<compile_context>
chip_gen: v6e
topology: v6e:2x2x1
jax: 0.10.0
libtpu: 0.0.40
codegen_flags: <defaults>
</compile_context>

<pallas_src>
import math

import jax
import jax.numpy as jnp
from jax.experimental import pallas as pl
from jax.experimental.pallas import tpu as pltpu

# ----------------------------------------------------------------------------
# Small synthetic config consistent with the module's forward
# ----------------------------------------------------------------------------
B = 2
IMG_C, IMG_H, IMG_W = 3, 16, 16
IN_DIMS = 128                    # stand-in for resnet50's 2048-dim features
OUT_DIMS = 5
N_NUM = 3                        # n_num_features
CAT_CARDS = [3, 5]               # cat_cardinalities
N_CAT = len(CAT_CARDS)
CMAX = max(CAT_CARDS)
D_TOKEN = 8
N_HEADS = 8                      # rtdl make_baseline default
HEAD_DIM = D_TOKEN // N_HEADS    # == 1 for the rtdl baseline config
FFN_D_HIDDEN = 6
N_BLOCKS = 2
TABLE_DIM = N_NUM + N_CAT
SEQ = TABLE_DIM + 1              # tokens + CLS (appended last)
IMG_FC_HIDDEN = 1024
IMG_FLAT = IMG_C * IMG_H * IMG_W

B_PAD = 16                       # sublane-friendly batch pad (bf16 packs 16)
OUT_SLAB = 128                   # lane-dense merged output width
HEAD_COLS = OUT_DIMS + N_NUM + N_CAT * CMAX
assert HEAD_COLS <= OUT_SLAB
# The fused attention below exploits head_dim == 1 (d_token=8, n_heads=8).
assert HEAD_DIM == 1, "fused attention kernel assumes rtdl baseline head_dim=1"

_VMEM = lambda: pl.BlockSpec(memory_space=pltpu.MemorySpace.VMEM)


# ----------------------------------------------------------------------------
# Fused image-head kernel:
#   backbone stand-in + img_fc + all masked con/cat heads, one dense output slab
#   out[:, 0:5]            = img_fc(feats)
#   out[:, 5:8]            = continuous heads
#   out[:, 8:8+2*CMAX]     = categorical heads (padded to CMAX each)
# ----------------------------------------------------------------------------
def _charms_head_kernel(img_ref, wbb_ref, bbb_ref, w1_ref, b1_ref,
                        w2p_ref, whp_ref, bout_ref, out_ref):
    # backbone stand-in: extracted_feats = flatten(img) @ W_bb + b_bb   (f32)
    feats = jnp.dot(img_ref[...], wbb_ref[...],
                    preferred_element_type=jnp.float32) + bbb_ref[...]

    # img_fc hidden: Linear(IN_DIMS, 1024)
    h = jnp.dot(feats.astype(jnp.bfloat16), w1_ref[...],
                preferred_element_type=jnp.float32) + b1_ref[...]

    # merged output: img_fc second Linear (columns 0:5, zero elsewhere) +
    # mask-folded con/cat heads (columns 5:18, zero elsewhere) + merged bias.
    out_ref[...] = (
        jnp.dot(h.astype(jnp.bfloat16), w2p_ref[...],
                preferred_element_type=jnp.float32)
        + jnp.dot(feats.astype(jnp.bfloat16), whp_ref[...],
                  preferred_element_type=jnp.float32)
        + bout_ref[...])


def charms_image_head(img_flat, p):
    bsz = img_flat.shape[0]
    assert bsz <= B_PAD

    f32 = jnp.float32
    mask = p['mask'].astype(f32)

    # fold per-column masks into the head weights (exact: mask is all-ones).
    con_w_m = p['con_w'] * mask[:N_NUM].T                       # (IN_DIMS, N_NUM)
    cat_w_m = p['cat_w'] * mask[N_NUM:][:, :, None]             # (N_CAT, IN_DIMS, CMAX)
    cat_w_flat = jnp.concatenate([cat_w_m[i] for i in range(N_CAT)], axis=1)
    w_heads = jnp.concatenate([con_w_m, cat_w_flat], axis=1)    # (IN_DIMS, 13)
    b_heads = jnp.concatenate([p['con_b'], p['cat_b'].reshape(-1)])

    # lane-dense merged projection weights / bias (zero-padded to 128 lanes)
    w2p = jnp.pad(p['w2'], ((0, 0), (0, OUT_SLAB - OUT_DIMS)))
    whp = jnp.concatenate(
        [jnp.zeros((IN_DIMS, OUT_DIMS), f32), w_heads], axis=1)
    whp = jnp.pad(whp, ((0, 0), (0, OUT_SLAB - whp.shape[1])))
    bout = jnp.concatenate([p['b2'], b_heads])
    bout = jnp.pad(bout, (0, OUT_SLAB - bout.shape[0]))[None, :]

    # pad batch to B_PAD rows; cast MXU operands to bf16 (f32 accumulation)
    img_pad = jnp.pad(img_flat, ((0, B_PAD - bsz), (0, 0))).astype(jnp.bfloat16)

    args = (img_pad,
            p['w_bb'].astype(jnp.bfloat16), p['b_bb'][None, :],
            p['w1'].astype(jnp.bfloat16), p['b1'][None, :],
            w2p.astype(jnp.bfloat16), whp.astype(jnp.bfloat16), bout)

    out = pl.pallas_call(
        _charms_head_kernel,
        out_shape=jax.ShapeDtypeStruct((B_PAD, OUT_SLAB), f32),
        in_specs=[_VMEM() for _ in args],
        out_specs=_VMEM(),
    )(*args)

    out = out[:bsz]
    img_out = out[:, :OUT_DIMS]
    con_out = [out[:, OUT_DIMS + i] for i in range(N_NUM)]
    base = OUT_DIMS + N_NUM
    # padded columns card_i..CMAX-1 are garbage by construction; sliced off here
    cat_out = [out[:, base + i * CMAX: base + i * CMAX + CAT_CARDS[i]]
               for i in range(N_CAT)]
    return img_out, con_out, cat_out


# ----------------------------------------------------------------------------
# Fused rtdl FT-Transformer kernel (baseline: pre-norm, ReGLU FFN, CLS last,
# head = LN -> ReLU -> Linear on CLS).  One launch for both blocks + head.
# ----------------------------------------------------------------------------
def _ft_transformer_kernel(tok_ref, wqkv_ref, bqkv_ref, wo_ref, bo_ref,
                           aln_w_ref, aln_b_ref, fln_w_ref, fln_b_ref,
                           f1w_ref, f1b_ref, f2w_ref, f2b_ref,
                           hln_w_ref, hln_b_ref, hw_ref, hb_ref, out_ref):
    bsz, s, d = tok_ref.shape
    x = tok_ref[...].reshape(bsz * s, d)

    def layer_norm(v, w, b, eps=1e-5):
        mu = jnp.mean(v, axis=-1, keepdims=True)
        var = jnp.mean((v - mu) ** 2, axis=-1, keepdims=True)
        return (v - mu) * jax.lax.rsqrt(var + eps) * w + b

    inv_scale = 1.0 / math.sqrt(HEAD_DIM)

    for l in range(N_BLOCKS):
        # ---- multi-head self-attention (pre-norm; block 0 skips the norm) ----
        xn = x if l == 0 else layer_norm(x, aln_w_ref[l], aln_b_ref[l])
        qkv = jnp.dot(xn, wqkv_ref[l],
                      preferred_element_type=jnp.float32) + bqkv_ref[l]
        # head_dim == 1 -> per-head logits are scalar products; broadcast form.
        q = qkv[:, 0 * d:1 * d].reshape(bsz, s, 1, d)   # queries
        k = qkv[:, 1 * d:2 * d].reshape(bsz, 1, s, d)   # keys
        v = qkv[:, 2 * d:3 * d].reshape(bsz, 1, s, d)   # values
        logits = (q * k) * inv_scale                     # (B, Sq, Sk, H)
        logits = logits - jnp.max(logits, axis=2, keepdims=True)
        e = jnp.exp(logits)
        probs = e * pl.reciprocal(jnp.sum(e, axis=2, keepdims=True), approx=True)
        attn = jnp.sum(probs * v, axis=2, keepdims=True)  # (B, Sq, 1, H)
        attn = attn.reshape(bsz * s, d)
        x = x + (jnp.dot(attn, wo_ref[l],
                         preferred_element_type=jnp.float32) + bo_ref[l])

        # ---- ReGLU FFN (pre-norm) ----
        xn = layer_norm(x, fln_w_ref[l], fln_b_ref[l])
        hdn = jnp.dot(xn, f1w_ref[l],
                      preferred_element_type=jnp.float32) + f1b_ref[l]
        a = hdn[:, :FFN_D_HIDDEN]
        g = hdn[:, FFN_D_HIDDEN:]
        hdn = a * jnp.maximum(g, 0.0)
        x = x + (jnp.dot(hdn, f2w_ref[l],
                         preferred_element_type=jnp.float32) + f2b_ref[l])

    # ---- head on CLS token (last position): LN -> ReLU -> Linear ----
    cls = x.reshape(bsz, s, d)[:, s - 1:s, :].reshape(bsz, d)
    cls = layer_norm(cls, hln_w_ref[...], hln_b_ref[...])
    cls = jnp.maximum(cls, 0.0)
    out_ref[...] = (jnp.dot(cls, hw_ref[...],
                            preferred_element_type=jnp.float32) + hb_ref[...])


def ft_transformer(tab_con, tab_cat, p):
    bsz = tab_con.shape[0]

    # --- feature tokenizer (XLA: the embedding gather has no clean Pallas path)
    num_tokens = tab_con[:, :, None] * p['num_w'][None] + p['num_b'][None]
    idx = tab_cat + p['cat_offsets'][None, :]
    cat_tokens = p['cat_emb'][idx] + p['cat_b'][None]
    cls = jnp.broadcast_to(p['cls'][None, None, :], (bsz, 1, D_TOKEN))
    tokens = jnp.concatenate([num_tokens, cat_tokens, cls], axis=1)  # (B, S, D)

    blocks = p['blocks']
    stk = lambda name: jnp.stack([blk[name] for blk in blocks])
    stk_row = lambda name: jnp.stack([blk[name][None, :] for blk in blocks])

    wqkv = jnp.stack([jnp.concatenate([blk['wq'], blk['wk'], blk['wv']], axis=1)
                      for blk in blocks])                          # (L, D, 3D)
    bqkv = jnp.stack([jnp.concatenate([blk['bq'], blk['bk'], blk['bv']])[None, :]
                      for blk in blocks])                          # (L, 1, 3D)

    head_w = jnp.pad(p['head_w'], ((0, 0), (0, OUT_SLAB - OUT_DIMS)))
    head_b = jnp.pad(p['head_b'], (0, OUT_SLAB - OUT_DIMS))[None, :]

    args = (tokens,
            wqkv, bqkv, stk('wo'), stk_row('bo'),
            stk_row('attn_ln_w'), stk_row('attn_ln_b'),
            stk_row('ffn_ln_w'), stk_row('ffn_ln_b'),
            stk('f1_w'), stk_row('f1_b'), stk('f2_w'), stk_row('f2_b'),
            p['head_ln_w'][None, :], p['head_ln_b'][None, :],
            head_w, head_b)

    out = pl.pallas_call(
        _ft_transformer_kernel,
        out_shape=jax.ShapeDtypeStruct((bsz, OUT_SLAB), jnp.float32),
        in_specs=[_VMEM() for _ in args],
        out_specs=_VMEM(),
    )(*args)

    return tokens, out[:, :OUT_DIMS]


# ----------------------------------------------------------------------------
# Full ImageClassifier.forward
# ----------------------------------------------------------------------------
def image_classifier_forward(img, tab_con, tab_cat, params):
    img_flat = img.reshape(img.shape[0], IMG_FLAT)   # NCHW -> (B, C*H*W)
    img_out, con_out, cat_out = charms_image_head(img_flat, params)
    _table_features_embed, table_embed_out = ft_transformer(
        tab_con, tab_cat, params['tab'])
    return img_out, con_out, cat_out, table_embed_out


# ----------------------------------------------------------------------------
# Deterministic parameter initialization
# ----------------------------------------------------------------------------
def init_params(key):
    ks = iter(jax.random.split(key, 64))

    def w(shape, scale=0.02):
        return scale * jax.random.normal(next(ks), shape, dtype=jnp.float32)

    params = dict(
        w_bb=w((IMG_FLAT, IN_DIMS)), b_bb=w((IN_DIMS,)),
        w1=w((IN_DIMS, IMG_FC_HIDDEN)), b1=w((IMG_FC_HIDDEN,)),
        w2=w((IMG_FC_HIDDEN, OUT_DIMS)), b2=w((OUT_DIMS,)),
        mask=jnp.ones((TABLE_DIM, IN_DIMS), dtype=jnp.float32),   # torch.ones
        con_w=w((IN_DIMS, N_NUM)), con_b=w((N_NUM,)),
        cat_w=w((N_CAT, IN_DIMS, CMAX)), cat_b=w((N_CAT, CMAX)),
    )

    blocks = []
    for _ in range(N_BLOCKS):
        blocks.append(dict(
            wq=w((D_TOKEN, D_TOKEN)), bq=w((D_TOKEN,)),
            wk=w((D_TOKEN, D_TOKEN)), bk=w((D_TOKEN,)),
            wv=w((D_TOKEN, D_TOKEN)), bv=w((D_TOKEN,)),
            wo=w((D_TOKEN, D_TOKEN)), bo=w((D_TOKEN,)),
            attn_ln_w=jnp.ones((D_TOKEN,), jnp.float32),
            attn_ln_b=jnp.zeros((D_TOKEN,), jnp.float32),
            ffn_ln_w=jnp.ones((D_TOKEN,), jnp.float32),
            ffn_ln_b=jnp.zeros((D_TOKEN,), jnp.float32),
            f1_w=w((D_TOKEN, 2 * FFN_D_HIDDEN)), f1_b=w((2 * FFN_D_HIDDEN,)),
            f2_w=w((FFN_D_HIDDEN, D_TOKEN)), f2_b=w((D_TOKEN,)),
        ))

    offsets = [0]
    for c in CAT_CARDS[:-1]:
        offsets.append(offsets[-1] + c)

    params['tab'] = dict(
        num_w=w((N_NUM, D_TOKEN)), num_b=w((N_NUM, D_TOKEN)),
        cat_emb=w((sum(CAT_CARDS), D_TOKEN)), cat_b=w((N_CAT, D_TOKEN)),
        cat_offsets=jnp.array(offsets, dtype=jnp.int32),
        cls=w((D_TOKEN,)),
        blocks=blocks,
        head_ln_w=jnp.ones((D_TOKEN,), jnp.float32),
        head_ln_b=jnp.zeros((D_TOKEN,), jnp.float32),
        head_w=w((D_TOKEN, OUT_DIMS)), head_b=w((OUT_DIMS,)),
    )
    return params


if __name__ == "__main__":
    key = jax.random.PRNGKey(0)
    k_img, k_con, k_cat, k_param = jax.random.split(key, 4)

    img = jax.random.normal(k_img, (B, IMG_C, IMG_H, IMG_W), dtype=jnp.float32)
    tab_con = jax.random.normal(k_con, (B, N_NUM), dtype=jnp.float32)
    tab_cat = jnp.stack(
        [jax.random.randint(jax.random.fold_in(k_cat, i), (B,), 0, CAT_CARDS[i])
         for i in range(N_CAT)], axis=1).astype(jnp.int32)

    params = init_params(k_param)

    fwd = jax.jit(image_classifier_forward)
    img_out, con_out, cat_out, table_embed_out = fwd(img, tab_con, tab_cat, params)
    jax.block_until_ready((img_out, con_out, cat_out, table_embed_out))

    assert img_out.shape == (B, OUT_DIMS)
    assert len(con_out) == N_NUM and all(c.shape == (B,) for c in con_out)
    assert len(cat_out) == N_CAT
    assert all(cat_out[i].shape == (B, CAT_CARDS[i]) for i in range(N_CAT))
    assert table_embed_out.shape == (B, OUT_DIMS)
    assert all(bool(jnp.all(jnp.isfinite(a))) for a in
               [img_out, table_embed_out] + list(con_out) + list(cat_out))

    print("KERNEL_OK")
</pallas_src>

<mosaic_0001>
module attributes {stable_mosaic.version = 11 : i64} {
  func.func @_ft_transformer_kernel(%arg0: memref<2x6x8xf32, #tpu.memory_space<vmem>>, %arg1: memref<2x8x24xf32, #tpu.memory_space<vmem>>, %arg2: memref<2x1x24xf32, #tpu.memory_space<vmem>>, %arg3: memref<2x8x8xf32, #tpu.memory_space<vmem>>, %arg4: memref<2x1x8xf32, #tpu.memory_space<vmem>>, %arg5: memref<2x1x8xf32, #tpu.memory_space<vmem>>, %arg6: memref<2x1x8xf32, #tpu.memory_space<vmem>>, %arg7: memref<2x1x8xf32, #tpu.memory_space<vmem>>, %arg8: memref<2x1x8xf32, #tpu.memory_space<vmem>>, %arg9: memref<2x8x12xf32, #tpu.memory_space<vmem>>, %arg10: memref<2x1x12xf32, #tpu.memory_space<vmem>>, %arg11: memref<2x6x8xf32, #tpu.memory_space<vmem>>, %arg12: memref<2x1x8xf32, #tpu.memory_space<vmem>>, %arg13: memref<1x8xf32, #tpu.memory_space<vmem>>, %arg14: memref<1x8xf32, #tpu.memory_space<vmem>>, %arg15: memref<8x128xf32, #tpu.memory_space<vmem>>, %arg16: memref<1x128xf32, #tpu.memory_space<vmem>>, %arg17: memref<2x128xf32, #tpu.memory_space<vmem>>) attributes {dimension_semantics = [], scalar_prefetch = 0 : i64, scratch_operands = 0 : i64, tpu.core_type = #tpu.core_type<tc>} {
    %c0 = arith.constant 0 : index
    %c0_0 = arith.constant 0 : index
    %c0_1 = arith.constant 0 : index
    %0 = vector.load %arg0[%c0, %c0_0, %c0_1] : memref<2x6x8xf32, #tpu.memory_space<vmem>>, vector<2x6x8xf32>
    %1 = vector.shape_cast %0 : vector<2x6x8xf32> to vector<12x8xf32>
    %c0_2 = arith.constant 0 : index
    %c0_3 = arith.constant 0 : index
    %c0_4 = arith.constant 0 : index
    %2 = vector.load %arg1[%c0_2, %c0_3, %c0_4] : memref<2x8x24xf32, #tpu.memory_space<vmem>>, vector<1x8x24xf32>
    %3 = vector.shape_cast %2 : vector<1x8x24xf32> to vector<8x24xf32>
    %cst = arith.constant dense<0.000000e+00> : vector<12x24xf32>
    %4 = tpu.matmul %1, %3, %cst {dimension_numbers = #tpu.dot_dimension_numbers<[1], [0], [0], [1], [0, 0, 1, 1], [], []>} : vector<12x8xf32>, vector<8x24xf32>, vector<12x24xf32> -> vector<12x24xf32>
    %c0_5 = arith.constant 0 : index
    %c0_6 = arith.constant 0 : index
    %c0_7 = arith.constant 0 : index
    %5 = vector.load %arg2[%c0_5, %c0_6, %c0_7] : memref<2x1x24xf32, #tpu.memory_space<vmem>>, vector<1x1x24xf32>
    %6 = vector.shape_cast %5 : vector<1x1x24xf32> to vector<1x24xf32>
    %7 = vector.broadcast %6 : vector<1x24xf32> to vector<12x24xf32>
    %8 = arith.addf %4, %7 : vector<12x24xf32>
    %9 = vector.extract_strided_slice %8 {offsets = [0, 0], sizes = [12, 8], strides = [1, 1]} : vector<12x24xf32> to vector<12x8xf32>
    %10 = vector.shape_cast %9 : vector<12x8xf32> to vector<2x6x1x8xf32>
    %11 = vector.extract_strided_slice %8 {offsets = [0, 8], sizes = [12, 8], strides = [1, 1]} : vector<12x24xf32> to vector<12x8xf32>
    %12 = vector.shape_cast %11 : vector<12x8xf32> to vector<2x1x6x8xf32>
    %13 = vector.extract_strided_slice %8 {offsets = [0, 16], sizes = [12, 8], strides = [1, 1]} : vector<12x24xf32> to vector<12x8xf32>
    %14 = vector.shape_cast %13 : vector<12x8xf32> to vector<2x1x6x8xf32>
    %15 = vector.broadcast %10 : vector<2x6x1x8xf32> to vector<2x6x6x8xf32>
    %16 = vector.broadcast %12 : vector<2x1x6x8xf32> to vector<2x6x6x8xf32>
    %17 = arith.mulf %15, %16 : vector<2x6x6x8xf32>
    %cst_8 = arith.constant 1.000000e+00 : f32
    %18 = vector.broadcast %cst_8 : f32 to vector<2x6x6x8xf32>
    %19 = arith.mulf %17, %18 : vector<2x6x6x8xf32>
    %cst_9 = arith.constant dense<0xFF800000> : vector<2x6x8xf32>
    %20 = vector.multi_reduction <maximumf>, %19, %cst_9 [2] : vector<2x6x6x8xf32> to vector<2x6x8xf32>
    %21 = vector.shape_cast %20 : vector<2x6x8xf32> to vector<2x6x1x8xf32>
    %22 = vector.broadcast %21 : vector<2x6x1x8xf32> to vector<2x6x6x8xf32>
    %23 = arith.subf %19, %22 : vector<2x6x6x8xf32>
    %24 = math.exp %23 : vector<2x6x6x8xf32>
    %cst_10 = arith.constant dense<0.000000e+00> : vector<2x6x8xf32>
    %25 = vector.multi_reduction <add>, %24, %cst_10 [2] : vector<2x6x6x8xf32> to vector<2x6x8xf32>
    %26 = vector.shape_cast %25 : vector<2x6x8xf32> to vector<2x6x1x8xf32>
    %27 = tpu.reciprocal %26 {approx = true} : vector<2x6x1x8xf32> -> vector<2x6x1x8xf32>
    %28 = vector.broadcast %27 : vector<2x6x1x8xf32> to vector<2x6x6x8xf32>
    %29 = arith.mulf %24, %28 : vector<2x6x6x8xf32>
    %30 = vector.broadcast %14 : vector<2x1x6x8xf32> to vector<2x6x6x8xf32>
    %31 = arith.mulf %29, %30 : vector<2x6x6x8xf32>
    %cst_11 = arith.constant dense<0.000000e+00> : vector<2x6x8xf32>
    %32 = vector.multi_reduction <add>, %31, %cst_11 [2] : vector<2x6x6x8xf32> to vector<2x6x8xf32>
    %33 = vector.shape_cast %32 : vector<2x6x8xf32> to vector<2x6x1x8xf32>
    %34 = vector.shape_cast %33 : vector<2x6x1x8xf32> to vector<12x8xf32>
    %c0_12 = arith.constant 0 : index
    %c0_13 = arith.constant 0 : index
    %c0_14 = arith.constant 0 : index
    %35 = vector.load %arg3[%c0_12, %c0_13, %c0_14] : memref<2x8x8xf32, #tpu.memory_space<vmem>>, vector<1x8x8xf32>
    %36 = vector.shape_cast %35 : vector<1x8x8xf32> to vector<8x8xf32>
    %cst_15 = arith.constant dense<0.000000e+00> : vector<12x8xf32>
    %37 = tpu.matmul %34, %36, %cst_15 {dimension_numbers = #tpu.dot_dimension_numbers<[1], [0], [0], [1], [0, 0, 1, 1], [], []>} : vector<12x8xf32>, vector<8x8xf32>, vector<12x8xf32> -> vector<12x8xf32>
    %c0_16 = arith.constant 0 : index
    %c0_17 = arith.constant 0 : index
    %c0_18 = arith.constant 0 : index
    %38 = vector.load %arg4[%c0_16, %c0_17, %c0_18] : memref<2x1x8xf32, #tpu.memory_space<vmem>>, vector<1x1x8xf32>
    %39 = vector.shape_cast %38 : vector<1x1x8xf32> to vector<1x8xf32>
    %40 = vector.broadcast %39 : vector<1x8xf32> to vector<12x8xf32>
    %41 = arith.addf %37, %40 : vector<12x8xf32>
    %42 = arith.addf %1, %41 : vector<12x8xf32>
    %c0_19 = arith.constant 0 : index
    %c0_20 = arith.constant 0 : index
    %c0_21 = arith.constant 0 : index
    %43 = vector.load %arg7[%c0_19, %c0_20, %c0_21] : memref<2x1x8xf32, #tpu.memory_space<vmem>>, vector<1x1x8xf32>
    %44 = vector.shape_cast %43 : vector<1x1x8xf32> to vector<1x8xf32>
    %c0_22 = arith.constant 0 : index
    %c0_23 = arith.constant 0 : index
    %c0_24 = arith.constant 0 : index
    %45 = vector.load %arg8[%c0_22, %c0_23, %c0_24] : memref<2x1x8xf32, #tpu.memory_space<vmem>>, vector<1x1x8xf32>
    %46 = vector.shape_cast %45 : vector<1x1x8xf32> to vector<1x8xf32>
    %cst_25 = arith.constant dense<0.000000e+00> : vector<12xf32>
    %47 = vector.multi_reduction <add>, %42, %cst_25 [1] : vector<12x8xf32> to vector<12xf32>
    %48 = vector.shape_cast %47 : vector<12xf32> to vector<12x1xf32>
    %cst_26 = arith.constant 8.000000e+00 : f32
    %49 = vector.broadcast %cst_26 : f32 to vector<12x1xf32>
    %50 = arith.divf %48, %49 : vector<12x1xf32>
    %51 = vector.broadcast %50 : vector<12x1xf32> to vector<12x8xf32>
    %52 = arith.subf %42, %51 : vector<12x8xf32>
    %53 = arith.mulf %52, %52 : vector<12x8xf32>
    %cst_27 = arith.constant dense<0.000000e+00> : vector<12xf32>
    %54 = vector.multi_reduction <add>, %53, %cst_27 [1] : vector<12x8xf32> to vector<12xf32>
    %55 = vector.shape_cast %54 : vector<12xf32> to vector<12x1xf32>
    %cst_28 = arith.constant 8.000000e+00 : f32
    %56 = vector.broadcast %cst_28 : f32 to vector<12x1xf32>
    %57 = arith.divf %55, %56 : vector<12x1xf32>
    %58 = vector.broadcast %50 : vector<12x1xf32> to vector<12x8xf32>
    %59 = arith.subf %42, %58 : vector<12x8xf32>
    %cst_29 = arith.constant 9.99999974E-6 : f32
    %60 = vector.broadcast %cst_29 : f32 to vector<12x1xf32>
    %61 = arith.addf %57, %60 : vector<12x1xf32>
    %62 = math.rsqrt %61 : vector<12x1xf32>
    %63 = vector.broadcast %62 : vector<12x1xf32> to vector<12x8xf32>
    %64 = arith.mulf %59, %63 : vector<12x8xf32>
    %65 = vector.broadcast %44 : vector<1x8xf32> to vector<12x8xf32>
    %66 = arith.mulf %64, %65 : vector<12x8xf32>
    %67 = vector.broadcast %46 : vector<1x8xf32> to vector<12x8xf32>
    %68 = arith.addf %66, %67 : vector<12x8xf32>
    %c0_30 = arith.constant 0 : index
    %c0_31 = arith.constant 0 : index
    %c0_32 = arith.constant 0 : index
    %69 = vector.load %arg9[%c0_30, %c0_31, %c0_32] : memref<2x8x12xf32, #tpu.memory_space<vmem>>, vector<1x8x12xf32>
    %70 = vector.shape_cast %69 : vector<1x8x12xf32> to vector<8x12xf32>
    %cst_33 = arith.constant dense<0.000000e+00> : vector<12x12xf32>
    %71 = tpu.matmul %68, %70, %cst_33 {dimension_numbers = #tpu.dot_dimension_numbers<[1], [0], [0], [1], [0, 0, 1, 1], [], []>} : vector<12x8xf32>, vector<8x12xf32>, vector<12x12xf32> -> vector<12x12xf32>
    %c0_34 = arith.constant 0 : index
    %c0_35 = arith.constant 0 : index
    %c0_36 = arith.constant 0 : index
    %72 = vector.load %arg10[%c0_34, %c0_35, %c0_36] : memref<2x1x12xf32, #tpu.memory_space<vmem>>, vector<1x1x12xf32>
    %73 = vector.shape_cast %72 : vector<1x1x12xf32> to vector<1x12xf32>
    %74 = vector.broadcast %73 : vector<1x12xf32> to vector<12x12xf32>
    %75 = arith.addf %71, %74 : vector<12x12xf32>
    %76 = vector.extract_strided_slice %75 {offsets = [0, 0], sizes = [12, 6], strides = [1, 1]} : vector<12x12xf32> to vector<12x6xf32>
    %77 = vector.extract_strided_slice %75 {offsets = [0, 6], sizes = [12, 6], strides = [1, 1]} : vector<12x12xf32> to vector<12x6xf32>
    %cst_37 = arith.constant 0.000000e+00 : f32
    %78 = vector.broadcast %cst_37 : f32 to vector<12x6xf32>
    %79 = arith.maximumf %77, %78 : vector<12x6xf32>
    %80 = arith.mulf %76, %79 : vector<12x6xf32>
    %c0_38 = arith.constant 0 : index
    %c0_39 = arith.constant 0 : index
    %c0_40 = arith.constant 0 : index
    %81 = vector.load %arg11[%c0_38, %c0_39, %c0_40] : memref<2x6x8xf32, #tpu.memory_space<vmem>>, vector<1x6x8xf32>
    %82 = vector.shape_cast %81 : vector<1x6x8xf32> to vector<6x8xf32>
    %cst_41 = arith.constant dense<0.000000e+00> : vector<12x8xf32>
    %83 = tpu.matmul %80, %82, %cst_41 {dimension_numbers = #tpu.dot_dimension_numbers<[1], [0], [0], [1], [0, 0, 1, 1], [], []>} : vector<12x6xf32>, vector<6x8xf32>, vector<12x8xf32> -> vector<12x8xf32>
    %c0_42 = arith.constant 0 : index
    %c0_43 = arith.constant 0 : index
    %c0_44 = arith.constant 0 : index
    %84 = vector.load %arg12[%c0_42, %c0_43, %c0_44] : memref<2x1x8xf32, #tpu.memory_space<vmem>>, vector<1x1x8xf32>
    %85 = vector.shape_cast %84 : vector<1x1x8xf32> to vector<1x8xf32>
    %86 = vector.broadcast %85 : vector<1x8xf32> to vector<12x8xf32>
    %87 = arith.addf %83, %86 : vector<12x8xf32>
    %88 = arith.addf %42, %87 : vector<12x8xf32>
    %c1 = arith.constant 1 : index
    %c0_45 = arith.constant 0 : index
    %c0_46 = arith.constant 0 : index
    %89 = vector.load %arg5[%c1, %c0_45, %c0_46] : memref<2x1x8xf32, #tpu.memory_space<vmem>>, vector<1x1x8xf32>
    %90 = vector.shape_cast %89 : vector<1x1x8xf32> to vector<1x8xf32>
    %c1_47 = arith.constant 1 : index
    %c0_48 = arith.constant 0 : index
    %c0_49 = arith.constant 0 : index
    %91 = vector.load %arg6[%c1_47, %c0_48, %c0_49] : memref<2x1x8xf32, #tpu.memory_space<vmem>>, vector<1x1x8xf32>
    %92 = vector.shape_cast %91 : vector<1x1x8xf32> to vector<1x8xf32>
    %cst_50 = arith.constant dense<0.000000e+00> : vector<12xf32>
    %93 = vector.multi_reduction <add>, %88, %cst_50 [1] : vector<12x8xf32> to vector<12xf32>
    %94 = vector.shape_cast %93 : vector<12xf32> to vector<12x1xf32>
    %cst_51 = arith.constant 8.000000e+00 : f32
    %95 = vector.broadcast %cst_51 : f32 to vector<12x1xf32>
    %96 = arith.divf %94, %95 : vector<12x1xf32>
    %97 = vector.broadcast %96 : vector<12x1xf32> to vector<12x8xf32>
    %98 = arith.subf %88, %97 : vector<12x8xf32>
    %99 = arith.mulf %98, %98 : vector<12x8xf32>
    %cst_52 = arith.constant dense<0.000000e+00> : vector<12xf32>
    %100 = vector.multi_reduction <add>, %99, %cst_52 [1] : vector<12x8xf32> to vector<12xf32>
    %101 = vector.shape_cast %100 : vector<12xf32> to vector<12x1xf32>
    %cst_53 = arith.constant 8.000000e+00 : f32
    %102 = vector.broadcast %cst_53 : f32 to vector<12x1xf32>
    %103 = arith.divf %101, %102 : vector<12x1xf32>
    %104 = vector.broadcast %96 : vector<12x1xf32> to vector<12x8xf32>
    %105 = arith.subf %88, %104 : vector<12x8xf32>
    %cst_54 = arith.constant 9.99999974E-6 : f32
    %106 = vector.broadcast %cst_54 : f32 to vector<12x1xf32>
    %107 = arith.addf %103, %106 : vector<12x1xf32>
    %108 = math.rsqrt %107 : vector<12x1xf32>
    %109 = vector.broadcast %108 : vector<12x1xf32> to vector<12x8xf32>
    %110 = arith.mulf %105, %109 : vector<12x8xf32>
    %111 = vector.broadcast %90 : vector<1x8xf32> to vector<12x8xf32>
    %112 = arith.mulf %110, %111 : vector<12x8xf32>
    %113 = vector.broadcast %92 : vector<1x8xf32> to vector<12x8xf32>
    %114 = arith.addf %112, %113 : vector<12x8xf32>
    %c1_55 = arith.constant 1 : index
    %c0_56 = arith.constant 0 : index
    %c0_57 = arith.constant 0 : index
    %115 = vector.load %arg1[%c1_55, %c0_56, %c0_57] : memref<2x8x24xf32, #tpu.memory_space<vmem>>, vector<1x8x24xf32>
    %116 = vector.shape_cast %115 : vector<1x8x24xf32> to vector<8x24xf32>
    %cst_58 = arith.constant dense<0.000000e+00> : vector<12x24xf32>
    %117 = tpu.matmul %114, %116, %cst_58 {dimension_numbers = #tpu.dot_dimension_numbers<[1], [0], [0], [1], [0, 0, 1, 1], [], []>} : vector<12x8xf32>, vector<8x24xf32>, vector<12x24xf32> -> vector<12x24xf32>
    %c1_59 = arith.constant 1 : index
    %c0_60 = arith.constant 0 : index
    %c0_61 = arith.constant 0 : index
    %118 = vector.load %arg2[%c1_59, %c0_60, %c0_61] : memref<2x1x24xf32, #tpu.memory_space<vmem>>, vector<1x1x24xf32>
    %119 = vector.shape_cast %118 : vector<1x1x24xf32> to vector<1x24xf32>
    %120 = vector.broadcast %119 : vector<1x24xf32> to vector<12x24xf32>
    %121 = arith.addf %117, %120 : vector<12x24xf32>
    %122 = vector.extract_strided_slice %121 {offsets = [0, 0], sizes = [12, 8], strides = [1, 1]} : vector<12x24xf32> to vector<12x8xf32>
    %123 = vector.shape_cast %122 : vector<12x8xf32> to vector<2x6x1x8xf32>
    %124 = vector.extract_strided_slice %121 {offsets = [0, 8], sizes = [12, 8], strides = [1, 1]} : vector<12x24xf32> to vector<12x8xf32>
    %125 = vector.shape_cast %124 : vector<12x8xf32> to vector<2x1x6x8xf32>
    %126 = vector.extract_strided_slice %121 {offsets = [0, 16], sizes = [12, 8], strides = [1, 1]} : vector<12x24xf32> to vector<12x8xf32>
    %127 = vector.shape_cast %126 : vector<12x8xf32> to vector<2x1x6x8xf32>
    %128 = vector.broadcast %123 : vector<2x6x1x8xf32> to vector<2x6x6x8xf32>
    %129 = vector.broadcast %125 : vector<2x1x6x8xf32> to vector<2x6x6x8xf32>
    %130 = arith.mulf %128, %129 : vector<2x6x6x8xf32>
    %cst_62 = arith.constant 1.000000e+00 : f32
    %131 = vector.broadcast %cst_62 : f32 to vector<2x6x6x8xf32>
    %132 = arith.mulf %130, %131 : vector<2x6x6x8xf32>
    %cst_63 = arith.constant dense<0xFF800000> : vector<2x6x8xf32>
    %133 = vector.multi_reduction <maximumf>, %132, %cst_63 [2] : vector<2x6x6x8xf32> to vector<2x6x8xf32>
    %134 = vector.shape_cast %133 : vector<2x6x8xf32> to vector<2x6x1x8xf32>
    %135 = vector.broadcast %134 : vector<2x6x1x8xf32> to vector<2x6x6x8xf32>
    %136 = arith.subf %132, %135 : vector<2x6x6x8xf32>
    %137 = math.exp %136 : vector<2x6x6x8xf32>
    %cst_64 = arith.constant dense<0.000000e+00> : vector<2x6x8xf32>
    %138 = vector.multi_reduction <add>, %137, %cst_64 [2] : vector<2x6x6x8xf32> to vector<2x6x8xf32>
    %139 = vector.shape_cast %138 : vector<2x6x8xf32> to vector<2x6x1x8xf32>
    %140 = tpu.reciprocal %139 {approx = true} : vector<2x6x1x8xf32> -> vector<2x6x1x8xf32>
    %141 = vector.broadcast %140 : vector<2x6x1x8xf32> to vector<2x6x6x8xf32>
    %142 = arith.mulf %137, %141 : vector<2x6x6x8xf32>
    %143 = vector.broadcast %127 : vector<2x1x6x8xf32> to vector<2x6x6x8xf32>
    %144 = arith.mulf %142, %143 : vector<2x6x6x8xf32>
    %cst_65 = arith.constant dense<0.000000e+00> : vector<2x6x8xf32>
    %145 = vector.multi_reduction <add>, %144, %cst_65 [2] : vector<2x6x6x8xf32> to vector<2x6x8xf32>
    %146 = vector.shape_cast %145 : vector<2x6x8xf32> to vector<2x6x1x8xf32>
    %147 = vector.shape_cast %146 : vector<2x6x1x8xf32> to vector<12x8xf32>
    %c1_66 = arith.constant 1 : index
    %c0_67 = arith.constant 0 : index
    %c0_68 = arith.constant 0 : index
    %148 = vector.load %arg3[%c1_66, %c0_67, %c0_68] : memref<2x8x8xf32, #tpu.memory_space<vmem>>, vector<1x8x8xf32>
    %149 = vector.shape_cast %148 : vector<1x8x8xf32> to vector<8x8xf32>
    %cst_69 = arith.constant dense<0.000000e+00> : vector<12x8xf32>
    %150 = tpu.matmul %147, %149, %cst_69 {dimension_numbers = #tpu.dot_dimension_numbers<[1], [0], [0], [1], [0, 0, 1, 1], [], []>} : vector<12x8xf32>, vector<8x8xf32>, vector<12x8xf32> -> vector<12x8xf32>
    %c1_70 = arith.constant 1 : index
    %c0_71 = arith.constant 0 : index
    %c0_72 = arith.constant 0 : index
    %151 = vector.load %arg4[%c1_70, %c0_71, %c0_72] : memref<2x1x8xf32, #tpu.memory_space<vmem>>, vector<1x1x8xf32>
    %152 = vector.shape_cast %151 : vector<1x1x8xf32> to vector<1x8xf32>
    %153 = vector.broadcast %152 : vector<1x8xf32> to vector<12x8xf32>
    %154 = arith.addf %150, %153 : vector<12x8xf32>
    %155 = arith.addf %88, %154 : vector<12x8xf32>
    %c1_73 = arith.constant 1 : index
    %c0_74 = arith.constant 0 : index
    %c0_75 = arith.constant 0 : index
    %156 = vector.load %arg7[%c1_73, %c0_74, %c0_75] : memref<2x1x8xf32, #tpu.memory_space<vmem>>, vector<1x1x8xf32>
    %157 = vector.shape_cast %156 : vector<1x1x8xf32> to vector<1x8xf32>
    %c1_76 = arith.constant 1 : index
    %c0_77 = arith.constant 0 : index
    %c0_78 = arith.constant 0 : index
    %158 = vector.load %arg8[%c1_76, %c0_77, %c0_78] : memref<2x1x8xf32, #tpu.memory_space<vmem>>, vector<1x1x8xf32>
    %159 = vector.shape_cast %158 : vector<1x1x8xf32> to vector<1x8xf32>
    %cst_79 = arith.constant dense<0.000000e+00> : vector<12xf32>
    %160 = vector.multi_reduction <add>, %155, %cst_79 [1] : vector<12x8xf32> to vector<12xf32>
    %161 = vector.shape_cast %160 : vector<12xf32> to vector<12x1xf32>
    %cst_80 = arith.constant 8.000000e+00 : f32
    %162 = vector.broadcast %cst_80 : f32 to vector<12x1xf32>
    %163 = arith.divf %161, %162 : vector<12x1xf32>
    %164 = vector.broadcast %163 : vector<12x1xf32> to vector<12x8xf32>
    %165 = arith.subf %155, %164 : vector<12x8xf32>
    %166 = arith.mulf %165, %165 : vector<12x8xf32>
    %cst_81 = arith.constant dense<0.000000e+00> : vector<12xf32>
    %167 = vector.multi_reduction <add>, %166, %cst_81 [1] : vector<12x8xf32> to vector<12xf32>
    %168 = vector.shape_cast %167 : vector<12xf32> to vector<12x1xf32>
    %cst_82 = arith.constant 8.000000e+00 : f32
    %169 = vector.broadcast %cst_82 : f32 to vector<12x1xf32>
    %170 = arith.divf %168, %169 : vector<12x1xf32>
    %171 = vector.broadcast %163 : vector<12x1xf32> to vector<12x8xf32>
    %172 = arith.subf %155, %171 : vector<12x8xf32>
    %cst_83 = arith.constant 9.99999974E-6 : f32
    %173 = vector.broadcast %cst_83 : f32 to vector<12x1xf32>
    %174 = arith.addf %170, %173 : vector<12x1xf32>
    %175 = math.rsqrt %174 : vector<12x1xf32>
    %176 = vector.broadcast %175 : vector<12x1xf32> to vector<12x8xf32>
    %177 = arith.mulf %172, %176 : vector<12x8xf32>
    %178 = vector.broadcast %157 : vector<1x8xf32> to vector<12x8xf32>
    %179 = arith.mulf %177, %178 : vector<12x8xf32>
    %180 = vector.broadcast %159 : vector<1x8xf32> to vector<12x8xf32>
    %181 = arith.addf %179, %180 : vector<12x8xf32>
    %c1_84 = arith.constant 1 : index
    %c0_85 = arith.constant 0 : index
    %c0_86 = arith.constant 0 : index
    %182 = vector.load %arg9[%c1_84, %c0_85, %c0_86] : memref<2x8x12xf32, #tpu.memory_space<vmem>>, vector<1x8x12xf32>
    %183 = vector.shape_cast %182 : vector<1x8x12xf32> to vector<8x12xf32>
    %cst_87 = arith.constant dense<0.000000e+00> : vector<12x12xf32>
    %184 = tpu.matmul %181, %183, %cst_87 {dimension_numbers = #tpu.dot_dimension_numbers<[1], [0], [0], [1], [0, 0, 1, 1], [], []>} : vector<12x8xf32>, vector<8x12xf32>, vector<12x12xf32> -> vector<12x12xf32>
    %c1_88 = arith.constant 1 : index
    %c0_89 = arith.constant 0 : index
    %c0_90 = arith.constant 0 : index
    %185 = vector.load %arg10[%c1_88, %c0_89, %c0_90] : memref<2x1x12xf32, #tpu.memory_space<vmem>>, vector<1x1x12xf32>
    %186 = vector.shape_cast %185 : vector<1x1x12xf32> to vector<1x12xf32>
    %187 = vector.broadcast %186 : vector<1x12xf32> to vector<12x12xf32>
    %188 = arith.addf %184, %187 : vector<12x12xf32>
    %189 = vector.extract_strided_slice %188 {offsets = [0, 0], sizes = [12, 6], strides = [1, 1]} : vector<12x12xf32> to vector<12x6xf32>
    %190 = vector.extract_strided_slice %188 {offsets = [0, 6], sizes = [12, 6], strides = [1, 1]} : vector<12x12xf32> to vector<12x6xf32>
    %cst_91 = arith.constant 0.000000e+00 : f32
    %191 = vector.broadcast %cst_91 : f32 to vector<12x6xf32>
    %192 = arith.maximumf %190, %191 : vector<12x6xf32>
    %193 = arith.mulf %189, %192 : vector<12x6xf32>
    %c1_92 = arith.constant 1 : index
    %c0_93 = arith.constant 0 : index
    %c0_94 = arith.constant 0 : index
    %194 = vector.load %arg11[%c1_92, %c0_93, %c0_94] : memref<2x6x8xf32, #tpu.memory_space<vmem>>, vector<1x6x8xf32>
    %195 = vector.shape_cast %194 : vector<1x6x8xf32> to vector<6x8xf32>
    %cst_95 = arith.constant dense<0.000000e+00> : vector<12x8xf32>
    %196 = tpu.matmul %193, %195, %cst_95 {dimension_numbers = #tpu.dot_dimension_numbers<[1], [0], [0], [1], [0, 0, 1, 1], [], []>} : vector<12x6xf32>, vector<6x8xf32>, vector<12x8xf32> -> vector<12x8xf32>
    %c1_96 = arith.constant 1 : index
    %c0_97 = arith.constant 0 : index
    %c0_98 = arith.constant 0 : index
    %197 = vector.load %arg12[%c1_96, %c0_97, %c0_98] : memref<2x1x8xf32, #tpu.memory_space<vmem>>, vector<1x1x8xf32>
    %198 = vector.shape_cast %197 : vector<1x1x8xf32> to vector<1x8xf32>
    %199 = vector.broadcast %198 : vector<1x8xf32> to vector<12x8xf32>
    %200 = arith.addf %196, %199 : vector<12x8xf32>
    %201 = arith.addf %155, %200 : vector<12x8xf32>
    %202 = vector.shape_cast %201 : vector<12x8xf32> to vector<2x6x8xf32>
    %203 = vector.extract_strided_slice %202 {offsets = [0, 5, 0], sizes = [2, 1, 8], strides = [1, 1, 1]} : vector<2x6x8xf32> to vector<2x1x8xf32>
    %204 = vector.shape_cast %203 : vector<2x1x8xf32> to vector<2x8xf32>
    %c0_99 = arith.constant 0 : index
    %c0_100 = arith.constant 0 : index
    %205 = vector.load %arg13[%c0_99, %c0_100] : memref<1x8xf32, #tpu.memory_space<vmem>>, vector<1x8xf32>
    %c0_101 = arith.constant 0 : index
    %c0_102 = arith.constant 0 : index
    %206 = vector.load %arg14[%c0_101, %c0_102] : memref<1x8xf32, #tpu.memory_space<vmem>>, vector<1x8xf32>
    %cst_103 = arith.constant dense<0.000000e+00> : vector<2xf32>
    %207 = vector.multi_reduction <add>, %204, %cst_103 [1] : vector<2x8xf32> to vector<2xf32>
    %208 = vector.shape_cast %207 : vector<2xf32> to vector<2x1xf32>
    %cst_104 = arith.constant 8.000000e+00 : f32
    %209 = vector.broadcast %cst_104 : f32 to vector<2x1xf32>
    %210 = arith.divf %208, %209 : vector<2x1xf32>
    %211 = vector.broadcast %210 : vector<2x1xf32> to vector<2x8xf32>
    %212 = arith.subf %204, %211 : vector<2x8xf32>
    %213 = arith.mulf %212, %212 : vector<2x8xf32>
    %cst_105 = arith.constant dense<0.000000e+00> : vector<2xf32>
    %214 = vector.multi_reduction <add>, %213, %cst_105 [1] : vector<2x8xf32> to vector<2xf32>
    %215 = vector.shape_cast %214 : vector<2xf32> to vector<2x1xf32>
    %cst_106 = arith.constant 8.000000e+00 : f32
    %216 = vector.broadcast %cst_106 : f32 to vector<2x1xf32>
    %217 = arith.divf %215, %216 : vector<2x1xf32>
    %218 = vector.broadcast %210 : vector<2x1xf32> to vector<2x8xf32>
    %219 = arith.subf %204, %218 : vector<2x8xf32>
    %cst_107 = arith.constant 9.99999974E-6 : f32
    %220 = vector.broadcast %cst_107 : f32 to vector<2x1xf32>
    %221 = arith.addf %217, %220 : vector<2x1xf32>
    %222 = math.rsqrt %221 : vector<2x1xf32>
    %223 = vector.broadcast %222 : vector<2x1xf32> to vector<2x8xf32>
    %224 = arith.mulf %219, %223 : vector<2x8xf32>
    %225 = vector.broadcast %205 : vector<1x8xf32> to vector<2x8xf32>
    %226 = arith.mulf %224, %225 : vector<2x8xf32>
    %227 = vector.broadcast %206 : vector<1x8xf32> to vector<2x8xf32>
    %228 = arith.addf %226, %227 : vector<2x8xf32>
    %cst_108 = arith.constant 0.000000e+00 : f32
    %229 = vector.broadcast %cst_108 : f32 to vector<2x8xf32>
    %230 = arith.maximumf %228, %229 : vector<2x8xf32>
    %c0_109 = arith.constant 0 : index
    %c0_110 = arith.constant 0 : index
    %231 = vector.load %arg15[%c0_109, %c0_110] : memref<8x128xf32, #tpu.memory_space<vmem>>, vector<8x128xf32>
    %cst_111 = arith.constant dense<0.000000e+00> : vector<2x128xf32>
    %232 = tpu.matmul %230, %231, %cst_111 {dimension_numbers = #tpu.dot_dimension_numbers<[1], [0], [0], [1], [0, 0, 1, 1], [], []>} : vector<2x8xf32>, vector<8x128xf32>, vector<2x128xf32> -> vector<2x128xf32>
    %c0_112 = arith.constant 0 : index
    %c0_113 = arith.constant 0 : index
    %233 = vector.load %arg16[%c0_112, %c0_113] : memref<1x128xf32, #tpu.memory_space<vmem>>, vector<1x128xf32>
    %234 = vector.broadcast %233 : vector<1x128xf32> to vector<2x128xf32>
    %235 = arith.addf %232, %234 : vector<2x128xf32>
    %c0_114 = arith.constant 0 : index
    %c0_115 = arith.constant 0 : index
    %236 = vector.load %arg17[%c0_114, %c0_115] : memref<2x128xf32, #tpu.memory_space<vmem>>, vector<2x128xf32>
    tpu.vector_store %arg17[%c0_114, %c0_115], %235 {strides = array<i32>} : memref<2x128xf32, #tpu.memory_space<vmem>>, vector<2x128xf32>,
    return
  }
}

module attributes {stable_mosaic.version = 11 : i64} {
  func.func @_charms_head_kernel(%arg0: memref<16x768xbf16, #tpu.memory_space<vmem>>, %arg1: memref<768x128xbf16, #tpu.memory_space<vmem>>, %arg2: memref<1x128xf32, #tpu.memory_space<vmem>>, %arg3: memref<128x1024xbf16, #tpu.memory_space<vmem>>, %arg4: memref<1x1024xf32, #tpu.memory_space<vmem>>, %arg5: memref<1024x128xbf16, #tpu.memory_space<vmem>>, %arg6: memref<128x128xbf16, #tpu.memory_space<vmem>>, %arg7: memref<1x128xf32, #tpu.memory_space<vmem>>, %arg8: memref<16x128xf32, #tpu.memory_space<vmem>>) attributes {dimension_semantics = [], scalar_prefetch = 0 : i64, scratch_operands = 0 : i64, tpu.core_type = #tpu.core_type<tc>} {
    %c0 = arith.constant 0 : index
    %c0_0 = arith.constant 0 : index
    %0 = vector.load %arg0[%c0, %c0_0] : memref<16x768xbf16, #tpu.memory_space<vmem>>, vector<16x768xbf16>
    %c0_1 = arith.constant 0 : index
    %c0_2 = arith.constant 0 : index
    %1 = vector.load %arg1[%c0_1, %c0_2] : memref<768x128xbf16, #tpu.memory_space<vmem>>, vector<768x128xbf16>
    %cst = arith.constant dense<0.000000e+00> : vector<16x128xf32>
    %2 = tpu.matmul %0, %1, %cst {dimension_numbers = #tpu.dot_dimension_numbers<[1], [0], [0], [1], [0, 0, 1, 1], [], []>} : vector<16x768xbf16>, vector<768x128xbf16>, vector<16x128xf32> -> vector<16x128xf32>
    %c0_3 = arith.constant 0 : index
    %c0_4 = arith.constant 0 : index
    %3 = vector.load %arg2[%c0_3, %c0_4] : memref<1x128xf32, #tpu.memory_space<vmem>>, vector<1x128xf32>
    %4 = vector.broadcast %3 : vector<1x128xf32> to vector<16x128xf32>
    %5 = arith.addf %2, %4 : vector<16x128xf32>
    %6 = arith.truncf %5 : vector<16x128xf32> to vector<16x128xbf16>
    %c0_5 = arith.constant 0 : index
    %c0_6 = arith.constant 0 : index
    %7 = vector.load %arg3[%c0_5, %c0_6] : memref<128x1024xbf16, #tpu.memory_space<vmem>>, vector<128x1024xbf16>
    %cst_7 = arith.constant dense<0.000000e+00> : vector<16x1024xf32>
    %8 = tpu.matmul %6, %7, %cst_7 {dimension_numbers = #tpu.dot_dimension_numbers<[1], [0], [0], [1], [0, 0, 1, 1], [], []>} : vector<16x128xbf16>, vector<128x1024xbf16>, vector<16x1024xf32> -> vector<16x1024xf32>
    %c0_8 = arith.constant 0 : index
    %c0_9 = arith.constant 0 : index
    %9 = vector.load %arg4[%c0_8, %c0_9] : memref<1x1024xf32, #tpu.memory_space<vmem>>, vector<1x1024xf32>
    %10 = vector.broadcast %9 : vector<1x1024xf32> to vector<16x1024xf32>
    %11 = arith.addf %8, %10 : vector<16x1024xf32>
    %12 = arith.truncf %11 : vector<16x1024xf32> to vector<16x1024xbf16>
    %c0_10 = arith.constant 0 : index
    %c0_11 = arith.constant 0 : index
    %13 = vector.load %arg5[%c0_10, %c0_11] : memref<1024x128xbf16, #tpu.memory_space<vmem>>, vector<1024x128xbf16>
    %cst_12 = arith.constant dense<0.000000e+00> : vector<16x128xf32>
    %14 = tpu.matmul %12, %13, %cst_12 {dimension_numbers = #tpu.dot_dimension_numbers<[1], [0], [0], [1], [0, 0, 1, 1], [], []>} : vector<16x1024xbf16>, vector<1024x128xbf16>, vector<16x128xf32> -> vector<16x128xf32>
    %15 = arith.truncf %5 : vector<16x128xf32> to vector<16x128xbf16>
    %c0_13 = arith.constant 0 : index
    %c0_14 = arith.constant 0 : index
    %16 = vector.load %arg6[%c0_13, %c0_14] : memref<128x128xbf16, #tpu.memory_space<vmem>>, vector<128x128xbf16>
    %cst_15 = arith.constant dense<0.000000e+00> : vector<16x128xf32>
    %17 = tpu.matmul %15, %16, %cst_15 {dimension_numbers = #tpu.dot_dimension_numbers<[1], [0], [0], [1], [0, 0, 1, 1], [], []>} : vector<16x128xbf16>, vector<128x128xbf16>, vector<16x128xf32> -> vector<16x128xf32>
    %18 = arith.addf %14, %17 : vector<16x128xf32>
    %c0_16 = arith.constant 0 : index
    %c0_17 = arith.constant 0 : index
    %19 = vector.load %arg7[%c0_16, %c0_17] : memref<1x128xf32, #tpu.memory_space<vmem>>, vector<1x128xf32>
    %20 = vector.broadcast %19 : vector<1x128xf32> to vector<16x128xf32>
    %21 = arith.addf %18, %20 : vector<16x128xf32>
    %c0_18 = arith.constant 0 : index
    %c0_19 = arith.constant 0 : index
    %22 = vector.load %arg8[%c0_18, %c0_19] : memref<16x128xf32, #tpu.memory_space<vmem>>, vector<16x128xf32>
    tpu.vector_store %arg8[%c0_18, %c0_19], %21 {strides = array<i32>} : memref<16x128xf32, #tpu.memory_space<vmem>>, vector<16x128xf32>,
    return
  }
}

</mosaic_0001>

<bundles_post_ra>
// kernel: image_classifier_forward.3
= control target key start
LH: loop header
LB: loop body
LE: loop exit
PB: predicated region body
PF: predicated region fallthrough
CT: control target
= control target key end

     0   :  { %s4447_s0 = inlined_call_operand.vmem [shape: f32[2,6,8], index: 0, kind: input, shape index: {}]   ;;  %s4448_s1 = inlined_call_operand.vmem [shape: f32[2,8,24], index: 1, kind: input, shape index: {}]   ;;  %s4449_s2 = inlined_call_operand.vmem [shape: f32[2,1,24], index: 2, kind: input, shape index: {}]   ;;  %s4450_s3 = inlined_call_operand.vmem [shape: f32[2,8,8], index: 3, kind: input, shape index: {}]   ;;  %s4451_s4 = inlined_call_operand.vmem [shape: f32[2,1,8], index: 4, kind: input, shape index: {}]   ;;  %s4452_s5 = inlined_call_operand.vmem [shape: f32[2,1,8], index: 5, kind: input, shape index: {}]   ;;  %s4453_s6 = inlined_call_operand.vmem [shape: f32[2,1,8], index: 6, kind: input, shape index: {}]   ;;  %s4454_s7 = inlined_call_operand.vmem [shape: f32[2,1,8], index: 7, kind: input, shape index: {}]   ;;  %s4455_s8 = inlined_call_operand.vmem [shape: f32[2,1,8], index: 8, kind: input, shape index: {}]   ;;  %s4456_s9 = inlined_call_operand.vmem [shape: f32[2,8,12], index: 9, kind: input, shape index: {}]   ;;  %s4457_s10 = inlined_call_operand.vmem [shape: f32[2,1,12], index: 10, kind: input, shape index: {}]   ;;  %s4458_s11 = inlined_call_operand.vmem [shape: f32[2,6,8], index: 11, kind: input, shape index: {}]   ;;  %s4459_s12 = inlined_call_operand.vmem [shape: f32[2,1,8], index: 12, kind: input, shape index: {}]   ;;  %s4460_s13 = inlined_call_operand.hbm [shape: f32[1,8], index: 13, kind: input, shape index: {}]   ;;  %s4461_s14 = inlined_call_operand.hbm [shape: f32[1,8], index: 14, kind: input, shape index: {}]   ;;  %s4462_s15 = inlined_call_operand.vmem [shape: f32[8,128], index: 15, kind: input, shape index: {}]   ;;  %s4463_s16 = inlined_call_operand.vmem [shape: f32[1,128], index: 16, kind: input, shape index: {}]   ;;  %s4464_s17 = inlined_call_operand.hbm [shape: f32[2,128], index: 17, kind: output, shape index: {}]  }
   0x1   :  { %4467 = sst [smem:[#allocation11_spill]] %s4447_s0 }
   0x2   :  { %4468 = sst [smem:[#allocation12_spill]] %s4448_s1 }
   0x3   :  { %22 = vsyncpa [#allocation3], 0 }
   0x4   :  { %23 = vsyncpa [#allocation6], 0 }
   0x5   :  { %24 = vsyncpa [#allocation4], 0  ;;  %s3601_s24 = smov [#allocation2]   ;;  %s3602_s26 = smov [#allocation5]  }
   0x6   :  { %s57_s25 = sshll.u32 %s3601_s24, 4  ;;  %s67_s27 = sshll.u32 %s3602_s26, 4  ;;  %s58_s25 = int_to_ptr.vmem [resolvable:$true] %s57_s25  ;;  %s68_s27 = int_to_ptr.vmem [resolvable:$true] %s67_s27 }
   0x7   :  { %s3543_s28 = scalar_lea.vmem %s58_s25, 16  ;;  %s3547_s29 = scalar_lea.vmem %s58_s25, 32 }
   0x8   :  { %p3544_p0 = scmp.ne.s32.totalorder %s58_s25, %s3543_s28  ;;  %p3548_p1 = scmp.lt.s32.totalorder %s58_s25, %s58_s25 }
   0x9   :  { %p3549_p2 = scmp.lt.s32.totalorder %s3547_s29, %s3543_s28 }
   0xb   :  { %p3550_p3 = por %p3549_p2, %p3548_p1 }
   0xd   :  { %p3551_p4 = pnand %p3550_p3, %p3544_p0 }
   0xf   :  { %3554 = shalt.err (!%p3551_p4)
}
  0x10   :  { %60 = dma.hbm_to_vmem [thread:$0]  %s4460_s13, 16, %s58_s25, [#allocation3]  }
  0x11   :  { %s3563_s18 = scalar_lea.vmem %s68_s27, 16  ;;  %s3567_s19 = scalar_lea.vmem %s68_s27, 32 }
  0x12   :  { %p3564_p5 = scmp.ne.s32.totalorder %s68_s27, %s3563_s18  ;;  %p3568_p6 = scmp.lt.s32.totalorder %s68_s27, %s68_s27 }
  0x13   :  { %p3569_p7 = scmp.lt.s32.totalorder %s3567_s19, %s3563_s18 }
  0x15   :  { %p3570_p8 = por %p3569_p7, %p3568_p6 }
  0x17   :  { %p3571_p9 = pnand %p3570_p8, %p3564_p5 }
  0x19   :  { %3574 = shalt.err (!%p3571_p9)
}
  0x1a   :  { %70 = dma.hbm_to_vmem [thread:$0]  %s4461_s14, 16, %s68_s27, [#allocation6]  }
  0x1b   :  { %3595 = dma.done.wait [#allocation3], 16  }
  0x1c   :  { %3596 = vsyncadd [#allocation3], 4294967280 }
  0x1d   :  { %3597 = dma.done.wait [#allocation6], 16  }
  0x1e   :  { %3598 = vsyncadd [#allocation6], 4294967280  ;;  %v89_v0 = vlaneseq  ;;  %v3603_v1 = vmov 1983009808   ;;  %s4469_s22 = sld [smem:[#allocation12_spill]]  ;;  %vm156_vm0 = vcmask 64512  }
  0x1f   :  { %v87_v2 = vunpack.c.l.s4 %v3603_v1  ;;  %s4470_s14 = sld [smem:[#allocation11_spill]]  ;;  %v3290_v25 = vld [vmem:[%s4449_s2] ss:$0 sm:$0xff]  ;;  %s3604_s29 = smov 112   ;;  %v3606_v45 = vmov 1966171168  }
  0x20   :  { %v3711_v3 = vshrl.u32 %v89_v0, 7  ;;  %s3605_s0 = smov 120   ;;  %v776_v44 = vld [vmem:[%s4450_s3] sm:$0xff]  ;;  %v240_v46 = vunpack.c.l.s4 %v3606_v45  ;;  %vm445_vm1 = vcmask 62464   ;;  %vm796_vm2 = vcmask 1041409   ;;  %s3611_s30 = smov 122  }
  0x21   :  { %v88_v4 = vunpack.c.0.s8 %v87_v2  ;;  %3369 = vmatprep.subr.mxu1 %v776_v44  ;;  %vm798_vm3 = vcmask 1042434   ;;  %vm800_vm4 = vcmask 1043459   ;;  %vm802_vm5 = vcmask 1044484   ;;  %s3614_s19 = smov [#allocation7]  }
  0x22   :  { %3370 = vmatpush3.msra.mxu1 %v776_v44  ;;  %v241_v47 = vunpack.c.0.s8 %v240_v46  ;;  %v3786_v59 = vsub.s32 0, %v3711_v3  ;;  %vm804_vm6 = vcmask 1045509   ;;  %vm806_vm7 = vcmask 1046534   ;;  %s3280_s1 = sshll.u32 %s3614_s19, 4  ;;  %s3281_s1 = int_to_ptr.vmem [resolvable:$true] %s3280_s1 }
  0x23   :  { %v3714_v5 = vsub.s32 %v88_v4, %v3711_v3  ;;  %vm808_vm8 = vcmask 1047559   ;;  %vm969_vm9 = vcmask 60416   ;;  %vm1348_vm10 = vcmask 1045504   ;;  %s3575_s20 = scalar_lea.vmem %s3281_s1, 32  ;;  %p3580_p11 = scmp.lt.s32.totalorder %s3281_s1, %s3281_s1 }
  0x24   :  { %v123_v6 = vld [vmem:[%s4469_s22] sm:$0xff]  ;;  %v3774_v48 = vsub.s32 %v241_v47, %v3711_v3  ;;  %vm1341_vm11 = vcmask 48128   ;;  %vm3081_vm12 = vcmask 59393   ;;  %vm3613_vm13 = vmmov 0   ;;  %p3576_p10 = scmp.ne.s32.totalorder %s3281_s1, %s3575_s20  ;;  %p3581_p12 = scmp.lt.s32.totalorder %s3575_s20, %s3575_s20 }
  0x25   :  { %v81_v7 = vld [vmem:[%s4470_s14] sm:$0x3f]  ;;  %v82_v8 = vld [vmem:[%s4470_s14 + $0x8] sm:$0x3f]  ;;  %3364 = vmatprep.subr.mxu0 %v123_v6 }
  0x26   :  { %v85_v9 = vcombine.high %v81_v7, %v81_v7  ;;  %v3726_v10 = vrot.slane %v81_v7, %v3714_v5  ;;  %v101_v11 = vcombine.high %v82_v8, %v82_v8  ;;  %v3729_v12 = vrot.slane %v82_v8, %v3714_v5  ;;  %3365 = vmatpush3.msra.mxu0 %v123_v6  ;;  %p3582_p13 = por %p3581_p12, %p3580_p11 }
  0x28   :  { %v3732_v13 = vrot.slane %v85_v9, %v3714_v5  ;;  %v3736_v14 = vcombine.high %v3726_v10, %v3726_v10  ;;  %v3739_v15 = vrot.slane %v101_v11, %v3714_v5  ;;  %v3743_v16 = vcombine.high %v3729_v12, %v3729_v12  ;;  %p3583_p0 = pnand %p3582_p13, %p3576_p10 }
  0x2a   :  { %v131_v17 = vcombine.low %v3726_v10, %v3736_v14  ;;  %v132_v18 = vcombine.low %v3732_v13, %v3729_v12  ;;  %v148_v19 = vcombine.low %v3743_v16, %v3739_v15 }
  0x2c   :  { %v139_v20 = vrot.slane %v131_v17, %v3714_v5  ;;  %v146_v21 = vrot.slane %v132_v18, %v3714_v5  ;;  %v155_v22 = vrot.slane %v148_v19, %v3714_v5 }
  0x2e   :  { %v147_v23 = vcombine.low %v139_v20, %v146_v21 }
  0x30   :  { %3366 = vmatprep.mubr.msk.f32.mxu0 %vm156_vm0, %v147_v23 }
  0x31   :  { %3367 = vmatmul.mubr.msk.f32.vlgmr.msra.gmra.mxu0 %vm156_vm0, %v155_v22 }
  0xf1   :  { %v3368_v24 = vpop.f32.mrf.mxu0 }
  0xf2   :  { %v233_v29 = vadd.f32 %v3368_v24, %v3290_v25 }
  0xf3   :  { %v227_v26 = vpop.f32.mrf.mxu0 }
  0xf4   :  { %v228_v27 = vadd.f32 %v3290_v25, %v227_v26  ;;  %v333_v33 = vrot.slane %v233_v29, %v3714_v5  ;;  %v293_v50 = vrot.slane %v233_v29, %v3774_v48 }
  0xf6   :  { %v238_v28 = vcombine.high %v228_v27, %v228_v27  ;;  %v317_v30 = vrot.slane %v228_v27, %v3714_v5  ;;  %v334_v37 = vcombine.high %v333_v33, %v333_v33  ;;  %v245_v49 = vrot.slane %v228_v27, %v3774_v48 }
  0xf7   :  { %v294_v53 = vcombine.high %v293_v50, %v293_v50  ;;  %v301_v57 = vrot.slane %v293_v50, %v3774_v48 }
  0xf8   :  { %v325_v31 = vcombine.high %v317_v30, %v317_v30  ;;  %v324_v32 = vrot.slane %v238_v28, %v3714_v5  ;;  %v425_v42 = vrot.slane %v334_v37, %v3714_v5  ;;  %v253_v51 = vcombine.high %v245_v49, %v245_v49 }
  0xf9   :  { %v252_v52 = vrot.slane %v238_v28, %v3774_v48  ;;  %v261_v54 = vrot.slane %v245_v49, %v3774_v48  ;;  %v3783_v58 = vrot.slane %v294_v53, %v3774_v48  ;;  %v309_v0 = vcombine.high %v301_v57, %v301_v57 }
  0xfa   :  { %v395_v34 = vcombine.low %v317_v30, %v325_v31  ;;  %v409_v36 = vrot.slane %v324_v32, %v3714_v5  ;;  %v326_v38 = vcombine.high %v324_v32, %v324_v32  ;;  %v275_v55 = vrot.slane %v253_v51, %v3774_v48 }
  0xfb   :  { %v254_v56 = vcombine.high %v252_v52, %v252_v52  ;;  %v283_v60 = vcombine.high %v261_v54, %v261_v54  ;;  %v268_v62 = vrot.slane %v252_v52, %v3774_v48  ;;  %v310_v1 = vcombine.high %v3783_v58, %v3783_v58 }
  0xfc   :  { %v402_v35 = vrot.slane %v395_v34, %v3714_v5  ;;  %v411_v40 = vcombine.low %v326_v38, %v333_v33  ;;  %v285_v61 = vcombine.high %v275_v55, %v275_v55  ;;  %v370_v2 = vrot.slane %v301_v57, %v3786_v59 }
  0xfd   :  { %v282_v63 = vrot.slane %v254_v56, %v3774_v48  ;;  %v338_v4 = vrot.slane %v261_v54, %v3786_v59  ;;  %v342_v6 = vrot.slane %v275_v55, %v3786_v59  ;;  %v346_v7 = vrot.slane %v283_v60, %v3786_v59 }
  0xfe   :  { %v410_v39 = vcombine.low %v402_v35, %v409_v36  ;;  %v418_v41 = vrot.slane %v411_v40, %v3714_v5  ;;  %v350_v8 = vrot.slane %v285_v61, %v3786_v59  ;;  %v374_v9 = vrot.slane %v3783_v58, %v3786_v59 }
  0xff   :  { %v284_v11 = vcombine.high %v268_v62, %v268_v62  ;;  %v354_v17 = vrot.slane %v268_v62, %v3786_v59  ;;  %v358_v18 = vrot.slane %v282_v63, %v3786_v59  ;;  %v378_v24 = vrot.slane %v309_v0, %v3786_v59 }
 0x100   :  { %674 = vrot.lane.b32.xlu1 %v410_v39, %s3604_s29  ;;  %427 = vrot.lane.b32.xlu0 %v410_v39, %s3605_s0  ;;  %v426_v43 = vcombine.low %v418_v41, %v425_v42  ;;  %v286_v25 = vcombine.high %v282_v63, %v282_v63  ;;  %v382_v36 = vrot.slane %v310_v1, %v3786_v59 }
 0x101   :  { %v362_v37 = vrot.slane %v284_v11, %v3786_v59 }
 0x102   :  { %v366_v47 = vrot.slane %v286_v25, %v3786_v59 }
 0x104   :  { %676 = vrot.lane.b32.xlu1 %v426_v43, %s3604_s29  ;;  %429 = vrot.lane.b32.xlu0 %v426_v43, %s3605_s0 }
 0x172   :  { %v428_v19 = vpop.permute.xlu0 %427 }
 0x173   :  { %v3801_v20 = vmul.f32 %v428_v19, %v338_v4  ;;  %v3803_v21 = vmul.f32 %v428_v19, %v342_v6  ;;  %v3805_v22 = vmul.f32 %v428_v19, %v346_v7  ;;  %v3807_v23 = vmul.f32 %v428_v19, %v350_v8 }
 0x174   :  { %v3810_v26 = vmul.f32 %v428_v19, %v354_v17  ;;  %v3812_v27 = vmul.f32 %v428_v19, %v358_v18 }
 0x175   :  { %v446_v28 = vsel %vm445_vm1, %v3801_v20, -inf  ;;  %v453_v29 = vsel %vm445_vm1, %v3803_v21, -inf  ;;  %v460_v30 = vsel %vm445_vm1, %v3805_v22, -inf  ;;  %v467_v31 = vsel %vm445_vm1, %v3807_v23, -inf }
 0x176   :  { %v447_v32 = vrot.slane %v446_v28, 4  ;;  %v454_v33 = vrot.slane %v453_v29, 4  ;;  %v461_v34 = vrot.slane %v460_v30, 4  ;;  %v468_v35 = vrot.slane %v467_v31, 4  ;;  %v430_v40 = vpop.permute.xlu0 %429 }
 0x177   :  { %v474_v38 = vsel %vm445_vm1, %v3810_v26, -inf  ;;  %v481_v39 = vsel %vm445_vm1, %v3812_v27, -inf  ;;  %v3829_v49 = vmul.f32 %v430_v40, %v362_v37  ;;  %v3831_v56 = vmul.f32 %v430_v40, %v366_v47 }
 0x178   :  { %v448_v41 = vmax.f32 %v446_v28, %v447_v32  ;;  %v455_v42 = vmax.f32 %v453_v29, %v454_v33  ;;  %v462_v43 = vmax.f32 %v460_v30, %v461_v34  ;;  %v469_v44 = vmax.f32 %v467_v31, %v468_v35 }
 0x179   :  { %v475_v45 = vrot.slane %v474_v38, 4  ;;  %v482_v46 = vrot.slane %v481_v39, 4  ;;  %v3833_v57 = vmul.f32 %v430_v40, %v370_v2  ;;  %v3835_v1 = vmul.f32 %v430_v40, %v374_v9 }
 0x17a   :  { %v449_v50 = vrot.slane %v448_v41, 2  ;;  %v456_v51 = vrot.slane %v455_v42, 2  ;;  %v463_v52 = vrot.slane %v462_v43, 2  ;;  %v470_v53 = vrot.slane %v469_v44, 2 }
 0x17b   :  { %v476_v54 = vmax.f32 %v474_v38, %v475_v45  ;;  %v483_v55 = vmax.f32 %v481_v39, %v482_v46  ;;  %v3837_v4 = vmul.f32 %v430_v40, %v378_v24  ;;  %v488_v2 = vsel %vm445_vm1, %v3829_v49, -inf }
 0x17c   :  { %v450_v58 = vmax.f32 %v448_v41, %v449_v50  ;;  %v457_v60 = vmax.f32 %v455_v42, %v456_v51  ;;  %v464_v61 = vmax.f32 %v462_v43, %v463_v52  ;;  %v471_v62 = vmax.f32 %v469_v44, %v470_v53 }
 0x17d   :  { %v477_v63 = vrot.slane %v476_v54, 2  ;;  %v484_v0 = vrot.slane %v483_v55, 2  ;;  %v495_v19 = vsel %vm445_vm1, %v3831_v56, -inf  ;;  %v489_v24 = vrot.slane %v488_v2, 4 }
 0x17e   :  { %v451_v6 = vrot.slane %v450_v58, 1  ;;  %v458_v7 = vrot.slane %v457_v60, 1  ;;  %v465_v8 = vrot.slane %v464_v61, 1  ;;  %v472_v11 = vrot.slane %v471_v62, 1 }
 0x17f   :  { %v478_v17 = vmax.f32 %v476_v54, %v477_v63  ;;  %v485_v18 = vmax.f32 %v483_v55, %v484_v0  ;;  %v496_v32 = vrot.slane %v495_v19, 4  ;;  %v490_v41 = vmax.f32 %v488_v2, %v489_v24 }
 0x180   :  { %v452_v25 = vmax.f32 %v450_v58, %v451_v6  ;;  %v459_v28 = vmax.f32 %v457_v60, %v458_v7  ;;  %v466_v29 = vmax.f32 %v464_v61, %v465_v8  ;;  %v473_v30 = vmax.f32 %v471_v62, %v472_v11 }
 0x181   :  { %v479_v9 = vrot.slane %v478_v17, 1  ;;  %v486_v31 = vrot.slane %v485_v18, 1  ;;  %v497_v42 = vmax.f32 %v495_v19, %v496_v32  ;;  %v3847_v46 = vmul.f32 %v430_v40, %v382_v36 }
 0x182   :  { %v530_v33 = vsub.f32 %v3801_v20, %v452_v25  ;;  %v531_v34 = vsub.f32 %v3803_v21, %v459_v28  ;;  %v532_v35 = vsub.f32 %v3805_v22, %v466_v29  ;;  %v533_v37 = vsub.f32 %v3807_v23, %v473_v30 }
 0x183   :  { %v480_v38 = vmax.f32 %v478_v17, %v479_v9  ;;  %v487_v39 = vmax.f32 %v485_v18, %v486_v31  ;;  %v491_v51 = vrot.slane %v490_v41, 2  ;;  %v498_v21 = vrot.slane %v497_v42, 2 }
 0x184   :  { %v542_v43 = vmul.f32 1.442695, %v530_v33  ;;  %v544_v44 = vmul.f32 1.442695, %v531_v34  ;;  %v546_v45 = vmul.f32 1.442695, %v532_v35 }
 0x185   :  { %v534_v47 = vsub.f32 %v3810_v26, %v480_v38  ;;  %v535_v50 = vsub.f32 %v3812_v27, %v487_v39  ;;  %v548_v20 = vmul.f32 1.442695, %v533_v37  ;;  %v502_v22 = vsel %vm445_vm1, %v3833_v57, -inf }
 0x186   :  { %3425 = vpow2.f32 %v542_v43  ;;  %v509_v23 = vsel %vm445_vm1, %v3835_v1, -inf  ;;  %v492_v54 = vmax.f32 %v490_v41, %v491_v51  ;;  %v499_v36 = vmax.f32 %v497_v42, %v498_v21 }
 0x187   :  { %3427 = vpow2.f32 %v544_v44  ;;  %v550_v52 = vmul.f32 1.442695, %v534_v47  ;;  %v552_v53 = vmul.f32 1.442695, %v535_v50  ;;  %v503_v40 = vrot.slane %v502_v22, 4 }
 0x188   :  { %3429 = vpow2.f32 %v546_v45  ;;  %v510_v26 = vrot.slane %v509_v23, 4  ;;  %v493_v27 = vrot.slane %v492_v54, 1  ;;  %v516_v55 = vsel %vm445_vm1, %v3837_v4, -inf }
 0x189   :  { %3431 = vpow2.f32 %v548_v20  ;;  %v523_v58 = vsel %vm445_vm1, %v3847_v46, -inf  ;;  %v500_v60 = vrot.slane %v499_v36, 1  ;;  %v504_v61 = vmax.f32 %v502_v22, %v503_v40 }
 0x18a   :  { %3433 = vpow2.f32 %v550_v52  ;;  %v511_v62 = vmax.f32 %v509_v23, %v510_v26  ;;  %v494_v63 = vmax.f32 %v492_v54, %v493_v27  ;;  %v517_v0 = vrot.slane %v516_v55, 4 }
 0x18b   :  { %3435 = vpow2.f32 %v552_v53  ;;  %v524_v6 = vrot.slane %v523_v58, 4  ;;  %v501_v7 = vmax.f32 %v499_v36, %v500_v60  ;;  %v505_v8 = vrot.slane %v504_v61, 2 }
 0x18c   :  { %v512_v11 = vrot.slane %v511_v62, 2  ;;  %v518_v17 = vmax.f32 %v516_v55, %v517_v0  ;;  %v536_v2 = vsub.f32 %v3829_v49, %v494_v63 }
 0x18d   :  { %v525_v18 = vmax.f32 %v523_v58, %v524_v6  ;;  %v506_v19 = vmax.f32 %v504_v61, %v505_v8  ;;  %v537_v28 = vsub.f32 %v3831_v56, %v501_v7 }
 0x18e   :  { %v513_v25 = vmax.f32 %v511_v62, %v512_v11  ;;  %v519_v29 = vrot.slane %v518_v17, 2  ;;  %v554_v9 = vmul.f32 1.442695, %v536_v2 }
 0x18f   :  { %v526_v30 = vrot.slane %v525_v18, 2  ;;  %v507_v31 = vrot.slane %v506_v19, 1  ;;  %v556_v32 = vmul.f32 1.442695, %v537_v28 }
 0x190   :  { %v514_v24 = vrot.slane %v513_v25, 1  ;;  %v520_v33 = vmax.f32 %v518_v17, %v519_v29  ;;  %3437 = vpow2.f32 %v554_v9 }
 0x191   :  { %v527_v34 = vmax.f32 %v525_v18, %v526_v30  ;;  %v508_v35 = vmax.f32 %v506_v19, %v507_v31  ;;  %3439 = vpow2.f32 %v556_v32 }
 0x192   :  { %v515_v37 = vmax.f32 %v513_v25, %v514_v24  ;;  %v521_v39 = vrot.slane %v520_v33, 1 }
 0x193   :  { %v3861_v38 = vpop.eup %3425  ;;  %v528_v49 = vrot.slane %v527_v34, 1  ;;  %v538_v42 = vsub.f32 %v3833_v57, %v508_v35 }
 0x194   :  { %v3863_v41 = vpop.eup %3427  ;;  %v566_v56 = vsel %vm445_vm1, %v3861_v38, 0.0  ;;  %v539_v43 = vsub.f32 %v3835_v1, %v515_v37  ;;  %v522_v50 = vmax.f32 %v520_v33, %v521_v39 }
 0x195   :  { %v3869_v44 = vpop.eup %3429  ;;  %v567_v45 = vrot.slane %v566_v56, 4  ;;  %v573_v47 = vsel %vm445_vm1, %v3863_v41, 0.0  ;;  %v529_v20 = vmax.f32 %v527_v34, %v528_v49  ;;  %v558_v23 = vmul.f32 1.442695, %v538_v42 }
 0x196   :  { %v3873_v51 = vpop.eup %3431  ;;  %v574_v21 = vrot.slane %v573_v47, 4  ;;  %v580_v22 = vsel %vm445_vm1, %v3869_v44, 0.0  ;;  %v560_v52 = vmul.f32 1.442695, %v539_v43  ;;  %v540_v36 = vsub.f32 %v3837_v4, %v522_v50 }
 0x197   :  { %v3877_v53 = vpop.eup %3433  ;;  %v568_v57 = vadd.f32 %v567_v45, %v566_v56  ;;  %v581_v1 = vrot.slane %v580_v22, 4  ;;  %v587_v54 = vsel %vm445_vm1, %v3873_v51, 0.0  ;;  %v541_v58 = vsub.f32 %v3847_v46, %v529_v20 }
 0x198   :  { %v3882_v40 = vpop.eup %3435  ;;  %v575_v26 = vadd.f32 %v574_v21, %v573_v47  ;;  %v588_v27 = vrot.slane %v587_v54, 4  ;;  %v594_v55 = vsel %vm445_vm1, %v3877_v53, 0.0  ;;  %3441 = vpow2.f32 %v558_v23 }
 0x199   :  { %v569_v60 = vrot.slane %v568_v57, 2  ;;  %v582_v61 = vadd.f32 %v581_v1, %v580_v22  ;;  %v595_v62 = vrot.slane %v594_v55, 4  ;;  %v601_v63 = vsel %vm445_vm1, %v3882_v40, 0.0 }
 0x19a   :  { %v576_v0 = vrot.slane %v575_v26, 2  ;;  %v589_v6 = vadd.f32 %v588_v27, %v587_v54  ;;  %v602_v7 = vrot.slane %v601_v63, 4  ;;  %3443 = vpow2.f32 %v560_v52 }
 0x19b   :  { %v570_v4 = vadd.f32 %v569_v60, %v568_v57  ;;  %v583_v8 = vrot.slane %v582_v61, 2  ;;  %v596_v11 = vadd.f32 %v595_v62, %v594_v55  ;;  %v562_v19 = vmul.f32 1.442695, %v540_v36 }
 0x19c   :  { %v577_v17 = vadd.f32 %v576_v0, %v575_v26  ;;  %v590_v18 = vrot.slane %v589_v6, 2  ;;  %v603_v2 = vadd.f32 %v602_v7, %v601_v63  ;;  %v564_v29 = vmul.f32 1.442695, %v541_v58 }
 0x19d   :  { %v571_v25 = vrot.slane %v570_v4, 1  ;;  %v584_v46 = vadd.f32 %v583_v8, %v582_v61  ;;  %v597_v28 = vrot.slane %v596_v11, 2  ;;  %v3889_v30 = vpop.eup %3437  ;;  %3445 = vpow2.f32 %v562_v19 }
 0x19e   :  { %v578_v9 = vrot.slane %v577_v17, 1  ;;  %v591_v31 = vadd.f32 %v590_v18, %v589_v6  ;;  %v604_v24 = vrot.slane %v603_v2, 2  ;;  %v3891_v32 = vpop.eup %3439  ;;  %3447 = vpow2.f32 %v564_v29 }
 0x19f   :  { %v572_v33 = vadd.f32 %v571_v25, %v570_v4  ;;  %v585_v34 = vrot.slane %v584_v46, 1  ;;  %v598_v35 = vadd.f32 %v597_v28, %v596_v11  ;;  %v608_v56 = vsel %vm445_vm1, %v3889_v30, 0.0 }
 0x1a0   :  { %v579_v37 = vadd.f32 %v578_v9, %v577_v17  ;;  %v592_v39 = vrot.slane %v591_v31, 1  ;;  %v605_v49 = vadd.f32 %v604_v24, %v603_v2  ;;  %v609_v45 = vrot.slane %v608_v56, 4 }
 0x1a1   :  { %v586_v42 = vadd.f32 %v585_v34, %v584_v46  ;;  %v599_v43 = vrot.slane %v598_v35, 1  ;;  %3449 = vrcp.f32 %v572_v33  ;;  %v615_v20 = vsel %vm445_vm1, %v3891_v32, 0.0 }
 0x1a2   :  { %v593_v47 = vadd.f32 %v592_v39, %v591_v31  ;;  %v606_v50 = vrot.slane %v605_v49, 1  ;;  %3451 = vrcp.f32 %v579_v37  ;;  %v610_v22 = vadd.f32 %v609_v45, %v608_v56 }
 0x1a3   :  { %v600_v21 = vadd.f32 %v599_v43, %v598_v35  ;;  %3453 = vrcp.f32 %v586_v42  ;;  %v616_v23 = vrot.slane %v615_v20, 4  ;;  %v675_v35 = vpop.permute.xlu1 %674 }
 0x1a4   :  { %3455 = vrcp.f32 %v593_v47  ;;  %v607_v52 = vadd.f32 %v606_v50, %v605_v49  ;;  %v611_v57 = vrot.slane %v610_v22, 2 }
 0x1a5   :  { %3457 = vrcp.f32 %v600_v21  ;;  %v617_v1 = vadd.f32 %v616_v23, %v615_v20  ;;  %v3897_v54 = vpop.eup %3441 }
 0x1a6   :  { %3459 = vrcp.f32 %v607_v52  ;;  %v612_v36 = vadd.f32 %v611_v57, %v610_v22  ;;  %v622_v55 = vsel %vm445_vm1, %v3897_v54, 0.0 }
 0x1a7   :  { %v618_v26 = vrot.slane %v617_v1, 2  ;;  %v3899_v27 = vpop.eup %3443  ;;  %v623_v58 = vrot.slane %v622_v55, 4 }
 0x1a8   :  { %v629_v60 = vsel %vm445_vm1, %v3899_v27, 0.0  ;;  %v613_v61 = vrot.slane %v612_v36, 1 }
 0x1a9   :  { %v619_v62 = vadd.f32 %v618_v26, %v617_v1  ;;  %v630_v63 = vrot.slane %v629_v60, 4  ;;  %v624_v6 = vadd.f32 %v623_v58, %v622_v55 }
 0x1aa   :  { %v3905_v0 = vpop.eup %3445  ;;  %v614_v7 = vadd.f32 %v613_v61, %v612_v36 }
 0x1ab   :  { %v620_v4 = vrot.slane %v619_v62, 1  ;;  %v3907_v8 = vpop.eup %3447  ;;  %v631_v11 = vadd.f32 %v630_v63, %v629_v60  ;;  %v636_v17 = vsel %vm445_vm1, %v3905_v0, 0.0  ;;  %v625_v18 = vrot.slane %v624_v6, 2 }
 0x1ac   :  { %v637_v2 = vrot.slane %v636_v17, 4  ;;  %v643_v19 = vsel %vm445_vm1, %v3907_v8, 0.0  ;;  %3461 = vrcp.f32 %v614_v7 }
 0x1ad   :  { %v621_v25 = vadd.f32 %v620_v4, %v619_v62  ;;  %v632_v28 = vrot.slane %v631_v11, 2  ;;  %v644_v29 = vrot.slane %v643_v19, 4  ;;  %v626_v31 = vadd.f32 %v625_v18, %v624_v6 }
 0x1ae   :  { %v3450_v46 = vpop.eup %3449  ;;  %v638_v24 = vadd.f32 %v637_v2, %v636_v17 }
 0x1af   :  { %v3452_v9 = vpop.eup %3451  ;;  %3463 = vrcp.f32 %v621_v25  ;;  %v662_v33 = vmul.f32 %v3450_v46, %v3861_v38  ;;  %v633_v37 = vadd.f32 %v632_v28, %v631_v11  ;;  %v645_v39 = vadd.f32 %v644_v29, %v643_v19 }
 0x1b0   :  { %v3454_v34 = vpop.eup %3453  ;;  %v663_v49 = vmul.f32 %v3452_v9, %v3863_v41  ;;  %v627_v42 = vrot.slane %v626_v31, 1  ;;  %v639_v43 = vrot.slane %v638_v24, 2 }
 0x1b1   :  { %v3456_v56 = vpop.eup %3455  ;;  %v664_v45 = vmul.f32 %v3454_v34, %v3869_v44  ;;  %v680_v47 = vmul.f32 %v675_v35, %v662_v33  ;;  %v634_v20 = vrot.slane %v633_v37, 1  ;;  %v646_v21 = vrot.slane %v645_v39, 2 }
 0x1b2   :  { %v3458_v50 = vpop.eup %3457  ;;  %v665_v22 = vmul.f32 %v3456_v56, %v3873_v51  ;;  %v681_v23 = vmul.f32 %v675_v35, %v663_v49  ;;  %v628_v38 = vadd.f32 %v627_v42, %v626_v31  ;;  %v640_v57 = vadd.f32 %v639_v43, %v638_v24  ;;  %v3926_v43 = vpop.permute.xlu1 %676 }
 0x1b3   :  { %v3460_v52 = vpop.eup %3459  ;;  %v666_v1 = vmul.f32 %v3458_v50, %v3877_v53  ;;  %v682_v36 = vmul.f32 %v675_v35, %v664_v45  ;;  %v635_v26 = vadd.f32 %v634_v20, %v633_v37  ;;  %v647_v41 = vadd.f32 %v646_v21, %v645_v39 }
 0x1b4   :  { %v667_v55 = vmul.f32 %v3460_v52, %v3882_v40  ;;  %v683_v58 = vmul.f32 %v675_v35, %v665_v22  ;;  %v641_v60 = vrot.slane %v640_v57, 1  ;;  %3465 = vrcp.f32 %v628_v38 }
 0x1b5   :  { %v684_v44 = vmul.f32 %v675_v35, %v666_v1  ;;  %v692_v61 = vsel %vm445_vm1, %v680_v47, 0.0  ;;  %3467 = vrcp.f32 %v635_v26  ;;  %v699_v63 = vsel %vm445_vm1, %v681_v23, 0.0 }
 0x1b6   :  { %v685_v62 = vmul.f32 %v675_v35, %v667_v55  ;;  %v693_v51 = vrot.slane %v692_v61, 4  ;;  %v700_v6 = vrot.slane %v699_v63, 4  ;;  %v706_v7 = vsel %vm445_vm1, %v682_v36, 0.0 }
 0x1b7   :  { %v713_v53 = vsel %vm445_vm1, %v683_v58, 0.0  ;;  %v720_v4 = vsel %vm445_vm1, %v684_v44, 0.0  ;;  %v707_v40 = vrot.slane %v706_v7, 4  ;;  %v642_v25 = vadd.f32 %v641_v60, %v640_v57 }
 0x1b8   :  { %v694_v11 = vadd.f32 %v693_v51, %v692_v61  ;;  %v714_v17 = vrot.slane %v713_v53, 4  ;;  %v721_v18 = vrot.slane %v720_v4, 4  ;;  %v701_v2 = vadd.f32 %v700_v6, %v699_v63 }
 0x1b9   :  { %v727_v19 = vsel %vm445_vm1, %v685_v62, 0.0  ;;  %v648_v46 = vrot.slane %v647_v41, 1  ;;  %v708_v29 = vadd.f32 %v707_v40, %v706_v7  ;;  %v3462_v24 = vpop.eup %3461  ;;  %3469 = vrcp.f32 %v642_v25 }
 0x1ba   :  { %v695_v28 = vrot.slane %v694_v11, 2  ;;  %v715_v9 = vadd.f32 %v714_v17, %v713_v53  ;;  %v722_v31 = vadd.f32 %v721_v18, %v720_v4  ;;  %v702_v33 = vrot.slane %v701_v2, 2 }
 0x1bb   :  { %v728_v34 = vrot.slane %v727_v19, 4  ;;  %v649_v35 = vadd.f32 %v648_v46, %v647_v41  ;;  %v668_v39 = vmul.f32 %v3462_v24, %v3889_v30  ;;  %v709_v56 = vrot.slane %v708_v29, 2 }
 0x1bc   :  { %v3464_v37 = vpop.eup %3463  ;;  %v696_v49 = vadd.f32 %v695_v28, %v694_v11  ;;  %v716_v42 = vrot.slane %v715_v9, 2  ;;  %v703_v47 = vadd.f32 %v702_v33, %v701_v2  ;;  %v723_v50 = vrot.slane %v722_v31, 2 }
 0x1bd   :  { %v669_v45 = vmul.f32 %v3464_v37, %v3891_v32  ;;  %v729_v20 = vadd.f32 %v728_v34, %v727_v19  ;;  %v686_v21 = vmul.f32 %v3926_v43, %v668_v39  ;;  %v710_v23 = vadd.f32 %v709_v56, %v708_v29 }
 0x1be   :  { %v697_v22 = vrot.slane %v696_v49, 1  ;;  %v717_v52 = vadd.f32 %v716_v42, %v715_v9  ;;  %v704_v57 = vrot.slane %v703_v47, 1  ;;  %v724_v1 = vadd.f32 %v723_v50, %v722_v31 }
 0x1bf   :  { %v687_v38 = vmul.f32 %v3926_v43, %v669_v45  ;;  %v730_v30 = vrot.slane %v729_v20, 2  ;;  %v711_v26 = vrot.slane %v710_v23, 1  ;;  %v734_v55 = vsel %vm445_vm1, %v686_v21, 0.0 }
 0x1c0   :  { %v698_v36 = vadd.f32 %v697_v22, %v696_v49  ;;  %v718_v41 = vrot.slane %v717_v52, 1  ;;  %v705_v58 = vadd.f32 %v704_v57, %v703_v47  ;;  %v725_v32 = vrot.slane %v724_v1, 1 }
 0x1c1   :  { %v731_v60 = vadd.f32 %v730_v30, %v729_v20  ;;  %v735_v44 = vrot.slane %v734_v55, 4  ;;  %v3466_v61 = vpop.eup %3465  ;;  %v712_v62 = vadd.f32 %v711_v26, %v710_v23  ;;  %v741_v51 = vsel %vm445_vm1, %v687_v38, 0.0 }
 0x1c2   :  { %3471 = vrcp.f32 %v649_v35  ;;  %v3468_v63 = vpop.eup %3467  ;;  %v742_v53 = vrot.slane %v741_v51, 4  ;;  %v719_v4 = vadd.f32 %v718_v41, %v717_v52  ;;  %v797_v11 = vsel %vm796_vm2, %v705_v58, %v698_v36 }
 0x1c3   :  { %v732_v6 = vrot.slane %v731_v60, 1  ;;  %v736_v7 = vadd.f32 %v735_v44, %v734_v55  ;;  %v670_v40 = vmul.f32 %v3466_v61, %v3897_v54  ;;  %v671_v17 = vmul.f32 %v3468_v63, %v3899_v27 }
 0x1c4   :  { %v726_v18 = vadd.f32 %v725_v32, %v724_v1  ;;  %v743_v19 = vadd.f32 %v742_v53, %v741_v51  ;;  %v799_v25 = vsel %vm798_vm3, %v712_v62, %v797_v11 }
 0x1c5   :  { %v737_v2 = vrot.slane %v736_v7, 2  ;;  %v733_v46 = vadd.f32 %v732_v6, %v731_v60  ;;  %v801_v28 = vsel %vm800_vm4, %v719_v4, %v799_v25  ;;  %v688_v29 = vmul.f32 %v3926_v43, %v670_v40 }
 0x1c6   :  { %v689_v9 = vmul.f32 %v3926_v43, %v671_v17  ;;  %v744_v24 = vrot.slane %v743_v19, 2  ;;  %v803_v33 = vsel %vm802_vm5, %v726_v18, %v801_v28  ;;  %v3470_v34 = vpop.eup %3469 }
 0x1c7   :  { %v738_v31 = vadd.f32 %v737_v2, %v736_v7  ;;  %v805_v54 = vsel %vm804_vm6, %v733_v46, %v803_v33  ;;  %v748_v27 = vsel %vm445_vm1, %v688_v29, 0.0  ;;  %v672_v49 = vmul.f32 %v3470_v34, %v3905_v0 }
 0x1c8   :  { %v755_v35 = vsel %vm445_vm1, %v689_v9, 0.0  ;;  %v745_v39 = vadd.f32 %v744_v24, %v743_v19  ;;  %v749_v56 = vrot.slane %v748_v27, 4  ;;  %v3293_v19 = vld [vmem:[%s4451_s4] ss:$0 sm:$0xff] }
 0x1c9   :  { %v739_v37 = vrot.slane %v738_v31, 1  ;;  %v756_v42 = vrot.slane %v755_v35, 4  ;;  %v690_v50 = vmul.f32 %v3926_v43, %v672_v49 }
 0x1ca   :  { %v746_v47 = vrot.slane %v745_v39, 1  ;;  %v750_v20 = vadd.f32 %v749_v56, %v748_v27 }
 0x1cb   :  { %v740_v45 = vadd.f32 %v739_v37, %v738_v31  ;;  %v757_v21 = vadd.f32 %v756_v42, %v755_v35  ;;  %v762_v38 = vsel %vm445_vm1, %v690_v50, 0.0 }
 0x1cc   :  { %v747_v22 = vadd.f32 %v746_v47, %v745_v39  ;;  %v751_v52 = vrot.slane %v750_v20, 2  ;;  %v763_v1 = vrot.slane %v762_v38, 4 }
 0x1cd   :  { %v807_v23 = vsel %vm806_vm7, %v740_v45, %v805_v54  ;;  %v758_v57 = vrot.slane %v757_v21, 2 }
 0x1ce   :  { %v809_v0 = vsel %vm808_vm8, %v747_v22, %v807_v23  ;;  %v752_v36 = vadd.f32 %v751_v52, %v750_v20  ;;  %v764_v55 = vadd.f32 %v763_v1, %v762_v38  ;;  %v3608_v22 = vmov 842150450  }
 0x1cf   :  { %v3472_v30 = vpop.eup %3471  ;;  %3371 = vmatprep.mubr.msk.f32.mxu1 %vm156_vm0, %v809_v0  ;;  %v759_v41 = vadd.f32 %v758_v57, %v757_v21  ;;  %v986_v23 = vunpack.c.l.s4 %v3608_v22  ;;  %v3609_v57 = vmov 1414812756  }
 0x1d0   :  { %v673_v26 = vmul.f32 %v3472_v30, %v3907_v8  ;;  %v765_v32 = vrot.slane %v764_v55, 2  ;;  %v753_v60 = vrot.slane %v752_v36, 1  ;;  %v993_v1 = vunpack.c.l.s4 %v3609_v57 }
 0x1d1   :  { %v760_v44 = vrot.slane %v759_v41, 1  ;;  %v987_v38 = vunpack.c.0.s8 %v986_v23  ;;  %v3610_v30 = vmov 1987475062  }
 0x1d2   :  { %v691_v58 = vmul.f32 %v3926_v43, %v673_v26  ;;  %v766_v61 = vadd.f32 %v765_v32, %v764_v55  ;;  %v754_v6 = vadd.f32 %v753_v60, %v752_v36  ;;  %v1000_v0 = vunpack.c.l.s4 %v3610_v30 }
 0x1d3   :  { %v761_v7 = vadd.f32 %v760_v44, %v759_v41  ;;  %v3996_v26 = vsub.s32 %v987_v38, %v3711_v3 }
 0x1d4   :  { %v769_v62 = vsel %vm445_vm1, %v691_v58, 0.0  ;;  %v767_v63 = vrot.slane %v766_v61, 1  ;;  %v994_v58 = vunpack.c.0.s8 %v993_v1  ;;  %v1001_v32 = vunpack.c.0.s8 %v1000_v0 }
 0x1d5   :  { %v770_v51 = vrot.slane %v769_v62, 4  ;;  %v810_v8 = vsel %vm796_vm2, %v761_v7, %v754_v6 }
 0x1d6   :  { %v768_v11 = vadd.f32 %v767_v63, %v766_v61  ;;  %v4001_v61 = vsub.s32 %v994_v58, %v3711_v3 }
 0x1d7   :  { %v771_v53 = vadd.f32 %v770_v51, %v769_v62  ;;  %v4004_v62 = vsub.s32 %v1001_v32, %v3711_v3 }
 0x1d8   :  { %v811_v18 = vsel %vm798_vm3, %v768_v11, %v810_v8 }
 0x1d9   :  { %v772_v4 = vrot.slane %v771_v53, 2 }
 0x1db   :  { %v773_v40 = vadd.f32 %v772_v4, %v771_v53 }
 0x1dd   :  { %v774_v17 = vrot.slane %v773_v40, 1 }
 0x1df   :  { %v775_v43 = vadd.f32 %v774_v17, %v773_v40 }
 0x1e1   :  { %v812_v2 = vsel %vm800_vm4, %v775_v43, %v811_v18 }
 0x1e2   :  { %3372 = vmatmul.mubr.msk.f32.vlgmr.msra.gmra.mxu1 %vm156_vm0, %v812_v2 }
 0x2a2   :  { %v3373_v25 = vpop.f32.mrf.mxu1 }
 0x2a3   :  { %v889_v46 = vadd.f32 %v3373_v25, %v3293_v19 }
 0x2a4   :  { %v883_v28 = vpop.f32.mrf.mxu1 }
 0x2a5   :  { %v917_v29 = vrot.slane %v889_v46, %v3714_v5  ;;  %v884_v9 = vadd.f32 %v3293_v19, %v883_v28 }
 0x2a7   :  { %v918_v31 = vcombine.high %v917_v29, %v917_v29  ;;  %v894_v24 = vcombine.high %v884_v9, %v884_v9  ;;  %v901_v33 = vrot.slane %v884_v9, %v3714_v5  ;;  %v3963_v34 = vadd.f32 %v917_v29, %v3743_v16 }
 0x2a9   :  { %v3966_v54 = vadd.f32 %v918_v31, %v3739_v15  ;;  %v908_v27 = vrot.slane %v894_v24, %v3714_v5  ;;  %v909_v35 = vcombine.high %v901_v33, %v901_v33  ;;  %v3970_v39 = vadd.f32 %v901_v33, %v3726_v10 }
 0x2ab   :  { %v910_v37 = vcombine.high %v908_v27, %v908_v27  ;;  %v3973_v49 = vadd.f32 %v909_v35, %v3736_v14  ;;  %v956_v56 = vcombine.low %v3963_v34, %v3966_v54  ;;  %v3978_v16 = vadd.f32 %v908_v27, %v3732_v13 }
 0x2ad   :  { %v3981_v15 = vadd.f32 %v910_v37, %v3729_v12  ;;  %v963_v42 = vrot.slane %v956_v56, %v3714_v5  ;;  %v939_v45 = vcombine.low %v3970_v39, %v3973_v49  ;;  %v3607_v12 = vmov 269488144  }
 0x2ae   :  { %v979_v21 = vunpack.c.l.s4 %v3607_v12  ;;  %v3296_v12 = vld [vmem:[%s4454_s7] ss:$0 sm:$0xff] }
 0x2af   :  { %v970_v10 = vsel %vm969_vm9, %v963_v42, 0.0  ;;  %v940_v14 = vcombine.low %v3978_v16, %v3981_v15  ;;  %v947_v47 = vrot.slane %v939_v45, %v3714_v5  ;;  %v1203_v45 = vld [vmem:[%s4456_s9] sm:$0xff]  ;;  %v1144_v22 = vcombine.high %v3296_v12, %v3296_v12 }
 0x2b0   :  { %971 = vadd.xlane.f32.xlu1 %v970_v10  ;;  %v980_v52 = vunpack.c.0.s8 %v979_v21  ;;  %3374 = vmatprep.subr.mxu0 %v1203_v45  ;;  %v3297_v21 = vld [vmem:[%s4455_s8] ss:$0 sm:$0xff]  ;;  %v1151_v23 = vrot.slane %v3296_v12, %v3714_v5 }
 0x2b1   :  { %v954_v50 = vrot.slane %v940_v14, %v3714_v5  ;;  %3375 = vmatpush3.msra.mxu0 %v1203_v45  ;;  %v1158_v38 = vrot.slane %v1144_v22, %v3714_v5  ;;  %v1183_v57 = vrot.slane %v3297_v21, %v3714_v5 }
 0x2b2   :  { %v3993_v36 = vsub.s32 %v980_v52, %v3711_v3  ;;  %v1176_v52 = vcombine.high %v3297_v21, %v3297_v21  ;;  %v1159_v30 = vcombine.high %v1151_v23, %v1151_v23 }
 0x2b3   :  { %v955_v13 = vcombine.low %v947_v47, %v954_v50 }
 0x2b4   :  { %v1190_v0 = vrot.slane %v1176_v52, %v3714_v5 }
 0x2b5   :  { %v966_v20 = vsel %vm156_vm0, %v955_v13, 0.0 }
 0x2b6   :  { %967 = vadd.xlane.f32.xlu0 %v966_v20 }
 0x339   :  { %v972_v41 = vpop.xlane.xlu1 %971 }
 0x33a   :  { %v975_v55 = vmul.f32 0.125, %v972_v41 }
 0x33c   :  { %v1012_v60 = vrot.slane %v975_v55, %v3993_v36  ;;  %v1019_v44 = vrot.slane %v975_v55, %v3996_v26 }
 0x33e   :  { %v4007_v6 = vsub.f32 %v3963_v34, %v1012_v60  ;;  %v4010_v7 = vsub.f32 %v3966_v54, %v1019_v44  ;;  %v1160_v60 = vcombine.high %v1158_v38, %v1158_v38  ;;  %v1191_v44 = vcombine.high %v1183_v57, %v1183_v57 }
 0x33f   :  { %v968_v51 = vpop.xlane.xlu0 %967 }
 0x340   :  { %v974_v63 = vmul.f32 0.125, %v968_v51  ;;  %v1036_v2 = vmul.f32 %v4007_v6, %v4007_v6  ;;  %v1037_v19 = vmul.f32 %v4010_v7, %v4010_v7 }
 0x342   :  { %v984_v53 = vrot.slane %v974_v63, %v3993_v36  ;;  %v991_v4 = vrot.slane %v974_v63, %v3996_v26  ;;  %v998_v11 = vrot.slane %v974_v63, %v4001_v61  ;;  %v1005_v40 = vrot.slane %v974_v63, %v4004_v62 }
 0x343   :  { %v1061_v27 = vcombine.low %v1036_v2, %v1037_v19 }
 0x344   :  { %v1026_v8 = vsub.f32 %v3970_v39, %v984_v53  ;;  %v1027_v17 = vsub.f32 %v3973_v49, %v991_v4  ;;  %v1028_v18 = vsub.f32 %v3978_v16, %v998_v11  ;;  %v1029_v43 = vsub.f32 %v3981_v15, %v1005_v40 }
 0x345   :  { %v1068_v56 = vrot.slane %v1061_v27, %v3714_v5  ;;  %v1192_v40 = vcombine.high %v1190_v0, %v1190_v0 }
 0x346   :  { %v1032_v25 = vmul.f32 %v1026_v8, %v1026_v8  ;;  %v1033_v46 = vmul.f32 %v1027_v17, %v1027_v17  ;;  %v1034_v28 = vmul.f32 %v1028_v18, %v1028_v18  ;;  %v1035_v29 = vmul.f32 %v1029_v43, %v1029_v43 }
 0x347   :  { %v1074_v42 = vsel %vm969_vm9, %v1068_v56, 0.0 }
 0x348   :  { %v1044_v9 = vcombine.low %v1032_v25, %v1033_v46  ;;  %v1045_v31 = vcombine.low %v1034_v28, %v1035_v29 }
 0x34a   :  { %v1052_v24 = vrot.slane %v1044_v9, %v3714_v5  ;;  %v1059_v33 = vrot.slane %v1045_v31, %v3714_v5 }
 0x34c   :  { %v1060_v35 = vcombine.low %v1052_v24, %v1059_v33 }
 0x34e   :  { %v1071_v37 = vsel %vm156_vm0, %v1060_v35, 0.0 }
 0x34f   :  { %1072 = vadd.xlane.f32.xlu0 %v1071_v37 }
 0x353   :  { %1075 = vadd.xlane.f32.xlu0 %v1074_v42 }
 0x3d8   :  { %v1073_v10 = vpop.xlane.xlu0 %1072 }
 0x3d9   :  { %v1077_v14 = vmul.f32 0.125, %v1073_v10 }
 0x3db   :  { %v1079_v47 = vadd.f32 1e-05, %v1077_v14 }
 0x3dc   :  { %v1076_v50 = vpop.xlane.xlu0 %1075 }
 0x3dd   :  { %3473 = vrsqrt.f32 %v1079_v47  ;;  %v1078_v13 = vmul.f32 0.125, %v1076_v50  ;;  %v3298_v47 = vld [vmem:[%s4457_s10] ss:$0 sm:$0xff] }
 0x3df   :  { %v1080_v20 = vadd.f32 1e-05, %v1078_v13 }
 0x3e1   :  { %3475 = vrsqrt.f32 %v1080_v20 }
 0x3ea   :  { %v3474_v1 = vpop.eup %3473 }
 0x3eb   :  { %v1091_v41 = vrot.slane %v3474_v1, %v3993_v36  ;;  %v1098_v55 = vrot.slane %v3474_v1, %v3996_v26  ;;  %v1105_v58 = vrot.slane %v3474_v1, %v4001_v61  ;;  %v1112_v32 = vrot.slane %v3474_v1, %v4004_v62  ;;  %v3301_v1 = vld [vmem:[%s4459_s12] ss:$0 sm:$0xff] }
 0x3ed   :  { %v1133_v51 = vmul.f32 %v1091_v41, %v1026_v8  ;;  %v1134_v63 = vmul.f32 %v1098_v55, %v1027_v17  ;;  %v1135_v53 = vmul.f32 %v1105_v58, %v1028_v18  ;;  %v1136_v4 = vmul.f32 %v1112_v32, %v1029_v43 }
 0x3ee   :  { %v3476_v11 = vpop.eup %3475 }
 0x3ef   :  { %v1119_v2 = vrot.slane %v3476_v11, %v3993_v36  ;;  %v1126_v19 = vrot.slane %v3476_v11, %v3996_v26  ;;  %v1165_v25 = vmul.f32 %v1151_v23, %v1133_v51  ;;  %v1166_v46 = vmul.f32 %v1159_v30, %v1134_v63 }
 0x3f0   :  { %v1167_v28 = vmul.f32 %v1158_v38, %v1135_v53  ;;  %v1168_v29 = vmul.f32 %v1160_v60, %v1136_v4 }
 0x3f1   :  { %v1137_v9 = vmul.f32 %v1119_v2, %v4007_v6  ;;  %v1138_v31 = vmul.f32 %v1126_v19, %v4010_v7  ;;  %v1197_v24 = vadd.f32 %v1183_v57, %v1165_v25  ;;  %v1198_v33 = vadd.f32 %v1191_v44, %v1166_v46  ;;  %v1333_v7 = vld [vmem:[%s4458_s11] sm:$0x3f] }
 0x3f2   :  { %v1199_v8 = vadd.f32 %v1190_v0, %v1167_v28  ;;  %v1200_v17 = vadd.f32 %v1192_v40, %v1168_v29  ;;  %3379 = vmatprep.subr.msk.mxu1 %vm1348_vm10, %v1333_v7 }
 0x3f3   :  { %v1217_v18 = vcombine.low %v1197_v24, %v1198_v33  ;;  %v1169_v43 = vmul.f32 %v1151_v23, %v1137_v9  ;;  %v1170_v27 = vmul.f32 %v1159_v30, %v1138_v31  ;;  %3380 = vmatpush3.msk.msra.mxu1 %vm1348_vm10, %v1333_v7 }
 0x3f4   :  { %v1218_v35 = vcombine.low %v1199_v8, %v1200_v17 }
 0x3f5   :  { %v1225_v37 = vrot.slane %v1217_v18, %v3714_v5  ;;  %v1201_v56 = vadd.f32 %v1183_v57, %v1169_v43  ;;  %v1202_v42 = vadd.f32 %v1191_v44, %v1170_v27 }
 0x3f6   :  { %v1232_v45 = vrot.slane %v1218_v35, %v3714_v5 }
 0x3f7   :  { %v1234_v10 = vcombine.low %v1201_v56, %v1202_v42 }
 0x3f8   :  { %v1233_v14 = vcombine.low %v1225_v37, %v1232_v45 }
 0x3f9   :  { %v1241_v6 = vrot.slane %v1234_v10, %v3714_v5 }
 0x3fa   :  { %3376 = vmatprep.mubr.msk.f32.mxu0 %vm156_vm0, %v1233_v14 }
 0x3fb   :  { %3377 = vmatmul.mubr.msk.f32.vlgmr.msra.gmra.mxu0 %vm156_vm0, %v1241_v6 }
 0x4bb   :  { %v3378_v50 = vpop.f32.mrf.mxu0 }
 0x4bc   :  { %v1318_v13 = vadd.f32 %v3378_v50, %v3298_v47 }
 0x4bd   :  { %v1312_v20 = vpop.f32.mrf.mxu0 }
 0x4be   :  { %v1322_v12 = vmax.f32 %v1318_v13, 0.0  ;;  %v1313_v21 = vadd.f32 %v3298_v47, %v1312_v20 }
 0x4c0   :  { %v1321_v22 = vmax.f32 %v1313_v21, 0.0  ;;  %1327 = vrot.lane.b32.xlu0 %v1322_v12, %s3611_s30 }
 0x4c2   :  { %1325 = vrot.lane.b32.xlu1 %v1321_v22, %s3611_s30 }
 0x532   :  { %v1328_v23 = vpop.permute.xlu0 %1327 }
 0x533   :  { %v1332_v57 = vmul.f32 %v1328_v23, %v1318_v13 }
 0x534   :  { %v1326_v52 = vpop.permute.xlu1 %1325 }
 0x535   :  { %v1331_v38 = vmul.f32 %v1326_v52, %v1313_v21 }
 0x537   :  { %3381 = vmatprep.mubr.msk.f32.mxu1 %vm1341_vm11, %v1331_v38 }
 0x538   :  { %3382 = vmatmul.mubr.msk.f32.vlgmr.msra.gmra.mxu1 %vm1341_vm11, %v1332_v57 }
 0x5f8   :  { %v3383_v30 = vpop.f32.mrf.mxu1 }
 0x5f9   :  { %v1424_v0 = vadd.f32 %v3383_v30, %v3301_v1 }
 0x5fa   :  { %v1418_v41 = vpop.f32.mrf.mxu1 }
 0x5fb   :  { %v1452_v55 = vrot.slane %v1424_v0, %v3714_v5  ;;  %v1419_v58 = vadd.f32 %v3301_v1, %v1418_v41  ;;  %v3309_v0 = vld [vmem:[%s4469_s22 + $0x8] sm:$0xff] }
 0x5fc   :  { %3384 = vmatprep.subr.mxu0 %v3309_v0 }
 0x5fd   :  { %v1453_v32 = vcombine.high %v1452_v55, %v1452_v55  ;;  %v1429_v60 = vcombine.high %v1419_v58, %v1419_v58  ;;  %v1436_v44 = vrot.slane %v1419_v58, %v3714_v5  ;;  %v4073_v51 = vadd.f32 %v1452_v55, %v3963_v34  ;;  %3385 = vmatpush3.msra.mxu0 %v3309_v0 }
 0x5ff   :  { %v4076_v63 = vadd.f32 %v1453_v32, %v3966_v54  ;;  %v1443_v53 = vrot.slane %v1429_v60, %v3714_v5  ;;  %v1444_v4 = vcombine.high %v1436_v44, %v1436_v44  ;;  %v4080_v40 = vadd.f32 %v1436_v44, %v3970_v39 }
 0x601   :  { %v1445_v11 = vcombine.high %v1443_v53, %v1443_v53  ;;  %v4083_v2 = vadd.f32 %v1444_v4, %v3973_v49  ;;  %v1493_v19 = vcombine.low %v4073_v51, %v4076_v63  ;;  %v4088_v25 = vadd.f32 %v1443_v53, %v3978_v16  ;;  %v3307_v53 = vld [vmem:[%s4452_s5 + $0x1] ss:$0 sm:$0xff] }
 0x602   :  { %v1679_v4 = vcombine.high %v3307_v53, %v3307_v53 }
 0x603   :  { %v4091_v34 = vadd.f32 %v1445_v11, %v3981_v15  ;;  %v1500_v54 = vrot.slane %v1493_v19, %v3714_v5  ;;  %v1476_v46 = vcombine.low %v4080_v40, %v4083_v2  ;;  %v3308_v19 = vld [vmem:[%s4453_s6 + $0x1] ss:$0 sm:$0xff] }
 0x605   :  { %v1506_v39 = vsel %vm969_vm9, %v1500_v54, 0.0  ;;  %v1477_v49 = vcombine.low %v4088_v25, %v4091_v34  ;;  %v1484_v28 = vrot.slane %v1476_v46, %v3714_v5  ;;  %v1686_v54 = vrot.slane %v3307_v53, %v3714_v5 }
 0x606   :  { %1507 = vadd.xlane.f32.xlu0 %v1506_v39 }
 0x607   :  { %v1491_v29 = vrot.slane %v1477_v49, %v3714_v5  ;;  %v1711_v49 = vcombine.high %v3308_v19, %v3308_v19 }
 0x609   :  { %v1492_v16 = vcombine.low %v1484_v28, %v1491_v29  ;;  %v1693_v28 = vrot.slane %v1679_v4, %v3714_v5  ;;  %v1694_v29 = vcombine.high %v1686_v54, %v1686_v54 }
 0x60b   :  { %v1503_v9 = vsel %vm156_vm0, %v1492_v16, 0.0 }
 0x60c   :  { %1504 = vadd.xlane.f32.xlu1 %v1503_v9 }
 0x68f   :  { %v1508_v15 = vpop.xlane.xlu0 %1507 }
 0x690   :  { %v1510_v31 = vmul.f32 0.125, %v1508_v15  ;;  %v1718_v15 = vrot.slane %v3308_v19, %v3714_v5 }
 0x692   :  { %v1547_v24 = vrot.slane %v1510_v31, %v3993_v36  ;;  %v1554_v33 = vrot.slane %v1510_v31, %v3996_v26  ;;  %v1725_v31 = vrot.slane %v1711_v49, %v3714_v5 }
 0x694   :  { %v1565_v8 = vsub.f32 %v4073_v51, %v1547_v24  ;;  %v1566_v17 = vsub.f32 %v4076_v63, %v1554_v33  ;;  %v1695_v33 = vcombine.high %v1693_v28, %v1693_v28 }
 0x695   :  { %v1505_v18 = vpop.xlane.xlu1 %1504 }
 0x696   :  { %v1509_v43 = vmul.f32 0.125, %v1505_v18  ;;  %v1571_v27 = vmul.f32 %v1565_v8, %v1565_v8  ;;  %v1572_v35 = vmul.f32 %v1566_v17, %v1566_v17 }
 0x698   :  { %v1519_v37 = vrot.slane %v1509_v43, %v3993_v36  ;;  %v1526_v56 = vrot.slane %v1509_v43, %v3996_v26  ;;  %v1533_v42 = vrot.slane %v1509_v43, %v4001_v61  ;;  %v1540_v45 = vrot.slane %v1509_v43, %v4004_v62 }
 0x699   :  { %v1596_v10 = vcombine.low %v1571_v27, %v1572_v35 }
 0x69a   :  { %v1561_v14 = vsub.f32 %v4080_v40, %v1519_v37  ;;  %v1562_v6 = vsub.f32 %v4083_v2, %v1526_v56  ;;  %v1563_v7 = vsub.f32 %v4088_v25, %v1533_v42  ;;  %v1564_v47 = vsub.f32 %v4091_v34, %v1540_v45 }
 0x69b   :  { %v1603_v50 = vrot.slane %v1596_v10, %v3714_v5  ;;  %v1726_v37 = vcombine.high %v1718_v15, %v1718_v15  ;;  %v1727_v56 = vcombine.high %v1725_v31, %v1725_v31 }
 0x69c   :  { %v1567_v13 = vmul.f32 %v1561_v14, %v1561_v14  ;;  %v1568_v20 = vmul.f32 %v1562_v6, %v1562_v6  ;;  %v1569_v12 = vmul.f32 %v1563_v7, %v1563_v7  ;;  %v1570_v21 = vmul.f32 %v1564_v47, %v1564_v47 }
 0x69d   :  { %v1609_v22 = vsel %vm969_vm9, %v1603_v50, 0.0 }
 0x69e   :  { %1610 = vadd.xlane.f32.xlu0 %v1609_v22  ;;  %v1579_v23 = vcombine.low %v1567_v13, %v1568_v20  ;;  %v1580_v52 = vcombine.low %v1569_v12, %v1570_v21 }
 0x6a0   :  { %v1587_v38 = vrot.slane %v1579_v23, %v3714_v5  ;;  %v1594_v57 = vrot.slane %v1580_v52, %v3714_v5 }
 0x6a2   :  { %v1595_v1 = vcombine.low %v1587_v38, %v1594_v57 }
 0x6a4   :  { %v1606_v30 = vsel %vm156_vm0, %v1595_v1, 0.0 }
 0x6a5   :  { %1607 = vadd.xlane.f32.xlu1 %v1606_v30 }
 0x727   :  { %v1611_v41 = vpop.xlane.xlu0 %1610 }
 0x728   :  { %v1613_v55 = vmul.f32 0.125, %v1611_v41 }
 0x72a   :  { %v1615_v58 = vadd.f32 1e-05, %v1613_v55 }
 0x72c   :  { %3477 = vrsqrt.f32 %v1615_v58  ;;  %v3311_v58 = vld [vmem:[%s4449_s2 + $0x1] ss:$0 sm:$0xff] }
 0x72e   :  { %v1608_v32 = vpop.xlane.xlu1 %1607 }
 0x72f   :  { %v1612_v60 = vmul.f32 0.125, %v1608_v32 }
 0x731   :  { %v1614_v44 = vadd.f32 1e-05, %v1612_v60 }
 0x733   :  { %3479 = vrsqrt.f32 %v1614_v44 }
 0x739   :  { %v3478_v11 = vpop.eup %3477 }
 0x73a   :  { %v1654_v46 = vrot.slane %v3478_v11, %v3993_v36  ;;  %v1661_v39 = vrot.slane %v3478_v11, %v3996_v26 }
 0x73c   :  { %v1672_v16 = vmul.f32 %v1654_v46, %v1565_v8  ;;  %v1673_v9 = vmul.f32 %v1661_v39, %v1566_v17 }
 0x73e   :  { %v1704_v42 = vmul.f32 %v1686_v54, %v1672_v16  ;;  %v1705_v45 = vmul.f32 %v1694_v29, %v1673_v9 }
 0x740   :  { %v3480_v24 = vpop.eup %3479  ;;  %v1736_v22 = vadd.f32 %v1718_v15, %v1704_v42  ;;  %v1737_v23 = vadd.f32 %v1726_v37, %v1705_v45 }
 0x741   :  { %v1626_v18 = vrot.slane %v3480_v24, %v3993_v36  ;;  %v1633_v43 = vrot.slane %v3480_v24, %v3996_v26  ;;  %v1640_v27 = vrot.slane %v3480_v24, %v4001_v61  ;;  %v1647_v35 = vrot.slane %v3480_v24, %v4004_v62 }
 0x742   :  { %v1771_v41 = vcombine.low %v1736_v22, %v1737_v23 }
 0x743   :  { %v1668_v8 = vmul.f32 %v1626_v18, %v1561_v14  ;;  %v1669_v17 = vmul.f32 %v1633_v43, %v1562_v6  ;;  %v1670_v10 = vmul.f32 %v1640_v27, %v1563_v7  ;;  %v1671_v50 = vmul.f32 %v1647_v35, %v1564_v47 }
 0x744   :  { %v1778_v7 = vrot.slane %v1771_v41, %v3714_v5 }
 0x745   :  { %v1700_v13 = vmul.f32 %v1686_v54, %v1668_v8  ;;  %v1701_v20 = vmul.f32 %v1694_v29, %v1669_v17  ;;  %v1702_v12 = vmul.f32 %v1693_v28, %v1670_v10  ;;  %v1703_v21 = vmul.f32 %v1695_v33, %v1671_v50  ;;  %v3314_v33 = vld [vmem:[%s4450_s3 + $0x8] sm:$0xff] }
 0x746   :  { %3389 = vmatprep.subr.mxu1 %v3314_v33 }
 0x747   :  { %v1732_v52 = vadd.f32 %v1718_v15, %v1700_v13  ;;  %v1733_v38 = vadd.f32 %v1726_v37, %v1701_v20  ;;  %v1734_v57 = vadd.f32 %v1725_v31, %v1702_v12  ;;  %v1735_v1 = vadd.f32 %v1727_v56, %v1703_v21  ;;  %3390 = vmatpush3.msra.mxu1 %v3314_v33 }
 0x749   :  { %v1754_v30 = vcombine.low %v1732_v52, %v1733_v38  ;;  %v1755_v0 = vcombine.low %v1734_v57, %v1735_v1 }
 0x74b   :  { %v1762_v55 = vrot.slane %v1754_v30, %v3714_v5  ;;  %v1769_v14 = vrot.slane %v1755_v0, %v3714_v5 }
 0x74d   :  { %v1770_v6 = vcombine.low %v1762_v55, %v1769_v14 }
 0x74f   :  { %3386 = vmatprep.mubr.msk.f32.mxu0 %vm156_vm0, %v1770_v6 }
 0x750   :  { %3387 = vmatmul.mubr.msk.f32.vlgmr.msra.gmra.mxu0 %vm156_vm0, %v1778_v7 }
 0x810   :  { %v3388_v47 = vpop.f32.mrf.mxu0 }
 0x811   :  { %v1855_v44 = vadd.f32 %v3388_v47, %v3311_v58 }
 0x812   :  { %v1849_v32 = vpop.f32.mrf.mxu0 }
 0x813   :  { %v1850_v60 = vadd.f32 %v3311_v58, %v1849_v32  ;;  %v1955_v11 = vrot.slane %v1855_v44, %v3714_v5  ;;  %v1915_v43 = vrot.slane %v1855_v44, %v3774_v48 }
 0x815   :  { %v1860_v53 = vcombine.high %v1850_v60, %v1850_v60  ;;  %v1939_v4 = vrot.slane %v1850_v60, %v3714_v5  ;;  %v1956_v49 = vcombine.high %v1955_v11, %v1955_v11  ;;  %v1867_v18 = vrot.slane %v1850_v60, %v3774_v48 }
 0x816   :  { %v1916_v37 = vcombine.high %v1915_v43, %v1915_v43  ;;  %v1923_v45 = vrot.slane %v1915_v43, %v3774_v48 }
 0x817   :  { %v1946_v19 = vrot.slane %v1860_v53, %v3714_v5  ;;  %v1947_v54 = vcombine.high %v1939_v4, %v1939_v4  ;;  %v2047_v31 = vrot.slane %v1956_v49, %v3714_v5  ;;  %v1875_v27 = vcombine.high %v1867_v18, %v1867_v18 }
 0x818   :  { %v1874_v35 = vrot.slane %v1860_v53, %v3774_v48  ;;  %v1883_v56 = vrot.slane %v1867_v18, %v3774_v48  ;;  %v1930_v17 = vrot.slane %v1916_v37, %v3774_v48  ;;  %v1931_v20 = vcombine.high %v1923_v45, %v1923_v45 }
 0x819   :  { %v1948_v46 = vcombine.high %v1946_v19, %v1946_v19  ;;  %v2017_v39 = vcombine.low %v1939_v4, %v1947_v54  ;;  %v2031_v29 = vrot.slane %v1946_v19, %v3714_v5  ;;  %v1897_v42 = vrot.slane %v1875_v27, %v3774_v48 }
 0x81a   :  { %v1876_v8 = vcombine.high %v1874_v35, %v1874_v35  ;;  %v1890_v10 = vrot.slane %v1874_v35, %v3774_v48  ;;  %v1905_v50 = vcombine.high %v1883_v56, %v1883_v56  ;;  %v1932_v21 = vcombine.high %v1930_v17, %v1930_v17 }
 0x81b   :  { %v2024_v28 = vrot.slane %v2017_v39, %v3714_v5  ;;  %v2033_v16 = vcombine.low %v1948_v46, %v1955_v11  ;;  %v1907_v13 = vcombine.high %v1897_v42, %v1897_v42  ;;  %v1992_v22 = vrot.slane %v1923_v45, %v3786_v59 }
 0x81c   :  { %v1904_v12 = vrot.slane %v1876_v8, %v3774_v48  ;;  %v1996_v23 = vrot.slane %v1930_v17, %v3786_v59  ;;  %v1906_v52 = vcombine.high %v1890_v10, %v1890_v10  ;;  %v1960_v38 = vrot.slane %v1883_v56, %v3786_v59 }
 0x81d   :  { %v2032_v9 = vcombine.low %v2024_v28, %v2031_v29  ;;  %v2040_v15 = vrot.slane %v2033_v16, %v3714_v5  ;;  %v1964_v57 = vrot.slane %v1897_v42, %v3786_v59  ;;  %v1968_v1 = vrot.slane %v1905_v50, %v3786_v59 }
 0x81e   :  { %v1972_v30 = vrot.slane %v1907_v13, %v3786_v59  ;;  %v2000_v0 = vrot.slane %v1931_v20, %v3786_v59  ;;  %v1908_v41 = vcombine.high %v1904_v12, %v1904_v12  ;;  %v1976_v55 = vrot.slane %v1890_v10, %v3786_v59 }
 0x81f   :  { %2049 = vrot.lane.b32.xlu1 %v2032_v9, %s3605_s0  ;;  %v2048_v24 = vcombine.low %v2040_v15, %v2047_v31  ;;  %v1980_v48 = vrot.slane %v1904_v12, %v3786_v59  ;;  %v4187_v32 = vrot.slane %v1932_v21, %v3786_v59  ;;  %v1984_v60 = vrot.slane %v1906_v52, %v3786_v59 }
 0x820   :  { %v1988_v15 = vrot.slane %v1908_v41, %v3786_v59 }
 0x821   :  { %2051 = vrot.lane.b32.xlu0 %v2048_v24, %s3605_s0 }
 0x823   :  { %2295 = vrot.lane.b32.xlu1 %v2032_v9, %s3604_s29 }
 0x827   :  { %2297 = vrot.lane.b32.xlu1 %v2048_v24, %s3604_s29 }
 0x891   :  { %v2050_v14 = vpop.permute.xlu1 %2049 }
 0x892   :  { %v4178_v6 = vmul.f32 %v2050_v14, %v1960_v38  ;;  %v4180_v7 = vmul.f32 %v2050_v14, %v1964_v57  ;;  %v4182_v47 = vmul.f32 %v2050_v14, %v1968_v1  ;;  %v4184_v58 = vmul.f32 %v2050_v14, %v1972_v30 }
 0x893   :  { %v4190_v44 = vmul.f32 %v2050_v14, %v1976_v55  ;;  %v4192_v53 = vmul.f32 %v2050_v14, %v1980_v48  ;;  %v4194_v4 = vpop.permute.xlu0 %2051 }
 0x894   :  { %v2067_v11 = vsel %vm445_vm1, %v4178_v6, -inf  ;;  %v2074_v19 = vsel %vm445_vm1, %v4180_v7, -inf  ;;  %v2081_v54 = vsel %vm445_vm1, %v4182_v47, -inf  ;;  %v2088_v46 = vsel %vm445_vm1, %v4184_v58, -inf }
 0x895   :  { %v2068_v39 = vrot.slane %v2067_v11, 4  ;;  %v2075_v49 = vrot.slane %v2074_v19, 4  ;;  %v2082_v28 = vrot.slane %v2081_v54, 4  ;;  %v2089_v29 = vrot.slane %v2088_v46, 4 }
 0x896   :  { %v2095_v16 = vsel %vm445_vm1, %v4190_v44, -inf  ;;  %v2102_v9 = vsel %vm445_vm1, %v4192_v53, -inf  ;;  %v4210_v31 = vmul.f32 %v4194_v4, %v1984_v60  ;;  %v4213_v37 = vmul.f32 %v4194_v4, %v1988_v15 }
 0x897   :  { %v2069_v24 = vmax.f32 %v2067_v11, %v2068_v39  ;;  %v2076_v33 = vmax.f32 %v2074_v19, %v2075_v49  ;;  %v2083_v18 = vmax.f32 %v2081_v54, %v2082_v28  ;;  %v2090_v43 = vmax.f32 %v2088_v46, %v2089_v29 }
 0x898   :  { %v2096_v27 = vrot.slane %v2095_v16, 4  ;;  %v2103_v35 = vrot.slane %v2102_v9, 4  ;;  %v4216_v56 = vmul.f32 %v4194_v4, %v1992_v22  ;;  %v4219_v50 = vmul.f32 %v4194_v4, %v1996_v23 }
 0x899   :  { %v2070_v42 = vrot.slane %v2069_v24, 2  ;;  %v2077_v45 = vrot.slane %v2076_v33, 2  ;;  %v2084_v8 = vrot.slane %v2083_v18, 2  ;;  %v2091_v17 = vrot.slane %v2090_v43, 2 }
 0x89a   :  { %v2097_v59 = vmax.f32 %v2095_v16, %v2096_v27  ;;  %v2104_v10 = vmax.f32 %v2102_v9, %v2103_v35  ;;  %v4222_v13 = vmul.f32 %v4194_v4, %v2000_v0  ;;  %v2109_v22 = vsel %vm445_vm1, %v4210_v31, -inf }
 0x89b   :  { %v2071_v20 = vmax.f32 %v2069_v24, %v2070_v42  ;;  %v2078_v12 = vmax.f32 %v2076_v33, %v2077_v45  ;;  %v2085_v21 = vmax.f32 %v2083_v18, %v2084_v8  ;;  %v2092_v52 = vmax.f32 %v2090_v43, %v2091_v17 }
 0x89c   :  { %v2098_v38 = vrot.slane %v2097_v59, 2  ;;  %v2105_v57 = vrot.slane %v2104_v10, 2  ;;  %v2116_v1 = vsel %vm445_vm1, %v4213_v37, -inf  ;;  %v2110_v0 = vrot.slane %v2109_v22, 4 }
 0x89d   :  { %v2072_v30 = vrot.slane %v2071_v20, 1  ;;  %v2079_v41 = vrot.slane %v2078_v12, 1  ;;  %v2086_v55 = vrot.slane %v2085_v21, 1  ;;  %v2093_v23 = vrot.slane %v2092_v52, 1 }
 0x89e   :  { %v2099_v48 = vmax.f32 %v2097_v59, %v2098_v38  ;;  %v2106_v14 = vmax.f32 %v2104_v10, %v2105_v57  ;;  %v2117_v60 = vrot.slane %v2116_v1, 4  ;;  %v2111_v28 = vmax.f32 %v2109_v22, %v2110_v0 }
 0x89f   :  { %v2073_v11 = vmax.f32 %v2071_v20, %v2072_v30  ;;  %v2080_v19 = vmax.f32 %v2078_v12, %v2079_v41  ;;  %v2087_v54 = vmax.f32 %v2085_v21, %v2086_v55  ;;  %v2094_v46 = vmax.f32 %v2092_v52, %v2093_v23 }
 0x8a0   :  { %v2100_v39 = vrot.slane %v2099_v48, 1  ;;  %v2107_v49 = vrot.slane %v2106_v14, 1  ;;  %v2118_v29 = vmax.f32 %v2116_v1, %v2117_v60  ;;  %v2112_v43 = vrot.slane %v2111_v28, 2 }
 0x8a1   :  { %v2151_v16 = vsub.f32 %v4178_v6, %v2073_v11  ;;  %v2152_v9 = vsub.f32 %v4180_v7, %v2080_v19  ;;  %v2153_v15 = vsub.f32 %v4182_v47, %v2087_v54  ;;  %v2154_v24 = vsub.f32 %v4184_v58, %v2094_v46 }
 0x8a2   :  { %v2101_v33 = vmax.f32 %v2099_v48, %v2100_v39  ;;  %v2108_v18 = vmax.f32 %v2106_v14, %v2107_v49  ;;  %v2119_v27 = vrot.slane %v2118_v29, 2  ;;  %v4234_v8 = vmul.f32 %v4194_v4, %v4187_v32 }
 0x8a3   :  { %v2163_v35 = vmul.f32 1.442695, %v2151_v16  ;;  %v2165_v42 = vmul.f32 1.442695, %v2152_v9  ;;  %v2167_v45 = vmul.f32 1.442695, %v2153_v15  ;;  %v2113_v59 = vmax.f32 %v2111_v28, %v2112_v43 }
 0x8a4   :  { %v2155_v17 = vsub.f32 %v4190_v44, %v2101_v33  ;;  %v2156_v6 = vsub.f32 %v4192_v53, %v2108_v18  ;;  %v2169_v7 = vmul.f32 1.442695, %v2154_v24  ;;  %v2120_v47 = vmax.f32 %v2118_v29, %v2119_v27 }
 0x8a5   :  { %3481 = vpow2.f32 %v2163_v35  ;;  %v2123_v58 = vsel %vm445_vm1, %v4216_v56, -inf  ;;  %v2130_v10 = vsel %vm445_vm1, %v4219_v50, -inf  ;;  %v2114_v21 = vrot.slane %v2113_v59, 1 }
 0x8a6   :  { %3483 = vpow2.f32 %v2165_v42  ;;  %v2171_v20 = vmul.f32 1.442695, %v2155_v17  ;;  %v2173_v12 = vmul.f32 1.442695, %v2156_v6  ;;  %v2121_v32 = vrot.slane %v2120_v47, 1 }
 0x8a7   :  { %3485 = vpow2.f32 %v2167_v45  ;;  %v2124_v4 = vrot.slane %v2123_v58, 4  ;;  %v2131_v44 = vrot.slane %v2130_v10, 4  ;;  %v2115_v53 = vmax.f32 %v2113_v59, %v2114_v21 }
 0x8a8   :  { %3487 = vpow2.f32 %v2169_v7  ;;  %v2137_v52 = vsel %vm445_vm1, %v4222_v13, -inf  ;;  %v2144_v38 = vsel %vm445_vm1, %v4234_v8, -inf  ;;  %v2122_v57 = vmax.f32 %v2120_v47, %v2121_v32 }
 0x8a9   :  { %3489 = vpow2.f32 %v2171_v20  ;;  %v2125_v22 = vmax.f32 %v2123_v58, %v2124_v4  ;;  %v2132_v1 = vmax.f32 %v2130_v10, %v2131_v44  ;;  %v2138_v30 = vrot.slane %v2137_v52, 4 }
 0x8aa   :  { %3491 = vpow2.f32 %v2173_v12  ;;  %v2145_v41 = vrot.slane %v2144_v38, 4  ;;  %v2157_v55 = vsub.f32 %v4210_v31, %v2115_v53  ;;  %v2158_v14 = vsub.f32 %v4213_v37, %v2122_v57 }
 0x8ab   :  { %v2126_v23 = vrot.slane %v2125_v22, 2  ;;  %v2133_v48 = vrot.slane %v2132_v1, 2  ;;  %v2139_v0 = vmax.f32 %v2137_v52, %v2138_v30 }
 0x8ac   :  { %v2146_v60 = vmax.f32 %v2144_v38, %v2145_v41  ;;  %v2175_v11 = vmul.f32 1.442695, %v2157_v55  ;;  %v2177_v46 = vmul.f32 1.442695, %v2158_v14 }
 0x8ad   :  { %v2127_v19 = vmax.f32 %v2125_v22, %v2126_v23  ;;  %v2134_v54 = vmax.f32 %v2132_v1, %v2133_v48  ;;  %v2140_v39 = vrot.slane %v2139_v0, 2 }
 0x8ae   :  { %v2147_v49 = vrot.slane %v2146_v60, 2  ;;  %3493 = vpow2.f32 %v2175_v11 }
 0x8af   :  { %v2128_v28 = vrot.slane %v2127_v19, 1  ;;  %v2135_v29 = vrot.slane %v2134_v54, 1  ;;  %3495 = vpow2.f32 %v2177_v46  ;;  %v2141_v16 = vmax.f32 %v2139_v0, %v2140_v39 }
 0x8b0   :  { %v2148_v9 = vmax.f32 %v2146_v60, %v2147_v49 }
 0x8b1   :  { %v2129_v15 = vmax.f32 %v2127_v19, %v2128_v28  ;;  %v2136_v31 = vmax.f32 %v2134_v54, %v2135_v29  ;;  %v2142_v33 = vrot.slane %v2141_v16, 1 }
 0x8b2   :  { %v4248_v24 = vpop.eup %3481  ;;  %v2149_v37 = vrot.slane %v2148_v9, 1 }
 0x8b3   :  { %v4250_v18 = vpop.eup %3483  ;;  %v2187_v43 = vsel %vm445_vm1, %v4248_v24, 0.0  ;;  %v2159_v27 = vsub.f32 %v4216_v56, %v2129_v15  ;;  %v2160_v35 = vsub.f32 %v4219_v50, %v2136_v31  ;;  %v2143_v6 = vmax.f32 %v2141_v16, %v2142_v33 }
 0x8b4   :  { %v4256_v42 = vpop.eup %3485  ;;  %v2188_v45 = vrot.slane %v2187_v43, 4  ;;  %v2194_v17 = vsel %vm445_vm1, %v4250_v18, 0.0  ;;  %v2150_v7 = vmax.f32 %v2148_v9, %v2149_v37 }
 0x8b5   :  { %v4260_v59 = vpop.eup %3487  ;;  %v2195_v47 = vrot.slane %v2194_v17, 4  ;;  %v2201_v58 = vsel %vm445_vm1, %v4256_v42, 0.0  ;;  %v2179_v10 = vmul.f32 1.442695, %v2159_v27  ;;  %v2181_v20 = vmul.f32 1.442695, %v2160_v35 }
 0x8b6   :  { %v4264_v12 = vpop.eup %3489  ;;  %v2189_v56 = vadd.f32 %v2188_v45, %v2187_v43  ;;  %v2202_v50 = vrot.slane %v2201_v58, 4  ;;  %v2208_v21 = vsel %vm445_vm1, %v4260_v59, 0.0  ;;  %v2161_v32 = vsub.f32 %v4222_v13, %v2143_v6 }
 0x8b7   :  { %v4269_v4 = vpop.eup %3491  ;;  %v2196_v44 = vadd.f32 %v2195_v47, %v2194_v17  ;;  %v2209_v53 = vrot.slane %v2208_v21, 4  ;;  %v2215_v52 = vsel %vm445_vm1, %v4264_v12, 0.0  ;;  %v2162_v38 = vsub.f32 %v4234_v8, %v2150_v7 }
 0x8b8   :  { %v2190_v57 = vrot.slane %v2189_v56, 2  ;;  %v2203_v22 = vadd.f32 %v2202_v50, %v2201_v58  ;;  %v2216_v1 = vrot.slane %v2215_v52, 4  ;;  %v2222_v30 = vsel %vm445_vm1, %v4269_v4, 0.0 }
 0x8b9   :  { %v2197_v41 = vrot.slane %v2196_v44, 2  ;;  %v2210_v55 = vadd.f32 %v2209_v53, %v2208_v21  ;;  %v2223_v23 = vrot.slane %v2222_v30, 4  ;;  %3497 = vpow2.f32 %v2179_v10 }
 0x8ba   :  { %v2204_v13 = vrot.slane %v2203_v22, 2  ;;  %v2217_v48 = vadd.f32 %v2216_v1, %v2215_v52  ;;  %3499 = vpow2.f32 %v2181_v20  ;;  %v2183_v14 = vmul.f32 1.442695, %v2161_v32 }
 0x8bb   :  { %v4276_v0 = vpop.eup %3493  ;;  %v2211_v60 = vrot.slane %v2210_v55, 2  ;;  %v2224_v11 = vadd.f32 %v2223_v23, %v2222_v30  ;;  %v2185_v19 = vmul.f32 1.442695, %v2162_v38  ;;  %v2191_v8 = vadd.f32 %v2190_v57, %v2189_v56 }
 0x8bc   :  { %v4278_v54 = vpop.eup %3495  ;;  %v2218_v46 = vrot.slane %v2217_v48, 2  ;;  %3501 = vpow2.f32 %v2183_v14  ;;  %v2229_v39 = vsel %vm445_vm1, %v4276_v0, 0.0  ;;  %v2198_v49 = vadd.f32 %v2197_v41, %v2196_v44 }
 0x8bd   :  { %v2225_v28 = vrot.slane %v2224_v11, 2  ;;  %3503 = vpow2.f32 %v2185_v19  ;;  %v2230_v29 = vrot.slane %v2229_v39, 4  ;;  %v2236_v16 = vsel %vm445_vm1, %v4278_v54, 0.0 }
 0x8be   :  { %v2237_v9 = vrot.slane %v2236_v16, 4  ;;  %v2192_v15 = vrot.slane %v2191_v8, 1  ;;  %v2199_v31 = vrot.slane %v2198_v49, 1  ;;  %v2205_v33 = vadd.f32 %v2204_v13, %v2203_v22 }
 0x8bf   :  { %v2231_v37 = vadd.f32 %v2230_v29, %v2229_v39  ;;  %v2212_v43 = vadd.f32 %v2211_v60, %v2210_v55  ;;  %v2219_v27 = vadd.f32 %v2218_v46, %v2217_v48  ;;  %v2226_v35 = vadd.f32 %v2225_v28, %v2224_v11 }
 0x8c0   :  { %v2238_v45 = vadd.f32 %v2237_v9, %v2236_v16  ;;  %v2193_v17 = vadd.f32 %v2192_v15, %v2191_v8  ;;  %v2200_v6 = vadd.f32 %v2199_v31, %v2198_v49  ;;  %v2206_v7 = vrot.slane %v2205_v33, 1 }
 0x8c1   :  { %v2232_v47 = vrot.slane %v2231_v37, 2  ;;  %v2213_v58 = vrot.slane %v2212_v43, 1  ;;  %v2220_v10 = vrot.slane %v2219_v27, 1  ;;  %v2227_v20 = vrot.slane %v2226_v35, 1 }
 0x8c2   :  { %v2239_v56 = vrot.slane %v2238_v45, 2  ;;  %v2207_v50 = vadd.f32 %v2206_v7, %v2205_v33  ;;  %3505 = vrcp.f32 %v2193_v17  ;;  %v2296_v7 = vpop.permute.xlu1 %2295 }
 0x8c3   :  { %v2214_v21 = vadd.f32 %v2213_v58, %v2212_v43  ;;  %3507 = vrcp.f32 %v2200_v6  ;;  %v2221_v32 = vadd.f32 %v2220_v10, %v2219_v27  ;;  %v2228_v44 = vadd.f32 %v2227_v20, %v2226_v35 }
 0x8c4   :  { %3509 = vrcp.f32 %v2207_v50  ;;  %v2233_v53 = vadd.f32 %v2232_v47, %v2231_v37  ;;  %v2240_v52 = vadd.f32 %v2239_v56, %v2238_v45 }
 0x8c5   :  { %3511 = vrcp.f32 %v2214_v21 }
 0x8c6   :  { %v4284_v38 = vpop.eup %3497  ;;  %3513 = vrcp.f32 %v2221_v32  ;;  %v2234_v57 = vrot.slane %v2233_v53, 1  ;;  %v2241_v22 = vrot.slane %v2240_v52, 1 }
 0x8c7   :  { %v4286_v1 = vpop.eup %3499  ;;  %v2243_v30 = vsel %vm445_vm1, %v4284_v38, 0.0  ;;  %3515 = vrcp.f32 %v2228_v44 }
 0x8c8   :  { %v2244_v41 = vrot.slane %v2243_v30, 4  ;;  %v2250_v55 = vsel %vm445_vm1, %v4286_v1, 0.0  ;;  %v2235_v48 = vadd.f32 %v2234_v57, %v2233_v53  ;;  %v2242_v19 = vadd.f32 %v2241_v22, %v2240_v52 }
 0x8c9   :  { %v4292_v23 = vpop.eup %3501  ;;  %v2251_v13 = vrot.slane %v2250_v55, 4 }
 0x8ca   :  { %v4294_v14 = vpop.eup %3503  ;;  %v2245_v60 = vadd.f32 %v2244_v41, %v2243_v30  ;;  %v2257_v11 = vsel %vm445_vm1, %v4292_v23, 0.0  ;;  %3517 = vrcp.f32 %v2235_v48 }
 0x8cb   :  { %v2252_v8 = vadd.f32 %v2251_v13, %v2250_v55  ;;  %v2258_v46 = vrot.slane %v2257_v11, 4  ;;  %v2264_v39 = vsel %vm445_vm1, %v4294_v14, 0.0  ;;  %3519 = vrcp.f32 %v2242_v19 }
 0x8cc   :  { %v2246_v49 = vrot.slane %v2245_v60, 2  ;;  %v2265_v28 = vrot.slane %v2264_v39, 4 }
 0x8cd   :  { %v2253_v29 = vrot.slane %v2252_v8, 2  ;;  %v2259_v16 = vadd.f32 %v2258_v46, %v2257_v11 }
 0x8ce   :  { %v2266_v9 = vadd.f32 %v2265_v28, %v2264_v39  ;;  %v2247_v15 = vadd.f32 %v2246_v49, %v2245_v60 }
 0x8cf   :  { %v3506_v31 = vpop.eup %3505  ;;  %v2260_v33 = vrot.slane %v2259_v16, 2  ;;  %v2254_v37 = vadd.f32 %v2253_v29, %v2252_v8 }
 0x8d0   :  { %v3508_v43 = vpop.eup %3507  ;;  %v2267_v27 = vrot.slane %v2266_v9, 2  ;;  %v2283_v35 = vmul.f32 %v3506_v31, %v4248_v24  ;;  %v2248_v45 = vrot.slane %v2247_v15, 1 }
 0x8d1   :  { %v3510_v17 = vpop.eup %3509  ;;  %v2284_v6 = vmul.f32 %v3508_v43, %v4250_v18  ;;  %v2255_v47 = vrot.slane %v2254_v37, 1  ;;  %v2261_v58 = vadd.f32 %v2260_v33, %v2259_v16 }
 0x8d2   :  { %v3512_v10 = vpop.eup %3511  ;;  %v2285_v20 = vmul.f32 %v3510_v17, %v4256_v42  ;;  %v2301_v56 = vmul.f32 %v2296_v7, %v2283_v35  ;;  %v2249_v50 = vadd.f32 %v2248_v45, %v2247_v15  ;;  %v2268_v21 = vadd.f32 %v2267_v27, %v2266_v9 }
 0x8d3   :  { %v3514_v32 = vpop.eup %3513  ;;  %v2286_v44 = vmul.f32 %v3512_v10, %v4260_v59  ;;  %v2302_v53 = vmul.f32 %v2296_v7, %v2284_v6  ;;  %v2256_v52 = vadd.f32 %v2255_v47, %v2254_v37  ;;  %v2262_v57 = vrot.slane %v2261_v58, 1 }
 0x8d4   :  { %v3516_v24 = vpop.eup %3515  ;;  %v2287_v22 = vmul.f32 %v3514_v32, %v4264_v12  ;;  %v2303_v30 = vmul.f32 %v2296_v7, %v2285_v20  ;;  %v2313_v18 = vsel %vm445_vm1, %v2301_v56, 0.0  ;;  %v2269_v41 = vrot.slane %v2268_v21, 1 }
 0x8d5   :  { %v2288_v55 = vmul.f32 %v3516_v24, %v4269_v4  ;;  %v2304_v13 = vmul.f32 %v2296_v7, %v2286_v44  ;;  %v2314_v42 = vrot.slane %v2313_v18, 4  ;;  %v2320_v48 = vsel %vm445_vm1, %v2302_v53, 0.0  ;;  %v2298_v24 = vpop.permute.xlu1 %2297 }
 0x8d6   :  { %v2305_v60 = vmul.f32 %v2296_v7, %v2287_v22  ;;  %v2321_v11 = vrot.slane %v2320_v48, 4  ;;  %v2327_v59 = vsel %vm445_vm1, %v2303_v30, 0.0  ;;  %v2263_v19 = vadd.f32 %v2262_v57, %v2261_v58 }
 0x8d7   :  { %v2306_v8 = vmul.f32 %v2296_v7, %v2288_v55  ;;  %v2315_v46 = vadd.f32 %v2314_v42, %v2313_v18  ;;  %v2328_v39 = vrot.slane %v2327_v59, 4  ;;  %v2334_v12 = vsel %vm445_vm1, %v2304_v13, 0.0  ;;  %v3518_v33 = vpop.eup %3517 }
 0x8d8   :  { %v2322_v49 = vadd.f32 %v2321_v11, %v2320_v48  ;;  %v2335_v28 = vrot.slane %v2334_v12, 4  ;;  %v2341_v29 = vsel %vm445_vm1, %v2305_v60, 0.0  ;;  %v2270_v16 = vadd.f32 %v2269_v41, %v2268_v21  ;;  %v3520_v35 = vpop.eup %3519 }
 0x8d9   :  { %v2316_v4 = vrot.slane %v2315_v46, 2  ;;  %v2329_v9 = vadd.f32 %v2328_v39, %v2327_v59  ;;  %v2342_v15 = vrot.slane %v2341_v29, 4  ;;  %v2348_v31 = vsel %vm445_vm1, %v2306_v8, 0.0 }
 0x8da   :  { %v2323_v37 = vrot.slane %v2322_v49, 2  ;;  %v2336_v43 = vadd.f32 %v2335_v28, %v2334_v12  ;;  %v2349_v27 = vrot.slane %v2348_v31, 4  ;;  %3521 = vrcp.f32 %v2249_v50 }
 0x8db   :  { %v2317_v45 = vadd.f32 %v2316_v4, %v2315_v46  ;;  %v2330_v17 = vrot.slane %v2329_v9, 2  ;;  %v2343_v6 = vadd.f32 %v2342_v15, %v2341_v29  ;;  %3523 = vrcp.f32 %v2256_v52 }
 0x8dc   :  { %v2324_v7 = vadd.f32 %v2323_v37, %v2322_v49  ;;  %v2337_v47 = vrot.slane %v2336_v43, 2  ;;  %v2350_v58 = vadd.f32 %v2349_v27, %v2348_v31  ;;  %3525 = vrcp.f32 %v2263_v19 }
 0x8dd   :  { %v2318_v10 = vrot.slane %v2317_v45, 1  ;;  %v2331_v20 = vadd.f32 %v2330_v17, %v2329_v9  ;;  %v2344_v56 = vrot.slane %v2343_v6, 2  ;;  %3527 = vrcp.f32 %v2270_v16 }
 0x8de   :  { %v2325_v21 = vrot.slane %v2324_v7, 1  ;;  %v2338_v32 = vadd.f32 %v2337_v47, %v2336_v43  ;;  %v2289_v44 = vmul.f32 %v3518_v33, %v4276_v0  ;;  %v2290_v53 = vmul.f32 %v3520_v35, %v4278_v54 }
 0x8df   :  { %v2319_v50 = vadd.f32 %v2318_v10, %v2317_v45  ;;  %v2332_v57 = vrot.slane %v2331_v20, 1  ;;  %v2345_v22 = vadd.f32 %v2344_v56, %v2343_v6  ;;  %v2351_v30 = vrot.slane %v2350_v58, 2 }
 0x8e0   :  { %v2326_v52 = vadd.f32 %v2325_v21, %v2324_v7  ;;  %v2339_v18 = vrot.slane %v2338_v32, 1  ;;  %v2307_v41 = vmul.f32 %v2298_v24, %v2289_v44  ;;  %v2308_v55 = vmul.f32 %v2298_v24, %v2290_v53 }
 0x8e1   :  { %v2333_v13 = vadd.f32 %v2332_v57, %v2331_v20  ;;  %v2346_v42 = vrot.slane %v2345_v22, 1  ;;  %v2352_v48 = vadd.f32 %v2351_v30, %v2350_v58 }
 0x8e2   :  { %v2355_v60 = vsel %vm445_vm1, %v2307_v41, 0.0  ;;  %v2362_v11 = vsel %vm445_vm1, %v2308_v55, 0.0  ;;  %v2419_v0 = vsel %vm796_vm2, %v2326_v52, %v2319_v50  ;;  %v2340_v54 = vadd.f32 %v2339_v18, %v2338_v32 }
 0x8e3   :  { %v2356_v59 = vrot.slane %v2355_v60, 4  ;;  %v2353_v19 = vrot.slane %v2352_v48, 1  ;;  %v2363_v8 = vrot.slane %v2362_v11, 4  ;;  %v2347_v46 = vadd.f32 %v2346_v42, %v2345_v22 }
 0x8e4   :  { %v2420_v39 = vsel %vm798_vm3, %v2333_v13, %v2419_v0 }
 0x8e5   :  { %v2354_v12 = vadd.f32 %v2353_v19, %v2352_v48  ;;  %v2357_v49 = vadd.f32 %v2356_v59, %v2355_v60  ;;  %v2364_v28 = vadd.f32 %v2363_v8, %v2362_v11  ;;  %v2421_v29 = vsel %vm800_vm4, %v2340_v54, %v2420_v39 }
 0x8e6   :  { %v2422_v16 = vsel %vm802_vm5, %v2347_v46, %v2421_v29 }
 0x8e7   :  { %v3522_v4 = vpop.eup %3521  ;;  %v2358_v9 = vrot.slane %v2357_v49, 2  ;;  %v2365_v15 = vrot.slane %v2364_v28, 2  ;;  %v2423_v31 = vsel %vm804_vm6, %v2354_v12, %v2422_v16 }
 0x8e8   :  { %v3524_v33 = vpop.eup %3523  ;;  %v2291_v37 = vmul.f32 %v3522_v4, %v4284_v38 }
 0x8e9   :  { %v3526_v43 = vpop.eup %3525  ;;  %v2292_v27 = vmul.f32 %v3524_v33, %v4286_v1  ;;  %v2359_v35 = vadd.f32 %v2358_v9, %v2357_v49  ;;  %v2366_v45 = vadd.f32 %v2365_v15, %v2364_v28  ;;  %v3316_v15 = vld [vmem:[%s4451_s4 + $0x1] ss:$0 sm:$0xff] }
 0x8ea   :  { %v3528_v17 = vpop.eup %3527  ;;  %v2293_v6 = vmul.f32 %v3526_v43, %v4292_v23  ;;  %v2309_v7 = vmul.f32 %v2298_v24, %v2291_v37 }
 0x8eb   :  { %v2294_v47 = vmul.f32 %v3528_v17, %v4294_v14  ;;  %v2310_v58 = vmul.f32 %v2298_v24, %v2292_v27  ;;  %v2360_v10 = vrot.slane %v2359_v35, 1  ;;  %v2367_v20 = vrot.slane %v2366_v45, 1 }
 0x8ec   :  { %v2311_v56 = vmul.f32 %v2298_v24, %v2293_v6  ;;  %v2369_v21 = vsel %vm445_vm1, %v2309_v7, 0.0 }
 0x8ed   :  { %v2312_v32 = vmul.f32 %v2298_v24, %v2294_v47  ;;  %v2370_v44 = vrot.slane %v2369_v21, 4  ;;  %v2376_v38 = vsel %vm445_vm1, %v2310_v58, 0.0  ;;  %v2361_v53 = vadd.f32 %v2360_v10, %v2359_v35 }
 0x8ee   :  { %v2377_v1 = vrot.slane %v2376_v38, 4  ;;  %v2383_v50 = vsel %vm445_vm1, %v2311_v56, 0.0  ;;  %v2368_v57 = vadd.f32 %v2367_v20, %v2366_v45 }
 0x8ef   :  { %v2371_v22 = vadd.f32 %v2370_v44, %v2369_v21  ;;  %v2384_v23 = vrot.slane %v2383_v50, 4  ;;  %v2390_v30 = vsel %vm445_vm1, %v2312_v32, 0.0  ;;  %v2424_v14 = vsel %vm806_vm7, %v2361_v53, %v2423_v31 }
 0x8f0   :  { %v2378_v52 = vadd.f32 %v2377_v1, %v2376_v38  ;;  %v2391_v18 = vrot.slane %v2390_v30, 4  ;;  %v2425_v41 = vsel %vm808_vm8, %v2368_v57, %v2424_v14 }
 0x8f1   :  { %v2372_v55 = vrot.slane %v2371_v22, 2  ;;  %v2385_v24 = vadd.f32 %v2384_v23, %v2383_v50  ;;  %3391 = vmatprep.mubr.msk.f32.mxu1 %vm156_vm0, %v2425_v41 }
 0x8f2   :  { %v2379_v13 = vrot.slane %v2378_v52, 2  ;;  %v2392_v42 = vadd.f32 %v2391_v18, %v2390_v30 }
 0x8f3   :  { %v2373_v48 = vadd.f32 %v2372_v55, %v2371_v22  ;;  %v2386_v60 = vrot.slane %v2385_v24, 2 }
 0x8f4   :  { %v2380_v11 = vadd.f32 %v2379_v13, %v2378_v52  ;;  %v2393_v0 = vrot.slane %v2392_v42, 2 }
 0x8f5   :  { %v2374_v59 = vrot.slane %v2373_v48, 1  ;;  %v2387_v54 = vadd.f32 %v2386_v60, %v2385_v24 }
 0x8f6   :  { %v2381_v19 = vrot.slane %v2380_v11, 1  ;;  %v2394_v8 = vadd.f32 %v2393_v0, %v2392_v42 }
 0x8f7   :  { %v2375_v46 = vadd.f32 %v2374_v59, %v2373_v48  ;;  %v2388_v39 = vrot.slane %v2387_v54, 1 }
 0x8f8   :  { %v2382_v12 = vadd.f32 %v2381_v19, %v2380_v11  ;;  %v2395_v49 = vrot.slane %v2394_v8, 1 }
 0x8f9   :  { %v2389_v28 = vadd.f32 %v2388_v39, %v2387_v54 }
 0x8fa   :  { %v2396_v29 = vadd.f32 %v2395_v49, %v2394_v8  ;;  %v2426_v16 = vsel %vm796_vm2, %v2382_v12, %v2375_v46 }
 0x8fb   :  { %v2427_v4 = vsel %vm798_vm3, %v2389_v28, %v2426_v16 }
 0x8fc   :  { %v2428_v9 = vsel %vm800_vm4, %v2396_v29, %v2427_v4 }
 0x8fd   :  { %3392 = vmatmul.mubr.msk.f32.vlgmr.msra.gmra.mxu1 %vm156_vm0, %v2428_v9 }
 0x9bd   :  { %v3393_v31 = vpop.f32.mrf.mxu1 }
 0x9be   :  { %v2505_v33 = vadd.f32 %v3393_v31, %v3316_v15 }
 0x9bf   :  { %v2499_v37 = vpop.f32.mrf.mxu1 }
 0x9c0   :  { %v2533_v43 = vrot.slane %v2505_v33, %v3714_v5  ;;  %v2500_v27 = vadd.f32 %v3316_v15, %v2499_v37  ;;  %v3323_v15 = vld [vmem:[%s4456_s9 + $0x8] sm:$0xff] }
 0x9c1   :  { %3394 = vmatprep.subr.mxu0 %v3323_v15 }
 0x9c2   :  { %v2534_v35 = vcombine.high %v2533_v43, %v2533_v43  ;;  %v2510_v45 = vcombine.high %v2500_v27, %v2500_v27  ;;  %v2517_v17 = vrot.slane %v2500_v27, %v3714_v5  ;;  %v2545_v6 = vadd.f32 %v2533_v43, %v4073_v51  ;;  %3395 = vmatpush3.msra.mxu0 %v3323_v15 }
 0x9c4   :  { %v4343_v7 = vadd.f32 %v2534_v35, %v4076_v63  ;;  %v2524_v47 = vrot.slane %v2510_v45, %v3714_v5  ;;  %v2525_v58 = vcombine.high %v2517_v17, %v2517_v17  ;;  %v2541_v20 = vadd.f32 %v2517_v17, %v4080_v40  ;;  %v3321_v45 = vld [vmem:[%s4454_s7 + $0x1] ss:$0 sm:$0xff] }
 0x9c5   :  { %v3322_v17 = vld [vmem:[%s4455_s8 + $0x1] ss:$0 sm:$0xff] }
 0x9c6   :  { %v2526_v10 = vcombine.high %v2524_v47, %v2524_v47  ;;  %v2542_v56 = vadd.f32 %v2525_v58, %v4083_v2  ;;  %v2574_v21 = vcombine.low %v2545_v6, %v4343_v7  ;;  %v4350_v32 = vadd.f32 %v2524_v47, %v4088_v25 }
 0x9c7   :  { %v2767_v47 = vrot.slane %v3321_v45, %v3714_v5  ;;  %v2792_v58 = vcombine.high %v3322_v17, %v3322_v17 }
 0x9c8   :  { %v2581_v44 = vrot.slane %v2574_v21, %v3714_v5  ;;  %v2544_v51 = vadd.f32 %v2526_v10, %v4091_v34  ;;  %v2557_v38 = vcombine.low %v2541_v20, %v2542_v56 }
 0x9c9   :  { %v2775_v21 = vcombine.high %v2767_v47, %v2767_v47 }
 0x9ca   :  { %v2587_v63 = vsel %vm969_vm9, %v2581_v44, 0.0  ;;  %v2558_v53 = vcombine.low %v4350_v32, %v2544_v51  ;;  %v2565_v1 = vrot.slane %v2557_v38, %v3714_v5  ;;  %v2806_v44 = vrot.slane %v2792_v58, %v3714_v5 }
 0x9cb   :  { %2588 = vadd.xlane.f32.xlu1 %v2587_v63 }
 0x9cc   :  { %v2572_v40 = vrot.slane %v2558_v53, %v3714_v5 }
 0x9ce   :  { %v2573_v2 = vcombine.low %v2565_v1, %v2572_v40 }
 0x9d0   :  { %v2584_v50 = vsel %vm156_vm0, %v2573_v2, 0.0 }
 0x9d1   :  { %2585 = vadd.xlane.f32.xlu0 %v2584_v50 }
 0xa54   :  { %v2589_v25 = vpop.xlane.xlu1 %2588 }
 0xa55   :  { %v2591_v57 = vmul.f32 0.125, %v2589_v25 }
 0xa57   :  { %v2628_v22 = vrot.slane %v2591_v57, %v3993_v36  ;;  %v2635_v34 = vrot.slane %v2591_v57, %v3996_v26 }
 0xa59   :  { %v4361_v14 = vsub.f32 %v2545_v6, %v2628_v22  ;;  %v4364_v52 = vsub.f32 %v4343_v7, %v2635_v34  ;;  %v2760_v6 = vcombine.high %v3321_v45, %v3321_v45  ;;  %v2808_v34 = vcombine.high %v2806_v44, %v2806_v44 }
 0xa5a   :  { %v2586_v23 = vpop.xlane.xlu0 %2585 }
 0xa5b   :  { %v2590_v30 = vmul.f32 0.125, %v2586_v23  ;;  %v2652_v11 = vmul.f32 %v4361_v14, %v4361_v14  ;;  %v2653_v0 = vmul.f32 %v4364_v52, %v4364_v52  ;;  %v2774_v10 = vrot.slane %v2760_v6, %v3714_v5 }
 0xa5d   :  { %v2600_v18 = vrot.slane %v2590_v30, %v3993_v36  ;;  %v2607_v41 = vrot.slane %v2590_v30, %v3996_v26  ;;  %v2614_v55 = vrot.slane %v2590_v30, %v4001_v61  ;;  %v2621_v24 = vrot.slane %v2590_v30, %v4004_v62 }
 0xa5e   :  { %v2677_v28 = vcombine.low %v2652_v11, %v2653_v0  ;;  %v2776_v1 = vcombine.high %v2774_v10, %v2774_v10 }
 0xa5f   :  { %v2642_v13 = vsub.f32 %v2541_v20, %v2600_v18  ;;  %v2643_v42 = vsub.f32 %v2542_v56, %v2607_v41  ;;  %v2644_v48 = vsub.f32 %v4350_v32, %v2614_v55  ;;  %v2645_v60 = vsub.f32 %v2544_v51, %v2621_v24 }
 0xa60   :  { %v2684_v4 = vrot.slane %v2677_v28, %v3714_v5  ;;  %v2799_v20 = vrot.slane %v3322_v17, %v3714_v5  ;;  %v3325_v28 = vld [vmem:[%s4457_s10 + $0x1] ss:$0 sm:$0xff] }
 0xa61   :  { %v2648_v59 = vmul.f32 %v2642_v13, %v2642_v13  ;;  %v2649_v54 = vmul.f32 %v2643_v42, %v2643_v42  ;;  %v2650_v19 = vmul.f32 %v2644_v48, %v2644_v48  ;;  %v2651_v8 = vmul.f32 %v2645_v60, %v2645_v60 }
 0xa62   :  { %v2690_v9 = vsel %vm969_vm9, %v2684_v4, 0.0  ;;  %v2807_v40 = vcombine.high %v2799_v20, %v2799_v20 }
 0xa63   :  { %v2660_v46 = vcombine.low %v2648_v59, %v2649_v54  ;;  %v2661_v39 = vcombine.low %v2650_v19, %v2651_v8 }
 0xa65   :  { %v2668_v12 = vrot.slane %v2660_v46, %v3714_v5  ;;  %v2675_v49 = vrot.slane %v2661_v39, %v3714_v5 }
 0xa67   :  { %v2676_v29 = vcombine.low %v2668_v12, %v2675_v49 }
 0xa69   :  { %v2687_v16 = vsel %vm156_vm0, %v2676_v29, 0.0 }
 0xa6a   :  { %2688 = vadd.xlane.f32.xlu0 %v2687_v16 }
 0xa6e   :  { %2691 = vadd.xlane.f32.xlu0 %v2690_v9 }
 0xaf3   :  { %v2689_v31 = vpop.xlane.xlu0 %2688 }
 0xaf4   :  { %v2693_v33 = vmul.f32 0.125, %v2689_v31 }
 0xaf6   :  { %v2695_v37 = vadd.f32 1e-05, %v2693_v33 }
 0xaf7   :  { %v2692_v43 = vpop.xlane.xlu0 %2691 }
 0xaf8   :  { %3529 = vrsqrt.f32 %v2695_v37  ;;  %v2694_v27 = vmul.f32 0.125, %v2692_v43 }
 0xafa   :  { %v2696_v35 = vadd.f32 1e-05, %v2694_v27 }
 0xafc   :  { %3531 = vrsqrt.f32 %v2696_v35  ;;  %v3330_v35 = vld [vmem:[%s4459_s12 + $0x1] ss:$0 sm:$0xff] }
 0xb05   :  { %v3530_v56 = vpop.eup %3529 }
 0xb06   :  { %v2707_v51 = vrot.slane %v3530_v56, %v3993_v36  ;;  %v2714_v38 = vrot.slane %v3530_v56, %v3996_v26  ;;  %v2721_v63 = vrot.slane %v3530_v56, %v4001_v61  ;;  %v2728_v53 = vrot.slane %v3530_v56, %v4004_v62 }
 0xb08   :  { %v2749_v2 = vmul.f32 %v2707_v51, %v2642_v13  ;;  %v2750_v50 = vmul.f32 %v2714_v38, %v2643_v42  ;;  %v2751_v25 = vmul.f32 %v2721_v63, %v2644_v48  ;;  %v2752_v57 = vmul.f32 %v2728_v53, %v2645_v60 }
 0xb09   :  { %v3532_v22 = vpop.eup %3531 }
 0xb0a   :  { %v2735_v23 = vrot.slane %v3532_v22, %v3993_v36  ;;  %v2742_v30 = vrot.slane %v3532_v22, %v3996_v26  ;;  %v2781_v18 = vmul.f32 %v2767_v47, %v2749_v2  ;;  %v2782_v41 = vmul.f32 %v2775_v21, %v2750_v50 }
 0xb0b   :  { %v2783_v55 = vmul.f32 %v2774_v10, %v2751_v25  ;;  %v2784_v24 = vmul.f32 %v2776_v1, %v2752_v57 }
 0xb0c   :  { %v2753_v61 = vmul.f32 %v2735_v23, %v4361_v14  ;;  %v2754_v62 = vmul.f32 %v2742_v30, %v4364_v52  ;;  %v2813_v11 = vadd.f32 %v2799_v20, %v2781_v18  ;;  %v2814_v0 = vadd.f32 %v2807_v40, %v2782_v41  ;;  %v3328_v52 = vld [vmem:[%s4458_s11 + $0x8] sm:$0x3f]  ;;  %v3182_v41 = vld [vmem:[%s4462_s15] sm:$0xff] }
 0xb0d   :  { %v2815_v13 = vadd.f32 %v2806_v44, %v2783_v55  ;;  %v2816_v42 = vadd.f32 %v2808_v34, %v2784_v24  ;;  %3399 = vmatprep.subr.msk.mxu1 %vm1348_vm10, %v3328_v52  ;;  %v3073_v44 = vsub.s32 1, %v3711_v3  ;;  %v3612_v55 = vmov 0.0  }
 0xb0e   :  { %v2835_v48 = vcombine.low %v2813_v11, %v2814_v0  ;;  %v2785_v60 = vmul.f32 %v2767_v47, %v2753_v61  ;;  %v2786_v59 = vmul.f32 %v2775_v21, %v2754_v62  ;;  %3400 = vmatpush3.msk.msra.mxu1 %vm1348_vm10, %v3328_v52  ;;  %3404 = vmatprep.subr.mxu0 %v3612_v55  ;;  %v3334_v11 = vld [vmem:[#allocation2] ss:$0 sm:$0xff]  ;;  %v3335_v0 = vld [vmem:[#allocation5] ss:$0 sm:$0xff] }
 0xb0f   :  { %v2836_v54 = vcombine.low %v2815_v13, %v2816_v42  ;;  %v3157_v13 = vrot.slane %v3334_v11, %v3714_v5  ;;  %v3174_v42 = vrot.slane %v3335_v0, %v3714_v5 }
 0xb10   :  { %v2843_v19 = vrot.slane %v2835_v48, %v3714_v5  ;;  %v2817_v8 = vadd.f32 %v2799_v20, %v2785_v60  ;;  %v2818_v46 = vadd.f32 %v2807_v40, %v2786_v59 }
 0xb11   :  { %v2850_v39 = vrot.slane %v2836_v54, %v3714_v5  ;;  %v3158_v54 = vrot.slane %v3157_v13, 7 }
 0xb12   :  { %v2852_v12 = vcombine.low %v2817_v8, %v2818_v46  ;;  %v3175_v46 = vrot.slane %v3174_v42, 7 }
 0xb13   :  { %v2851_v49 = vcombine.low %v2843_v19, %v2850_v39 }
 0xb14   :  { %v2859_v14 = vrot.slane %v2852_v12, %v3714_v5 }
 0xb15   :  { %3396 = vmatprep.mubr.msk.f32.mxu0 %vm156_vm0, %v2851_v49 }
 0xb16   :  { %3397 = vmatmul.mubr.msk.f32.vlgmr.msra.gmra.mxu0 %vm156_vm0, %v2859_v14 }
 0xb17   :  { %3406 = vmatprep.mubr.msk.f32.mxu0 %vm3613_vm13, %v3612_v55  ;;  %3405 = vmatpush3.msra.mxu0 %v3182_v41 }
 0xbd6   :  { %v3398_v29 = vpop.f32.mrf.mxu0 }
 0xbd7   :  { %v2936_v16 = vadd.f32 %v3398_v29, %v3325_v28 }
 0xbd8   :  { %v2930_v4 = vpop.f32.mrf.mxu0 }
 0xbd9   :  { %v2940_v9 = vmax.f32 %v2936_v16, 0.0  ;;  %v2931_v15 = vadd.f32 %v3325_v28, %v2930_v4 }
 0xbdb   :  { %v2939_v31 = vmax.f32 %v2931_v15, 0.0  ;;  %2945 = vrot.lane.b32.xlu0 %v2940_v9, %s3611_s30 }
 0xbdd   :  { %2943 = vrot.lane.b32.xlu1 %v2939_v31, %s3611_s30 }
 0xc4d   :  { %v2946_v33 = vpop.permute.xlu0 %2945 }
 0xc4e   :  { %v2950_v27 = vmul.f32 %v2946_v33, %v2936_v16 }
 0xc4f   :  { %v2944_v37 = vpop.permute.xlu1 %2943 }
 0xc50   :  { %v2949_v43 = vmul.f32 %v2944_v37, %v2931_v15 }
 0xc52   :  { %3401 = vmatprep.mubr.msk.f32.mxu1 %vm1341_vm11, %v2949_v43 }
 0xc53   :  { %3402 = vmatmul.mubr.msk.f32.vlgmr.msra.gmra.mxu1 %vm1341_vm11, %v2950_v27 }
 0xd13   :  { %v3403_v45 = vpop.f32.mrf.mxu1 }
 0xd14   :  { %v3042_v17 = vadd.f32 %v3403_v45, %v3330_v35 }
 0xd15   :  { %v3036_v6 = vpop.f32.mrf.mxu1 }
 0xd16   :  { %v3061_v47 = vrot.slane %v3042_v17, %v3714_v5  ;;  %v3037_v58 = vadd.f32 %v3330_v35, %v3036_v6 }
 0xd18   :  { %v3062_v10 = vcombine.high %v3061_v47, %v3061_v47  ;;  %v3047_v20 = vcombine.high %v3037_v58, %v3037_v58 }
 0xd1a   :  { %v3066_v56 = vadd.f32 %v3062_v10, %v4343_v7  ;;  %v3054_v21 = vrot.slane %v3047_v20, %v3714_v5 }
 0xd1c   :  { %v3065_v51 = vadd.f32 %v3054_v21, %v4350_v32  ;;  %v3078_v63 = vrot.slane %v3066_v56, %v3073_v44 }
 0xd1e   :  { %v3074_v38 = vrot.slane %v3065_v51, %v3073_v44 }
 0xd20   :  { %v3079_v53 = vsel %vm798_vm3, %v3078_v63, %v3074_v38 }
 0xd21   :  { %v3082_v1 = vsel %vm3081_vm12, %v3079_v53, 0.0 }
 0xd22   :  { %3083 = vadd.xlane.f32.xlu1 %v3082_v1 }
 0xdab   :  { %v3084_v40 = vpop.xlane.xlu1 %3083 }
 0xdac   :  { %v3085_v2 = vmul.f32 0.125, %v3084_v40 }
 0xdae   :  { %v3093_v50 = vrot.slane %v3085_v2, %v3993_v36  ;;  %v3100_v7 = vrot.slane %v3085_v2, %v3996_v26 }
 0xdb0   :  { %v3101_v25 = vrot.slane %v3100_v7, 7  ;;  %v3104_v57 = vsub.f32 %v3065_v51, %v3093_v50 }
 0xdb2   :  { %v3105_v22 = vsub.f32 %v3066_v56, %v3101_v25  ;;  %v3106_v3 = vmul.f32 %v3104_v57, %v3104_v57 }
 0xdb4   :  { %v3107_v34 = vmul.f32 %v3105_v22, %v3105_v22  ;;  %v3113_v32 = vrot.slane %v3106_v3, %v3073_v44 }
 0xdb6   :  { %v3117_v23 = vrot.slane %v3107_v34, %v3073_v44 }
 0xdb8   :  { %v3118_v30 = vsel %vm798_vm3, %v3117_v23, %v3113_v32 }
 0xdb9   :  { %v3120_v18 = vsel %vm3081_vm12, %v3118_v30, 0.0 }
 0xdba   :  { %3121 = vadd.xlane.f32.xlu0 %v3120_v18 }
 0xe43   :  { %v3122_v24 = vpop.xlane.xlu0 %3121 }
 0xe44   :  { %v3123_v61 = vmul.f32 0.125, %v3122_v24 }
 0xe46   :  { %v3124_v62 = vadd.f32 1e-05, %v3123_v61 }
 0xe48   :  { %3533 = vrsqrt.f32 %v3124_v62 }
 0xe55   :  { %v3534_v48 = vpop.eup %3533 }
 0xe56   :  { %v3133_v60 = vrot.slane %v3534_v48, %v3993_v36  ;;  %v3140_v59 = vrot.slane %v3534_v48, %v3996_v26  ;;  %v3336_v36 = vld [vmem:[%s4463_s16] ss:$0 sm:$0xff] }
 0xe58   :  { %v3141_v19 = vrot.slane %v3140_v59, 7  ;;  %v3144_v8 = vmul.f32 %v3133_v60, %v3104_v57 }
 0xe5a   :  { %v3145_v39 = vmul.f32 %v3141_v19, %v3105_v22  ;;  %v3161_v12 = vmul.f32 %v3158_v54, %v3144_v8 }
 0xe5c   :  { %v3162_v49 = vmul.f32 %v3157_v13, %v3145_v39  ;;  %v3178_v14 = vadd.f32 %v3175_v46, %v3161_v12 }
 0xe5e   :  { %v3179_v52 = vadd.f32 %v3174_v42, %v3162_v49  ;;  %v3180_v28 = vmax.f32 %v3178_v14, 0.0 }
 0xe60   :  { %v3181_v29 = vmax.f32 %v3179_v52, 0.0  ;;  %v3195_v16 = vrot.slane %v3180_v28, %v3073_v44 }
 0xe62   :  { %v3199_v4 = vrot.slane %v3181_v29, %v3073_v44 }
 0xe64   :  { %v3200_v5 = vsel %vm796_vm2, %v3199_v4, %v3195_v16 }
 0xe65   :  { %3407 = vmatmul.mubr.msk.f32.vlgmr.msra.gmra.mxu0 %vm156_vm0, %v3200_v5 }
 0xf25   :  { %v3269_v26 = vpop.f32.mrf.mxu0 }
 0xf26   :  { %v3270_v9 = vadd.f32 %v3336_v36, %v3269_v26 }
 0xf27   :  { %v3408_v15 = vpop.f32.mrf.mxu0 }
 0xf28   :  { %3273 = vst [vmem:[#allocation7] sm:$0x3] %v3270_v9 }
 0xf29   :  { %3586 = shalt.err (!%p3583_p0)
}
 0xf2a   :  { %3283 = dma.vmem_to_hbm [thread:$0]  %s3281_s1, 32, %s4464_s17, [#allocation4]  }
 0xf2b   :  { %3599 = dma.done.wait [#allocation4], 32  }
 0xf2c   :  { %3600 = vsyncadd [#allocation4], 4294967264 }
 0xf2d   :  { %3287 = vsyncpa [#allocation3], 1 }
 0xf2e   :  { %3288 = vsyncpa [#allocation6], 1 }
 0xf2f   :  { %3289 = vsyncpa [#allocation4], 1 }

// kernel: image_classifier_forward.2
= control target key start
LH: loop header
LB: loop body
LE: loop exit
PB: predicated region body
PF: predicated region fallthrough
CT: control target
= control target key end

     0   :  { %vm2492_vm0 = vmmov 0   ;;  %s3150_s1 = inlined_call_operand.vmem [shape: bf16[768,128], index: 1, kind: input, shape index: {}]   ;;  %s3151_s0 = inlined_call_operand.vmem [shape: bf16[16,768], index: 0, kind: input, shape index: {}]   ;;  %s3152_s3 = inlined_call_operand.vmem [shape: bf16[128,1024], index: 3, kind: input, shape index: {}]   ;;  %s3153_s6 = inlined_call_operand.vmem [shape: bf16[128,128], index: 6, kind: input, shape index: {}]   ;;  %s3154_s5 = inlined_call_operand.vmem [shape: bf16[1024,128], index: 5, kind: input, shape index: {}]   ;;  %s3155_s2 = inlined_call_operand.vmem [shape: f32[1,128], index: 2, kind: input, shape index: {}]   ;;  %s3156_s4 = inlined_call_operand.vmem [shape: f32[1,1024], index: 4, kind: input, shape index: {}]   ;;  %s3157_s7 = inlined_call_operand.vmem [shape: f32[1,128], index: 7, kind: input, shape index: {}]   ;;  %s3158_s8 = inlined_call_operand.vmem [shape: f32[16,128], index: 8, kind: output, shape index: {}]  }
   0x1   :  { %v2361_v0 = vld [vmem:[%s3150_s1 + $0x78] sm:$0xff]   ;;  %v2365_v4 = vld [vmem:[%s3150_s1 + $0x70] sm:$0xff]   ;;  %v2369_v8 = vld [vmem:[%s3150_s1 + $0x68] sm:$0xff]  }
   0x2   :  { %v2362_v1 = vld [vmem:[%s3150_s1 + $0x38] sm:$0xff]   ;;  %2175 = vmatprep.subr.bf16.mxu0 %v2361_v0  ;;  %v2366_v5 = vld [vmem:[%s3150_s1 + $0x30] sm:$0xff]   ;;  %v2370_v9 = vld [vmem:[%s3150_s1 + $0x28] sm:$0xff]  }
   0x3   :  { %v2363_v2 = vld [vmem:[%s3150_s1 + $0xf8] sm:$0xff]   ;;  %2176 = vmatpush3.bf16.msra.mxu0 %v2362_v1  ;;  %v2367_v6 = vld [vmem:[%s3150_s1 + $0xf0] sm:$0xff]   ;;  %v2371_v10 = vld [vmem:[%s3150_s1 + $0xe8] sm:$0xff]  }
   0x4   :  { %v2364_v3 = vld [vmem:[%s3150_s1 + $0xb8] sm:$0xff]   ;;  %2197 = vmatprep.subr.bf16.mxu1 %v2363_v2  ;;  %2177 = vmatprep.subr.bf16.mxu0 %v2365_v4  ;;  %v2368_v7 = vld [vmem:[%s3150_s1 + $0xb0] sm:$0xff]   ;;  %v2372_v11 = vld [vmem:[%s3150_s1 + $0xa8] sm:$0xff]  }
   0x5   :  { %2198 = vmatpush3.bf16.msra.mxu1 %v2364_v3  ;;  %v2373_v12 = vld [vmem:[%s3150_s1 + $0x60] sm:$0xff]   ;;  %v2377_v16 = vld [vmem:[%s3150_s1 + $0x58] sm:$0xff]   ;;  %v2381_v20 = vld [vmem:[%s3150_s1 + $0x50] sm:$0xff]  }
   0x6   :  { %2199 = vmatprep.subr.bf16.mxu1 %v2367_v6  ;;  %v2374_v13 = vld [vmem:[%s3150_s1 + $0x20] sm:$0xff]   ;;  %v2378_v17 = vld [vmem:[%s3150_s1 + $0x18] sm:$0xff]   ;;  %v2382_v21 = vld [vmem:[%s3150_s1 + $0x10] sm:$0xff]  }
   0x7   :  { %2178 = vmatpush3.bf16.msra.mxu0 %v2366_v5  ;;  %v2375_v14 = vld [vmem:[%s3150_s1 + $0xe0] sm:$0xff]   ;;  %v2379_v18 = vld [vmem:[%s3150_s1 + $0xd8] sm:$0xff]   ;;  %v2383_v22 = vld [vmem:[%s3150_s1 + $0xd0] sm:$0xff]  }
   0x8   :  { %2179 = vmatprep.subr.bf16.mxu0 %v2369_v8  ;;  %v2376_v15 = vld [vmem:[%s3150_s1 + $0xa0] sm:$0xff]   ;;  %v2380_v19 = vld [vmem:[%s3150_s1 + $0x98] sm:$0xff]   ;;  %v2384_v23 = vld [vmem:[%s3150_s1 + $0x90] sm:$0xff]  }
   0x9   :  { %2200 = vmatpush3.bf16.msra.mxu1 %v2368_v7  ;;  %v2385_v24 = vld [vmem:[%s3150_s1 + $0x48] sm:$0xff]   ;;  %v2389_v28 = vld [vmem:[%s3150_s1 + $0x40] sm:$0xff]   ;;  %v2396_v34 = vld [vmem:[%s3150_s1 + $0x178] sm:$0xff]  }
   0xa   :  { %2201 = vmatprep.subr.bf16.mxu1 %v2371_v10  ;;  %v2386_v25 = vld [vmem:[%s3150_s1 + $0x8] sm:$0xff]   ;;  %v2390_v29 = vld [vmem:[%s3150_s1] sm:$0xff]   ;;  %v2400_v37 = vld [vmem:[%s3150_s1 + $0x138] sm:$0xff]  }
   0xb   :  { %2180 = vmatpush3.bf16.msra.mxu0 %v2370_v9  ;;  %v2387_v26 = vld [vmem:[%s3150_s1 + $0xc8] sm:$0xff]   ;;  %v2391_v30 = vld [vmem:[%s3150_s1 + $0xc0] sm:$0xff]   ;;  %v2401_v38 = vld [vmem:[%s3150_s1 + $0x170] sm:$0xff]  }
   0xc   :  { %2181 = vmatprep.subr.bf16.mxu0 %v2373_v12  ;;  %v2388_v27 = vld [vmem:[%s3150_s1 + $0x88] sm:$0xff]   ;;  %v2392_v31 = vld [vmem:[%s3151_s0] ss:$24 sps:$4 sm:$0xff]   ;;  %v2394_v32 = vld [vmem:[%s3151_s0 + $0x4] ss:$24 sps:$4 sm:$0xff]  }
   0xd   :  { %2202 = vmatpush3.bf16.msra.mxu1 %v2372_v11  ;;  %v2395_v33 = vld [vmem:[%s3150_s1 + $0x80] sm:$0xff]   ;;  %489 = vmatprep.mubr.bf16.mxu0 %v2394_v32  ;;  %v2402_v39 = vld [vmem:[%s3150_s1 + $0x130] sm:$0xff]   ;;  %v2403_v40 = vld [vmem:[%s3150_s1 + $0x168] sm:$0xff]  }
   0xe   :  { %2203 = vmatprep.subr.bf16.mxu1 %v2375_v14  ;;  %v2397_v35 = vld [vmem:[%s3151_s0 + $0x8] ss:$24 sps:$4 sm:$0xff]   ;;  %v2399_v36 = vld [vmem:[%s3151_s0 + $0xc] ss:$24 sps:$4 sm:$0xff]   ;;  %v2407_v44 = vld [vmem:[%s3150_s1 + $0x158] sm:$0xff]  }
   0xf   :  { %2182 = vmatpush3.bf16.msra.mxu0 %v2374_v13  ;;  %530 = vmatprep.mubr.bf16.mxu1 %v2399_v36  ;;  %v2404_v41 = vld [vmem:[%s3150_s1 + $0x128] sm:$0xff]   ;;  %v2405_v42 = vld [vmem:[%s3150_s1 + $0x160] sm:$0xff]   ;;  %v2408_v45 = vld [vmem:[%s3150_s1 + $0x118] sm:$0xff]  }
  0x10   :  { %2183 = vmatprep.subr.bf16.mxu0 %v2377_v16  ;;  %v2406_v43 = vld [vmem:[%s3150_s1 + $0x120] sm:$0xff]   ;;  %v2409_v46 = vld [vmem:[%s3150_s1 + $0x150] sm:$0xff]   ;;  %v2411_v49 = vld [vmem:[%s3150_s1 + $0x148] sm:$0xff]  }
  0x11   :  { %2204 = vmatpush3.bf16.msra.mxu1 %v2376_v15  ;;  %v2417_v47 = vld [vmem:[%s3151_s0 + $0x14] ss:$24 sps:$4 sm:$0xff]   ;;  %v2413_v51 = vld [vmem:[%s3150_s1 + $0x140] sm:$0xff]   ;;  %v2415_v53 = vld [vmem:[%s3151_s0 + $0x10] ss:$24 sps:$4 sm:$0xff]  }
  0x12   :  { %2205 = vmatprep.subr.bf16.mxu1 %v2379_v18  ;;  %v2410_v48 = vld [vmem:[%s3150_s1 + $0x110] sm:$0xff]   ;;  %v2412_v50 = vld [vmem:[%s3150_s1 + $0x108] sm:$0xff]   ;;  %v2414_v52 = vld [vmem:[%s3150_s1 + $0x100] sm:$0xff]  }
  0x13   :  { %2184 = vmatpush3.bf16.msra.mxu0 %v2378_v17  ;;  %v637_v54 = vld [vmem:[%s3152_s3 + $0x1c0] sm:$0xff]  ;;  %v638_v56 = vld [vmem:[%s3152_s3 + $0x1c8] sm:$0xff] }
  0x14   :  { %2185 = vmatprep.subr.bf16.mxu0 %v2381_v20  ;;  %v641_v55 = vld [vmem:[%s3152_s3 + $0x1e0] sm:$0xff]  ;;  %v642_v59 = vld [vmem:[%s3152_s3 + $0x1e8] sm:$0xff] }
  0x15   :  { %2206 = vmatpush3.bf16.msra.mxu1 %v2380_v19  ;;  %v2094_v57 = vcombine.low %v637_v54, %v641_v55  ;;  %v2095_v58 = vcombine.high %v637_v54, %v641_v55  ;;  %v629_v60 = vld [vmem:[%s3152_s3 + $0x180] sm:$0xff]  ;;  %v2096_v62 = vcombine.low %v638_v56, %v642_v59  ;;  %v2097_v63 = vcombine.high %v638_v56, %v642_v59  ;;  %v630_v1 = vld [vmem:[%s3152_s3 + $0x188] sm:$0xff]  ;;  %v639_v54 = vld [vmem:[%s3152_s3 + $0x1d0] sm:$0xff] }
  0x16   :  { %2207 = vmatprep.subr.bf16.mxu1 %v2383_v22  ;;  %v633_v61 = vld [vmem:[%s3152_s3 + $0x1a0] sm:$0xff]  ;;  %v634_v2 = vld [vmem:[%s3152_s3 + $0x1a8] sm:$0xff]  ;;  %v643_v55 = vld [vmem:[%s3152_s3 + $0x1f0] sm:$0xff] }
  0x17   :  { %2186 = vmatpush3.bf16.msra.mxu0 %v2382_v21  ;;  %v2087_v0 = vcombine.high %v629_v60, %v633_v61  ;;  %v621_v3 = vld [vmem:[%s3152_s3 + $0x140] sm:$0xff]  ;;  %v2089_v4 = vcombine.high %v630_v1, %v634_v2  ;;  %v622_v6 = vld [vmem:[%s3152_s3 + $0x148] sm:$0xff]  ;;  %v2086_v8 = vcombine.low %v629_v60, %v633_v61  ;;  %v2088_v9 = vcombine.low %v630_v1, %v634_v2  ;;  %v640_v56 = vld [vmem:[%s3152_s3 + $0x1d8] sm:$0xff] }
  0x18   :  { %2187 = vmatprep.subr.bf16.mxu0 %v2385_v24  ;;  %v625_v5 = vld [vmem:[%s3152_s3 + $0x160] sm:$0xff]  ;;  %v626_v7 = vld [vmem:[%s3152_s3 + $0x168] sm:$0xff]  ;;  %v2098_v59 = vcombine.low %v639_v54, %v643_v55 }
  0x19   :  { %2208 = vmatpush3.bf16.msra.mxu1 %v2384_v23  ;;  %v2079_v10 = vcombine.high %v621_v3, %v625_v5  ;;  %v2081_v11 = vcombine.high %v622_v6, %v626_v7  ;;  %v613_v12 = vld [vmem:[%s3152_s3 + $0x100] sm:$0xff]  ;;  %v614_v14 = vld [vmem:[%s3152_s3 + $0x108] sm:$0xff]  ;;  %v2078_v16 = vcombine.low %v621_v3, %v625_v5  ;;  %v2080_v17 = vcombine.low %v622_v6, %v626_v7 }
  0x1a   :  { %2209 = vmatprep.subr.bf16.mxu1 %v2387_v26  ;;  %v617_v13 = vld [vmem:[%s3152_s3 + $0x120] sm:$0xff]  ;;  %v618_v15 = vld [vmem:[%s3152_s3 + $0x128] sm:$0xff] }
  0x1b   :  { %2188 = vmatpush3.bf16.msra.mxu0 %v2386_v25  ;;  %v2071_v18 = vcombine.high %v613_v12, %v617_v13  ;;  %v2073_v19 = vcombine.high %v614_v14, %v618_v15  ;;  %v605_v20 = vld [vmem:[%s3152_s3 + $0xc0] sm:$0xff]  ;;  %v606_v22 = vld [vmem:[%s3152_s3 + $0xc8] sm:$0xff]  ;;  %v2070_v24 = vcombine.low %v613_v12, %v617_v13  ;;  %v2072_v25 = vcombine.low %v614_v14, %v618_v15 }
  0x1c   :  { %2189 = vmatprep.subr.bf16.mxu0 %v2389_v28  ;;  %v609_v21 = vld [vmem:[%s3152_s3 + $0xe0] sm:$0xff]  ;;  %v610_v23 = vld [vmem:[%s3152_s3 + $0xe8] sm:$0xff] }
  0x1d   :  { %2210 = vmatpush3.bf16.msra.mxu1 %v2388_v27  ;;  %v2063_v26 = vcombine.high %v605_v20, %v609_v21  ;;  %v2065_v27 = vcombine.high %v606_v22, %v610_v23  ;;  %v2062_v28 = vcombine.low %v605_v20, %v609_v21  ;;  %v598_v32 = vld [vmem:[%s3152_s3 + $0x88] sm:$0xff] }
  0x1e   :  { %2211 = vmatprep.subr.bf16.mxu1 %v2391_v30  ;;  %v597_v30 = vld [vmem:[%s3152_s3 + $0x80] sm:$0xff] }
  0x1f   :  { %2190 = vmatpush3.bf16.msra.mxu0 %v2390_v29  ;;  %v2064_v29 = vcombine.low %v606_v22, %v610_v23  ;;  %v631_v22 = vld [vmem:[%s3152_s3 + $0x190] sm:$0xff] }
  0x20   :  { %2219 = vmatprep.subr.bf16.mxu0 %v2396_v34  ;;  %v602_v34 = vld [vmem:[%s3152_s3 + $0xa8] sm:$0xff]  ;;  %v635_v23 = vld [vmem:[%s3152_s3 + $0x1b0] sm:$0xff] }
  0x21   :  { %2212 = vmatpush3.bf16.msra.mxu1 %v2395_v33  ;;  %v2056_v36 = vcombine.low %v598_v32, %v602_v34 }
  0x22   :  { %490 = vmatmul.mubr.bf16.vlgmr.msra.gmra.mxu0 %v2392_v31  ;;  %1007 = vmatprep.subr.bf16.mxu1 %v2095_v58  ;;  %v601_v31 = vld [vmem:[%s3152_s3 + $0xa0] sm:$0xff]  ;;  %v644_v58 = vld [vmem:[%s3152_s3 + $0x1f8] sm:$0xff] }
  0x23   :  { %2220 = vmatpush3.bf16.msra.mxu0 %v2400_v37  ;;  %571 = vmatprep.mubr.bf16.mxu0 %v2417_v47  ;;  %v2055_v33 = vcombine.high %v597_v30, %v601_v31  ;;  %v2057_v37 = vcombine.high %v598_v32, %v602_v34  ;;  %v585_v47 = vld [vmem:[%s3152_s3 + $0x20] sm:$0xff]  ;;  %v2100_v60 = vcombine.low %v640_v56, %v644_v58  ;;  %v627_v32 = vld [vmem:[%s3152_s3 + $0x170] sm:$0xff]  ;;  %v628_v34 = vld [vmem:[%s3152_s3 + $0x178] sm:$0xff] }
  0x24   :  { %531 = vmatmul.mubr.bf16.vlgmr.msra.gmra.mxu1 %v2397_v35  ;;  %2221 = vmatprep.subr.bf16.mxu0 %v2401_v38  ;;  %v2054_v35 = vcombine.low %v597_v30, %v601_v31  ;;  %v589_v38 = vld [vmem:[%s3152_s3 + $0x40] sm:$0xff]  ;;  %v2101_v61 = vcombine.high %v640_v56, %v644_v58  ;;  %v623_v31 = vld [vmem:[%s3152_s3 + $0x150] sm:$0xff]  ;;  %v604_v58 = vld [vmem:[%s3152_s3 + $0xb8] sm:$0xff] }
  0x25   :  { %1008 = vmatpush1.bf16.msra.mxu1 %v2094_v57  ;;  %v2099_v57 = vcombine.high %v639_v54, %v643_v55  ;;  %v599_v55 = vld [vmem:[%s3152_s3 + $0x90] sm:$0xff] }
  0x26   :  { %1009 = vmatprep.subr.bf16.mxu1 %v2087_v0  ;;  %v603_v56 = vld [vmem:[%s3152_s3 + $0xb0] sm:$0xff] }
  0x27   :  { %2222 = vmatpush3.bf16.msra.mxu0 %v2402_v39  ;;  %v593_v39 = vld [vmem:[%s3152_s3 + $0x60] sm:$0xff] }
  0x28   :  { %2223 = vmatprep.subr.bf16.mxu0 %v2403_v40  ;;  %v590_v40 = vld [vmem:[%s3152_s3 + $0x48] sm:$0xff] }
  0x29   :  { %1010 = vmatpush1.bf16.msra.mxu1 %v2086_v8  ;;  %v1983_v8 = vld [vmem:[%s3155_s2] ss:$0 sm:$0xff] }
  0x2a   :  { %1011 = vmatprep.subr.bf16.mxu1 %v2079_v10 }
  0x2b   :  { %2224 = vmatpush3.bf16.msra.mxu0 %v2404_v41  ;;  %v2047_v41 = vcombine.high %v589_v38, %v593_v39 }
  0x2c   :  { %2225 = vmatprep.subr.bf16.mxu0 %v2405_v42  ;;  %v594_v42 = vld [vmem:[%s3152_s3 + $0x68] sm:$0xff] }
  0x2d   :  { %1012 = vmatpush1.bf16.msra.mxu1 %v2078_v16 }
  0x2e   :  { %1013 = vmatprep.subr.bf16.mxu1 %v2071_v18 }
  0x2f   :  { %2226 = vmatpush3.bf16.msra.mxu0 %v2406_v43  ;;  %v2046_v43 = vcombine.low %v589_v38, %v593_v39  ;;  %v615_v39 = vld [vmem:[%s3152_s3 + $0x110] sm:$0xff] }
  0x30   :  { %2227 = vmatprep.subr.bf16.mxu0 %v2407_v44  ;;  %v2048_v44 = vcombine.low %v590_v40, %v594_v42 }
  0x31   :  { %1014 = vmatpush1.bf16.msra.mxu1 %v2070_v24  ;;  %v632_v24 = vld [vmem:[%s3152_s3 + $0x198] sm:$0xff] }
  0x32   :  { %1015 = vmatprep.subr.bf16.mxu1 %v2063_v26 }
  0x33   :  { %2228 = vmatpush3.bf16.msra.mxu0 %v2408_v45  ;;  %v2049_v45 = vcombine.high %v590_v40, %v594_v42  ;;  %v619_v40 = vld [vmem:[%s3152_s3 + $0x130] sm:$0xff]  ;;  %v620_v42 = vld [vmem:[%s3152_s3 + $0x138] sm:$0xff] }
  0x34   :  { %2229 = vmatprep.subr.bf16.mxu0 %v2409_v46  ;;  %v581_v46 = vld [vmem:[%s3152_s3] sm:$0xff] }
  0x35   :  { %1016 = vmatpush1.bf16.msra.mxu1 %v2062_v28 }
  0x36   :  { %1017 = vmatprep.subr.bf16.mxu1 %v2055_v33  ;;  %v624_v33 = vld [vmem:[%s3152_s3 + $0x158] sm:$0xff] }
  0x37   :  { %2230 = vmatpush3.bf16.msra.mxu0 %v2410_v48  ;;  %v582_v48 = vld [vmem:[%s3152_s3 + $0x8] sm:$0xff]  ;;  %v2085_v38 = vcombine.high %v624_v33, %v628_v34 }
  0x38   :  { %2231 = vmatprep.subr.bf16.mxu0 %v2411_v49  ;;  %v2039_v49 = vcombine.high %v581_v46, %v585_v47 }
  0x39   :  { %1018 = vmatpush1.bf16.msra.mxu1 %v2054_v35  ;;  %v2090_v35 = vcombine.low %v631_v22, %v635_v23 }
  0x3a   :  { %1019 = vmatprep.subr.bf16.mxu1 %v2047_v41  ;;  %v616_v41 = vld [vmem:[%s3152_s3 + $0x118] sm:$0xff] }
  0x3b   :  { %2232 = vmatpush3.bf16.msra.mxu0 %v2412_v50  ;;  %v586_v50 = vld [vmem:[%s3152_s3 + $0x28] sm:$0xff] }
  0x3c   :  { %2233 = vmatprep.subr.bf16.mxu0 %v2413_v51  ;;  %v2038_v51 = vcombine.low %v581_v46, %v585_v47  ;;  %v2077_v46 = vcombine.high %v616_v41, %v620_v42  ;;  %v607_v47 = vld [vmem:[%s3152_s3 + $0xd0] sm:$0xff] }
  0x3d   :  { %1020 = vmatpush1.bf16.msra.mxu1 %v2046_v43  ;;  %v2082_v43 = vcombine.low %v623_v31, %v627_v32 }
  0x3e   :  { %1021 = vmatprep.subr.bf16.mxu1 %v2039_v49  ;;  %v608_v49 = vld [vmem:[%s3152_s3 + $0xd8] sm:$0xff] }
  0x3f   :  { %2234 = vmatpush3.bf16.msra.mxu0 %v2414_v52  ;;  %v2040_v52 = vcombine.low %v582_v48, %v586_v50 }
  0x40   :  { %1050 = vmatprep.subr.bf16.mxu0 %v2097_v63 }
  0x41   :  { %1022 = vmatpush1.bf16.msra.mxu1 %v2038_v51  ;;  %v2074_v51 = vcombine.low %v615_v39, %v619_v40 }
  0x42   :  { %572 = vmatmul.mubr.bf16.vlgmr.msra.gmra.mxu0 %v2415_v53  ;;  %v2041_v53 = vcombine.high %v582_v48, %v586_v50  ;;  %1093 = vmatprep.subr.bf16.mxu1 %v2099_v57  ;;  %v611_v48 = vld [vmem:[%s3152_s3 + $0xf0] sm:$0xff]  ;;  %v612_v50 = vld [vmem:[%s3152_s3 + $0xf8] sm:$0xff] }
  0x43   :  { %1051 = vmatpush1.bf16.msra.mxu0 %v2096_v62  ;;  %v2490_v62 = vmov 0   ;;  %v2069_v54 = vcombine.high %v608_v49, %v612_v50  ;;  %v600_v57 = vld [vmem:[%s3152_s3 + $0x98] sm:$0xff] }
  0x44   :  { %1052 = vmatprep.subr.bf16.mxu0 %v2089_v4  ;;  %1039 = vmatprep.mubr.bf16.mxu1 %v2490_v62 }
  0x45   :  { %1082 = vmatprep.mubr.bf16.mxu0 %v2490_v62 }
  0x47   :  { %1053 = vmatpush1.bf16.msra.mxu0 %v2088_v9 }
  0x48   :  { %1054 = vmatprep.subr.bf16.mxu0 %v2081_v11 }
  0x4b   :  { %1055 = vmatpush1.bf16.msra.mxu0 %v2080_v17 }
  0x4c   :  { %1056 = vmatprep.subr.bf16.mxu0 %v2073_v19 }
  0x4f   :  { %1057 = vmatpush1.bf16.msra.mxu0 %v2072_v25  ;;  %v636_v25 = vld [vmem:[%s3152_s3 + $0x1b8] sm:$0xff] }
  0x50   :  { %1058 = vmatprep.subr.bf16.mxu0 %v2065_v27  ;;  %v2093_v30 = vcombine.high %v632_v24, %v636_v25 }
  0x53   :  { %1059 = vmatpush1.bf16.msra.mxu0 %v2064_v29  ;;  %v2091_v29 = vcombine.high %v631_v22, %v635_v23  ;;  %v2419_v22 = vld [vmem:[%s3153_s6 + $0x30] sm:$0xff]  }
  0x54   :  { %1060 = vmatprep.subr.bf16.mxu0 %v2057_v37  ;;  %v2083_v37 = vcombine.high %v623_v31, %v627_v32  ;;  %v2432_v23 = vld [vmem:[%s3154_s5 + $0x30] sm:$0xff]   ;;  %v2442_v31 = vld [vmem:[%s3154_s5 + $0x58] sm:$0xff]  }
  0x55   :  { %v2422_v32 = vld [vmem:[%s3153_s6 + $0x18] sm:$0xff]  }
  0x57   :  { %1061 = vmatpush1.bf16.msra.mxu0 %v2056_v36  ;;  %v2092_v36 = vcombine.low %v632_v24, %v636_v25  ;;  %v2434_v24 = vld [vmem:[%s3154_s5 + $0x68] sm:$0xff]  }
  0x58   :  { %1062 = vmatprep.subr.bf16.mxu0 %v2049_v45  ;;  %v2075_v45 = vcombine.high %v615_v39, %v619_v40  ;;  %v2420_v25 = vld [vmem:[%s3153_s6 + $0x28] sm:$0xff]   ;;  %v2429_v39 = vld [vmem:[%s3154_s5 + $0xb8] sm:$0xff]   ;;  %v2431_v40 = vld [vmem:[%s3154_s5 + $0xf0] sm:$0xff]  }
  0x5b   :  { %1063 = vmatpush1.bf16.msra.mxu0 %v2048_v44  ;;  %v2084_v44 = vcombine.low %v624_v33, %v628_v34  ;;  %v2444_v33 = vld [vmem:[%s3154_s5 + $0x18] sm:$0xff]   ;;  %v2446_v34 = vld [vmem:[%s3154_s5 + $0x50] sm:$0xff]  }
  0x5c   :  { %1064 = vmatprep.subr.bf16.mxu0 %v2041_v53  ;;  %v2067_v53 = vcombine.high %v607_v47, %v611_v48 }
  0x5f   :  { %1065 = vmatpush1.bf16.msra.mxu0 %v2040_v52  ;;  %v2076_v52 = vcombine.low %v616_v41, %v620_v42  ;;  %v2448_v41 = vld [vmem:[%s3154_s5 + $0x10] sm:$0xff]  }
  0x60   :  { %1136 = vmatprep.subr.bf16.mxu0 %v2101_v61  ;;  %v2059_v61 = vcombine.high %v599_v55, %v603_v56  ;;  %v2433_v42 = vld [vmem:[%s3154_s5 + $0xb0] sm:$0xff]  }
  0xe2   :  { %v2191_v63 = vpop.f32.mrf.mxu0 }
  0xe4   :  { %v2192_v0 = vpop.f32.mrf.mxu0  ;;  %v2213_v1 = vpop.f32.mrf.mxu1 }
  0xe5   :  { %v2193_v6 = vadd.f32 %v2192_v0, %v2191_v63  ;;  %v591_v63 = vld [vmem:[%s3152_s3 + $0x50] sm:$0xff] }
  0xe6   :  { %v2194_v2 = vpop.f32.mrf.mxu0  ;;  %v2214_v3 = vpop.f32.mrf.mxu1  ;;  %v595_v0 = vld [vmem:[%s3152_s3 + $0x70] sm:$0xff] }
  0xe7   :  { %v492_v12 = vadd.f32 %v2193_v6, %v1983_v8  ;;  %v2215_v13 = vadd.f32 %v2214_v3, %v2213_v1  ;;  %v592_v1 = vld [vmem:[%s3152_s3 + $0x58] sm:$0xff]  ;;  %v2058_v3 = vcombine.low %v599_v55, %v603_v56  ;;  %v2451_v55 = vld [vmem:[%s3154_s5 + $0xc8] sm:$0xff]  }
  0xe8   :  { %v2195_v4 = vpop.f32.mrf.mxu0  ;;  %v2216_v5 = vpop.f32.mrf.mxu1  ;;  %v2453_v56 = vld [vmem:[%s3154_s5 + $0x88] sm:$0xff]  }
  0xe9   :  { %v2196_v7 = vadd.f32 %v2195_v4, %v2194_v2  ;;  %v533_v19 = vadd.f32 %v2215_v13, %v492_v12  ;;  %v596_v2 = vld [vmem:[%s3152_s3 + $0x78] sm:$0xff]  ;;  %v2060_v4 = vcombine.low %v600_v57, %v604_v58 }
  0xea   :  { %v2217_v9 = vpop.f32.mrf.mxu1  ;;  %v2053_v6 = vcombine.high %v592_v1, %v596_v2  ;;  %v2052_v12 = vcombine.low %v592_v1, %v596_v2 }
  0xeb   :  { %v495_v14 = vadd.f32 %v2196_v7, %v1983_v8  ;;  %v2218_v15 = vadd.f32 %v2217_v9, %v2216_v5  ;;  %v2051_v5 = vcombine.high %v591_v63, %v595_v0  ;;  %v583_v7 = vld [vmem:[%s3152_s3 + $0x10] sm:$0xff]  ;;  %v584_v9 = vld [vmem:[%s3152_s3 + $0x18] sm:$0xff] }
  0xec   :  { %v587_v8 = vld [vmem:[%s3152_s3 + $0x30] sm:$0xff] }
  0xed   :  { %v536_v20 = vadd.f32 %v2218_v15, %v495_v14  ;;  %v2043_v13 = vcombine.high %v583_v7, %v587_v8  ;;  %v2042_v15 = vcombine.low %v583_v7, %v587_v8 }
 0x102   :  { %v2235_v10 = vpop.f32.mrf.mxu0 }
 0x104   :  { %v2236_v11 = vpop.f32.mrf.mxu0 }
 0x105   :  { %v2237_v17 = vadd.f32 %v2236_v11, %v2235_v10  ;;  %v588_v10 = vld [vmem:[%s3152_s3 + $0x38] sm:$0xff]  ;;  %v2050_v11 = vcombine.low %v591_v63, %v595_v0 }
 0x106   :  { %v2238_v16 = vpop.f32.mrf.mxu0  ;;  %v2045_v14 = vcombine.high %v584_v9, %v588_v10 }
 0x107   :  { %v574_v26 = vadd.f32 %v2237_v17, %v533_v19  ;;  %v2426_v17 = vld [vmem:[%s3154_s5 + $0x78] sm:$0xff]   ;;  %v2491_v19 = vmov 0.0  }
 0x108   :  { %v2239_v18 = vpop.f32.mrf.mxu0 }
 0x109   :  { %v2240_v21 = vadd.f32 %v2239_v18, %v2238_v16  ;;  %v2044_v16 = vcombine.low %v584_v9, %v588_v10  ;;  %v2418_v18 = vld [vmem:[%s3153_s6 + $0x38] sm:$0xff]  }
 0x10b   :  { %v577_v27 = vadd.f32 %v2240_v21, %v536_v20  ;;  %v2428_v20 = vld [vmem:[%s3154_s5 + $0x38] sm:$0xff]   ;;  %v2430_v21 = vld [vmem:[%s3154_s5 + $0x70] sm:$0xff]  }
 0x10d   :  { %v2823_v28 = vpack.c.bf16 %v577_v27, %v574_v26  ;;  %v2436_v26 = vld [vmem:[%s3154_s5 + $0x28] sm:$0xff]   ;;  %v2438_v27 = vld [vmem:[%s3154_s5 + $0x60] sm:$0xff]  }
 0x10f   :  { %1040 = vmatmul.mubr.bf16.vlgmr.msra.gmra.mxu1 %v2823_v28  ;;  %1083 = vmatmul.mubr.bf16.vlgmr.msra.gmra.mxu0 %v2823_v28 }
 0x110   :  { %1094 = vmatpush1.bf16.msra.mxu1 %v2098_v59  ;;  %1137 = vmatpush1.bf16.msra.mxu0 %v2100_v60  ;;  %v2066_v59 = vcombine.low %v607_v47, %v611_v48  ;;  %v2068_v60 = vcombine.low %v608_v49, %v612_v50  ;;  %v2454_v47 = vld [vmem:[%s3154_s5 + $0x40] sm:$0xff]   ;;  %v2443_v50 = vld [vmem:[%s3154_s5 + $0xd8] sm:$0xff]  }
 0x111   :  { %1095 = vmatprep.subr.bf16.mxu1 %v2091_v29  ;;  %1138 = vmatprep.subr.bf16.mxu0 %v2093_v30  ;;  %v2421_v29 = vld [vmem:[%s3153_s6 + $0x20] sm:$0xff]  }
 0x112   :  { %1125 = vmatprep.mubr.bf16.mxu1 %v2490_v62  ;;  %1168 = vmatprep.mubr.bf16.mxu0 %v2490_v62  ;;  %v2061_v62 = vcombine.high %v600_v57, %v604_v58  ;;  %v2440_v30 = vld [vmem:[%s3154_s5 + $0x20] sm:$0xff]  }
 0x113   :  { %v2456_v48 = vld [vmem:[%s3154_s5] sm:$0xff]  }
 0x114   :  { %1096 = vmatpush1.bf16.msra.mxu1 %v2090_v35  ;;  %1139 = vmatpush1.bf16.msra.mxu0 %v2092_v36  ;;  %v2423_v35 = vld [vmem:[%s3153_s6 + $0x10] sm:$0xff]   ;;  %v2424_v36 = vld [vmem:[%s3153_s6 + $0x8] sm:$0xff]   ;;  %v2441_v49 = vld [vmem:[%s3154_s5 + $0xa0] sm:$0xff]  }
 0x115   :  { %1097 = vmatprep.subr.bf16.mxu1 %v2083_v37  ;;  %1140 = vmatprep.subr.bf16.mxu0 %v2085_v38  ;;  %v2425_v37 = vld [vmem:[%s3153_s6] sm:$0xff]   ;;  %v2427_v38 = vld [vmem:[%s3154_s5 + $0xf8] sm:$0xff]  }
 0x116   :  { %v2455_v57 = vld [vmem:[%s3154_s5 + $0xc0] sm:$0xff]  }
 0x117   :  { %v2457_v58 = vld [vmem:[%s3154_s5 + $0x80] sm:$0xff]  }
 0x118   :  { %1098 = vmatpush1.bf16.msra.mxu1 %v2082_v43  ;;  %1141 = vmatpush1.bf16.msra.mxu0 %v2084_v44  ;;  %v2435_v43 = vld [vmem:[%s3154_s5 + $0xe8] sm:$0xff]  }
 0x119   :  { %1099 = vmatprep.subr.bf16.mxu1 %v2075_v45  ;;  %1142 = vmatprep.subr.bf16.mxu0 %v2077_v46  ;;  %v2450_v44 = vld [vmem:[%s3154_s5 + $0x48] sm:$0xff]   ;;  %v2439_v46 = vld [vmem:[%s3154_s5 + $0xe0] sm:$0xff]  }
 0x11a   :  { %v2452_v45 = vld [vmem:[%s3154_s5 + $0x8] sm:$0xff]  }
 0x11c   :  { %1100 = vmatpush1.bf16.msra.mxu1 %v2074_v51  ;;  %1143 = vmatpush1.bf16.msra.mxu0 %v2076_v52  ;;  %v2458_v51 = vld [vmem:[%s3154_s5 + $0x178] sm:$0xff]  }
 0x11d   :  { %1101 = vmatprep.subr.bf16.mxu1 %v2067_v53  ;;  %1144 = vmatprep.subr.bf16.mxu0 %v2069_v54  ;;  %v2445_v52 = vld [vmem:[%s3154_s5 + $0x98] sm:$0xff]   ;;  %v2447_v53 = vld [vmem:[%s3154_s5 + $0xd0] sm:$0xff]  }
 0x11e   :  { %v2449_v54 = vld [vmem:[%s3154_s5 + $0x90] sm:$0xff]  }
 0x120   :  { %1102 = vmatpush1.bf16.msra.mxu1 %v2066_v59  ;;  %1145 = vmatpush1.bf16.msra.mxu0 %v2068_v60  ;;  %v2459_v59 = vld [vmem:[%s3154_s5 + $0x1f8] sm:$0xff]   ;;  %v647_v60 = vlaneseq }
 0x121   :  { %1103 = vmatprep.subr.bf16.mxu1 %v2059_v61  ;;  %1146 = vmatprep.subr.bf16.mxu0 %v2061_v62 }
 0x122   :  { %v3028_v61 = vshrl.u32 %v647_v60, 7 }
 0x124   :  { %1104 = vmatpush1.bf16.msra.mxu1 %v2058_v3  ;;  %1147 = vmatpush1.bf16.msra.mxu0 %v2060_v4  ;;  %v653_v62 = vsub.s32 1, %v3028_v61  ;;  %v661_v63 = vsub.s32 3, %v3028_v61  ;;  %v649_v0 = vsub.s32 0, %v3028_v61  ;;  %v657_v2 = vsub.s32 2, %v3028_v61  ;;  %v3037_v4 = vld [vmem:[%s3156_s4] sm:$0xff] }
 0x125   :  { %1105 = vmatprep.subr.bf16.mxu1 %v2051_v5  ;;  %1148 = vmatprep.subr.bf16.mxu0 %v2053_v6 }
 0x126   :  { %v654_v7 = vrot.slane %v3037_v4, %v653_v62  ;;  %v662_v8 = vrot.slane %v3037_v4, %v661_v63  ;;  %v650_v9 = vrot.slane %v3037_v4, %v649_v0  ;;  %v658_v10 = vrot.slane %v3037_v4, %v657_v2  ;;  %v2486_v62 = vld [vmem:[%s3154_s5 + $0x140] sm:$0xff]  }
 0x128   :  { %1106 = vmatpush1.bf16.msra.mxu1 %v2050_v11  ;;  %1149 = vmatpush1.bf16.msra.mxu0 %v2052_v12 }
 0x129   :  { %1107 = vmatprep.subr.bf16.mxu1 %v2043_v13  ;;  %1150 = vmatprep.subr.bf16.mxu0 %v2045_v14 }
 0x12c   :  { %1108 = vmatpush1.bf16.msra.mxu1 %v2042_v15  ;;  %1151 = vmatpush1.bf16.msra.mxu0 %v2044_v16 }
 0x12d   :  { %2338 = vmatprep.subr.bf16.mxu1 %v2491_v19  ;;  %2250 = vmatprep.subr.bf16.mxu0 %v2426_v17 }
 0x12f   :  { %1126 = vmatmul.mubr.bf16.vlgmr.msra.gmra.mxu1 %v2823_v28  ;;  %1169 = vmatmul.mubr.bf16.vlgmr.msra.gmra.mxu0 %v2823_v28 }
 0x130   :  { %2339 = vmatpush3.bf16.msra.mxu1 %v2418_v18  ;;  %2354 = vmatprep.mubr.msk.bf16.mxu1 %vm2492_vm0, %v2491_v19 }
 0x131   :  { %2340 = vmatprep.subr.bf16.mxu1 %v2491_v19  ;;  %2251 = vmatpush3.bf16.msra.mxu0 %v2428_v20 }
 0x132   :  { %2252 = vmatprep.subr.bf16.mxu0 %v2430_v21 }
 0x134   :  { %2341 = vmatpush3.bf16.msra.mxu1 %v2419_v22 }
 0x135   :  { %2342 = vmatprep.subr.bf16.mxu1 %v2491_v19  ;;  %2253 = vmatpush3.bf16.msra.mxu0 %v2432_v23 }
 0x136   :  { %2254 = vmatprep.subr.bf16.mxu0 %v2434_v24 }
 0x138   :  { %2343 = vmatpush3.bf16.msra.mxu1 %v2420_v25  ;;  %v2460_v25 = vld [vmem:[%s3154_s5 + $0x138] sm:$0xff]  }
 0x139   :  { %2344 = vmatprep.subr.bf16.mxu1 %v2491_v19  ;;  %2255 = vmatpush3.bf16.msra.mxu0 %v2436_v26  ;;  %v2461_v26 = vld [vmem:[%s3154_s5 + $0x1b8] sm:$0xff]  }
 0x13a   :  { %2256 = vmatprep.subr.bf16.mxu0 %v2438_v27 }
 0x13c   :  { %2345 = vmatpush3.bf16.msra.mxu1 %v2421_v29 }
 0x13d   :  { %2346 = vmatprep.subr.bf16.mxu1 %v2491_v19  ;;  %2257 = vmatpush3.bf16.msra.mxu0 %v2440_v30  ;;  %v2462_v30 = vld [vmem:[%s3154_s5 + $0x170] sm:$0xff]  }
 0x13e   :  { %2258 = vmatprep.subr.bf16.mxu0 %v2442_v31  ;;  %v2463_v31 = vld [vmem:[%s3154_s5 + $0x1f0] sm:$0xff]  }
 0x140   :  { %2347 = vmatpush3.bf16.msra.mxu1 %v2422_v32  ;;  %v2464_v32 = vld [vmem:[%s3154_s5 + $0x130] sm:$0xff]  }
 0x141   :  { %2348 = vmatprep.subr.bf16.mxu1 %v2491_v19  ;;  %2259 = vmatpush3.bf16.msra.mxu0 %v2444_v33  ;;  %v2465_v33 = vld [vmem:[%s3154_s5 + $0x1b0] sm:$0xff]  }
 0x142   :  { %2260 = vmatprep.subr.bf16.mxu0 %v2446_v34  ;;  %v2466_v34 = vld [vmem:[%s3154_s5 + $0x168] sm:$0xff]  }
 0x144   :  { %2349 = vmatpush3.bf16.msra.mxu1 %v2423_v35  ;;  %v2467_v35 = vld [vmem:[%s3154_s5 + $0x1e8] sm:$0xff]  }
 0x145   :  { %2350 = vmatprep.subr.bf16.mxu1 %v2491_v19  ;;  %2261 = vmatpush3.bf16.msra.mxu0 %v2448_v41  ;;  %v2473_v41 = vld [vmem:[%s3154_s5 + $0x1a0] sm:$0xff]  }
 0x146   :  { %2262 = vmatprep.subr.bf16.mxu0 %v2450_v44  ;;  %v2476_v44 = vld [vmem:[%s3154_s5 + $0x118] sm:$0xff]  }
 0x148   :  { %2351 = vmatpush3.bf16.msra.mxu1 %v2424_v36  ;;  %v2468_v36 = vld [vmem:[%s3154_s5 + $0x128] sm:$0xff]  }
 0x149   :  { %2352 = vmatprep.subr.bf16.mxu1 %v2491_v19  ;;  %2263 = vmatpush3.bf16.msra.mxu0 %v2452_v45  ;;  %v2477_v45 = vld [vmem:[%s3154_s5 + $0x198] sm:$0xff]  }
 0x14a   :  { %2264 = vmatprep.subr.bf16.mxu0 %v2454_v47  ;;  %v2480_v47 = vld [vmem:[%s3154_s5 + $0x110] sm:$0xff]  }
 0x14c   :  { %2353 = vmatpush3.bf16.msra.mxu1 %v2425_v37  ;;  %v2469_v37 = vld [vmem:[%s3154_s5 + $0x1a8] sm:$0xff]  }
 0x14d   :  { %2272 = vmatprep.subr.bf16.mxu1 %v2427_v38  ;;  %2265 = vmatpush3.bf16.msra.mxu0 %v2456_v48  ;;  %v2470_v38 = vld [vmem:[%s3154_s5 + $0x160] sm:$0xff]   ;;  %v2481_v48 = vld [vmem:[%s3154_s5 + $0x190] sm:$0xff]  }
 0x14e   :  { %2294 = vmatprep.subr.bf16.mxu0 %v2458_v51  ;;  %v669_v51 = vsub.s32 5, %v3028_v61 }
 0x14f   :  { %2355 = vmatmul.mubr.bf16.vlgmr.msra.gmra.mxu1 %v2823_v28  ;;  %v2437_v28 = vld [vmem:[%s3154_s5 + $0xa8] sm:$0xff]  }
 0x150   :  { %2273 = vmatpush3.bf16.msra.mxu1 %v2429_v39  ;;  %v2471_v39 = vld [vmem:[%s3154_s5 + $0x1e0] sm:$0xff]   ;;  %v670_v63 = vrot.slane %v3037_v4, %v669_v51 }
 0x151   :  { %2274 = vmatprep.subr.bf16.mxu1 %v2431_v40  ;;  %v2472_v40 = vld [vmem:[%s3154_s5 + $0x120] sm:$0xff]  }
 0x154   :  { %2275 = vmatpush3.bf16.msra.mxu1 %v2433_v42  ;;  %v2474_v42 = vld [vmem:[%s3154_s5 + $0x158] sm:$0xff]  }
 0x155   :  { %2276 = vmatprep.subr.bf16.mxu1 %v2435_v43  ;;  %v2475_v43 = vld [vmem:[%s3154_s5 + $0x1d8] sm:$0xff]  }
 0x158   :  { %2277 = vmatpush3.bf16.msra.mxu1 %v2437_v28  ;;  %v2478_v28 = vld [vmem:[%s3154_s5 + $0x150] sm:$0xff]  }
 0x159   :  { %2278 = vmatprep.subr.bf16.mxu1 %v2439_v46  ;;  %v2479_v46 = vld [vmem:[%s3154_s5 + $0x1d0] sm:$0xff]  }
 0x15c   :  { %2279 = vmatpush3.bf16.msra.mxu1 %v2441_v49  ;;  %v2482_v49 = vld [vmem:[%s3154_s5 + $0x148] sm:$0xff]  }
 0x15d   :  { %2280 = vmatprep.subr.bf16.mxu1 %v2443_v50  ;;  %v2483_v50 = vld [vmem:[%s3154_s5 + $0x1c8] sm:$0xff]  }
 0x160   :  { %2281 = vmatpush3.bf16.msra.mxu1 %v2445_v52  ;;  %v677_v52 = vsub.s32 7, %v3028_v61 }
 0x161   :  { %2282 = vmatprep.subr.bf16.mxu1 %v2447_v53  ;;  %v665_v53 = vsub.s32 4, %v3028_v61 }
 0x162   :  { %v678_v0 = vrot.slane %v3037_v4, %v677_v52 }
 0x164   :  { %2283 = vmatpush3.bf16.msra.mxu1 %v2449_v54 }
 0x165   :  { %2284 = vmatprep.subr.bf16.mxu1 %v2451_v55  ;;  %v673_v55 = vsub.s32 6, %v3028_v61  ;;  %v2487_v61 = vld [vmem:[%s3154_s5 + $0x1c0] sm:$0xff]  }
 0x167   :  { %v674_v2 = vrot.slane %v3037_v4, %v673_v55 }
 0x168   :  { %2285 = vmatpush3.bf16.msra.mxu1 %v2453_v56 }
 0x169   :  { %2286 = vmatprep.subr.bf16.mxu1 %v2455_v57  ;;  %v2484_v57 = vld [vmem:[%s3154_s5 + $0x108] sm:$0xff]  }
 0x16c   :  { %2287 = vmatpush3.bf16.msra.mxu1 %v2457_v58  ;;  %v2485_v58 = vld [vmem:[%s3154_s5 + $0x188] sm:$0xff]  }
 0x16d   :  { %2316 = vmatprep.subr.bf16.mxu1 %v2459_v59 }
 0x1cf   :  { %v1041_v1 = vpop.f32.mrf.mxu1  ;;  %v1084_v3 = vpop.f32.mrf.mxu0 }
 0x1d0   :  { %v1042_v21 = vadd.f32 %v1041_v1, %v650_v9  ;;  %v1085_v22 = vadd.f32 %v1084_v3, %v658_v10  ;;  %v666_v1 = vrot.slane %v3037_v4, %v665_v53 }
 0x1d1   :  { %v1043_v5 = vpop.f32.mrf.mxu1  ;;  %v1086_v6 = vpop.f32.mrf.mxu0 }
 0x1d2   :  { %v1044_v17 = vadd.f32 %v1043_v5, %v654_v7  ;;  %v1087_v18 = vadd.f32 %v1086_v6, %v662_v8  ;;  %v2488_v6 = vld [vmem:[%s3154_s5 + $0x100] sm:$0xff]  }
 0x1d3   :  { %v1045_v11 = vpop.f32.mrf.mxu1  ;;  %v1088_v12 = vpop.f32.mrf.mxu0 }
 0x1d4   :  { %v1046_v13 = vadd.f32 %v1045_v11, %v650_v9  ;;  %v1089_v14 = vadd.f32 %v1088_v12, %v658_v10 }
 0x1d5   :  { %v1047_v15 = vpop.f32.mrf.mxu1  ;;  %v1090_v16 = vpop.f32.mrf.mxu0 }
 0x1d6   :  { %v1048_v19 = vadd.f32 %v1047_v15, %v654_v7  ;;  %v1091_v20 = vadd.f32 %v1090_v16, %v662_v8  ;;  %v1179_v27 = vpack.c.bf16 %v1046_v13, %v1042_v21  ;;  %v1181_v29 = vpack.c.bf16 %v1089_v14, %v1085_v22  ;;  %v2489_v7 = vld [vmem:[%s3154_s5 + $0x180] sm:$0xff]  }
 0x1d8   :  { %v1180_v23 = vpack.c.bf16 %v1048_v19, %v1044_v17  ;;  %v1182_v24 = vpack.c.bf16 %v1091_v20, %v1087_v18 }
 0x1da   :  { %1836 = vmatprep.mubr.bf16.mxu0 %v1180_v23  ;;  %1877 = vmatprep.mubr.bf16.mxu1 %v1182_v24 }
 0x1db   :  { %1837 = vmatmul.mubr.bf16.vlgmr.msra.gmra.mxu0 %v1179_v27  ;;  %1878 = vmatmul.mubr.bf16.vlgmr.msra.gmra.mxu1 %v1181_v29 }
 0x1dc   :  { %2295 = vmatpush3.bf16.msra.mxu0 %v2460_v25  ;;  %2317 = vmatpush3.bf16.msra.mxu1 %v2461_v26 }
 0x1dd   :  { %2296 = vmatprep.subr.bf16.mxu0 %v2462_v30  ;;  %2318 = vmatprep.subr.bf16.mxu1 %v2463_v31 }
 0x1e0   :  { %2297 = vmatpush3.bf16.msra.mxu0 %v2464_v32  ;;  %2319 = vmatpush3.bf16.msra.mxu1 %v2465_v33 }
 0x1e1   :  { %2298 = vmatprep.subr.bf16.mxu0 %v2466_v34  ;;  %2320 = vmatprep.subr.bf16.mxu1 %v2467_v35 }
 0x1e4   :  { %2299 = vmatpush3.bf16.msra.mxu0 %v2468_v36  ;;  %2321 = vmatpush3.bf16.msra.mxu1 %v2469_v37 }
 0x1e5   :  { %2300 = vmatprep.subr.bf16.mxu0 %v2470_v38  ;;  %2322 = vmatprep.subr.bf16.mxu1 %v2471_v39 }
 0x1e8   :  { %2301 = vmatpush3.bf16.msra.mxu0 %v2472_v40  ;;  %2323 = vmatpush3.bf16.msra.mxu1 %v2473_v41 }
 0x1e9   :  { %2302 = vmatprep.subr.bf16.mxu0 %v2474_v42  ;;  %2324 = vmatprep.subr.bf16.mxu1 %v2475_v43 }
 0x1ec   :  { %2303 = vmatpush3.bf16.msra.mxu0 %v2476_v44  ;;  %2325 = vmatpush3.bf16.msra.mxu1 %v2477_v45 }
 0x1ed   :  { %2304 = vmatprep.subr.bf16.mxu0 %v2478_v28  ;;  %2326 = vmatprep.subr.bf16.mxu1 %v2479_v46 }
 0x1ef   :  { %v1127_v54 = vpop.f32.mrf.mxu1  ;;  %v1170_v56 = vpop.f32.mrf.mxu0 }
 0x1f0   :  { %2305 = vmatpush3.bf16.msra.mxu0 %v2480_v47  ;;  %2327 = vmatpush3.bf16.msra.mxu1 %v2481_v48  ;;  %v1128_v15 = vadd.f32 %v1127_v54, %v666_v1  ;;  %v1171_v16 = vadd.f32 %v1170_v56, %v674_v2 }
 0x1f1   :  { %v1129_v59 = vpop.f32.mrf.mxu1  ;;  %v1172_v60 = vpop.f32.mrf.mxu0  ;;  %2306 = vmatprep.subr.bf16.mxu0 %v2482_v49  ;;  %2328 = vmatprep.subr.bf16.mxu1 %v2483_v50  ;;  %v2174_v49 = vld [vmem:[%s3157_s7] ss:$0 sm:$0xff] }
 0x1f2   :  { %v1130_v12 = vadd.f32 %v1129_v59, %v670_v63  ;;  %v1173_v4 = vadd.f32 %v1172_v60, %v678_v0 }
 0x1f3   :  { %v1131_v3 = vpop.f32.mrf.mxu1  ;;  %v1174_v5 = vpop.f32.mrf.mxu0 }
 0x1f4   :  { %2307 = vmatpush3.bf16.msra.mxu0 %v2484_v57  ;;  %2329 = vmatpush3.bf16.msra.mxu1 %v2485_v58  ;;  %v1132_v8 = vadd.f32 %v1131_v3, %v666_v1  ;;  %v1175_v9 = vadd.f32 %v1174_v5, %v674_v2 }
 0x1f5   :  { %v1133_v10 = vpop.f32.mrf.mxu1  ;;  %v1176_v11 = vpop.f32.mrf.mxu0  ;;  %2308 = vmatprep.subr.bf16.mxu0 %v2486_v62  ;;  %2330 = vmatprep.subr.bf16.mxu1 %v2487_v61 }
 0x1f6   :  { %v1134_v13 = vadd.f32 %v1133_v10, %v670_v63  ;;  %v1177_v14 = vadd.f32 %v1176_v11, %v678_v0  ;;  %v1183_v19 = vpack.c.bf16 %v1132_v8, %v1128_v15  ;;  %v1185_v20 = vpack.c.bf16 %v1175_v9, %v1171_v16 }
 0x1f8   :  { %v1184_v17 = vpack.c.bf16 %v1134_v13, %v1130_v12  ;;  %v1186_v18 = vpack.c.bf16 %v1177_v14, %v1173_v4  ;;  %2309 = vmatpush3.bf16.msra.mxu0 %v2488_v6  ;;  %2331 = vmatpush3.bf16.msra.mxu1 %v2489_v7 }
 0x1fa   :  { %1918 = vmatprep.mubr.bf16.mxu0 %v1184_v17  ;;  %1959 = vmatprep.mubr.bf16.mxu1 %v1186_v18 }
 0x1fb   :  { %1919 = vmatmul.mubr.bf16.vlgmr.msra.gmra.mxu0 %v1183_v19  ;;  %1960 = vmatmul.mubr.bf16.vlgmr.msra.gmra.mxu1 %v1185_v20 }
 0x20f   :  { %v1413_v21 = vpop.f32.mrf.mxu1 }
 0x211   :  { %v2356_v22 = vpop.f32.mrf.mxu1 }
 0x213   :  { %v1416_v23 = vpop.f32.mrf.mxu1 }
 0x215   :  { %v2357_v24 = vpop.f32.mrf.mxu1 }
 0x29b   :  { %v2266_v25 = vpop.f32.mrf.mxu0  ;;  %v2288_v26 = vpop.f32.mrf.mxu1 }
 0x29d   :  { %v2267_v27 = vpop.f32.mrf.mxu0  ;;  %v2289_v29 = vpop.f32.mrf.mxu1 }
 0x29e   :  { %v2268_v32 = vadd.f32 %v2267_v27, %v2266_v25  ;;  %v2290_v39 = vadd.f32 %v2289_v29, %v2288_v26 }
 0x29f   :  { %v2269_v30 = vpop.f32.mrf.mxu0  ;;  %v2291_v31 = vpop.f32.mrf.mxu1 }
 0x2a0   :  { %v1839_v35 = vadd.f32 %v2268_v32, %v1413_v21 }
 0x2a1   :  { %v2270_v33 = vpop.f32.mrf.mxu0  ;;  %v2292_v34 = vpop.f32.mrf.mxu1 }
 0x2a2   :  { %v2271_v36 = vadd.f32 %v2270_v33, %v2269_v30  ;;  %v1880_v42 = vadd.f32 %v2290_v39, %v1839_v35  ;;  %v2293_v46 = vadd.f32 %v2292_v34, %v2291_v31 }
 0x2a4   :  { %v1842_v43 = vadd.f32 %v2271_v36, %v1416_v23 }
 0x2a6   :  { %v1883_v52 = vadd.f32 %v2293_v46, %v1842_v43 }
 0x2bb   :  { %v2310_v37 = vpop.f32.mrf.mxu0  ;;  %v2332_v38 = vpop.f32.mrf.mxu1 }
 0x2bd   :  { %v2311_v40 = vpop.f32.mrf.mxu0  ;;  %v2333_v41 = vpop.f32.mrf.mxu1 }
 0x2be   :  { %v2312_v44 = vadd.f32 %v2311_v40, %v2310_v37  ;;  %v2334_v48 = vadd.f32 %v2333_v41, %v2332_v38 }
 0x2bf   :  { %v2313_v45 = vpop.f32.mrf.mxu0  ;;  %v2335_v28 = vpop.f32.mrf.mxu1 }
 0x2c0   :  { %v1921_v47 = vadd.f32 %v2312_v44, %v1880_v42 }
 0x2c1   :  { %v2314_v50 = vpop.f32.mrf.mxu0  ;;  %v2336_v51 = vpop.f32.mrf.mxu1 }
 0x2c2   :  { %v1962_v53 = vadd.f32 %v2334_v48, %v1921_v47  ;;  %v2315_v54 = vadd.f32 %v2314_v50, %v2313_v45  ;;  %v2337_v57 = vadd.f32 %v2336_v51, %v2335_v28 }
 0x2c4   :  { %v1975_v55 = vadd.f32 %v2174_v49, %v1962_v53  ;;  %v1924_v56 = vadd.f32 %v2315_v54, %v1883_v52 }
 0x2c6   :  { %1977 = vst [vmem:[%s3158_s8] sm:$0xff] %v1975_v55  ;;  %v1965_v58 = vadd.f32 %v2337_v57, %v1924_v56 }
 0x2c8   :  { %v1976_v59 = vadd.f32 %v2174_v49, %v1965_v58 }
 0x2ca   :  { %1978 = vst [vmem:[%s3158_s8 + $0x8] sm:$0xff] %v1976_v59 }

</bundles_post_ra>
